<compile_context>
chip_gen: v6e
topology: v6e:2x2x1
jax: 0.10.0
libtpu: 0.0.40
codegen_flags: <defaults>
</compile_context>

<pallas_src>
import functools

import jax
import jax.numpy as jnp
from jax.experimental import pallas as pl
from jax.experimental.pallas import tpu as pltpu


_SMALL_BYPASS_BYTES = 1 << 20     # below this jnp.transpose wins (launch cost)
_COPY_CAP = 2 << 20               # padded in+out tile footprint, outer-only transpose
_COPY_TARGET = 1 << 20
_GEN_CAP = 1 << 20                # padded in+out tile footprint, minor-dim transpose
_GEN_TARGET = 512 << 10


def _prod(xs):
    out = 1
    for v in xs:
        out *= int(v)
    return out


def _cdiv(a, b):
    return -(-a // b)


def _round_up(x, m):
    return _cdiv(x, m) * m


def _largest_divisor(size, limit):
    """Largest divisor of `size` that is <= limit (always >= 1)."""
    limit = min(int(limit), int(size))
    if limit <= 1:
        return 1
    best = 1
    i = 1
    while i * i <= size:
        if size % i == 0:
            if i <= limit and i > best:
                best = i
            j = size // i
            if j <= limit and j > best:
                best = j
        i += 1
    return best


def _vmem_capacity_bytes():
    """Per-generation VMEM capacity (v7x: 64 MiB, v4/v5/v6: 128 MiB)."""
    try:
        cap = getattr(pltpu.get_tpu_info(), "vmem_capacity_bytes", None)
        if cap:
            return int(cap)
    except Exception:
        pass
    try:
        kind = jax.devices()[0].device_kind.lower()
    except Exception:
        kind = ""
    if ("v4" in kind) or ("v5" in kind) or ("v6" in kind):
        return 128 << 20
    return 64 << 20  # conservative (v7x / unknown)


def _padded_bytes(block, itemsize, sub_mult):
    """VMEM footprint of a tile: minor dim padded to 128 lanes, second-minor
    to the sublane multiple.  This (not prod(block)*itemsize) is what the
    buffers and the in-kernel transpose value actually cost."""
    bl = list(block)
    if len(bl) >= 1:
        bl[-1] = _round_up(bl[-1], 128)
    if len(bl) >= 2:
        bl[-2] = _round_up(bl[-2], sub_mult)
    return _prod(bl) * itemsize


def _transpose_kernel(x_ref, o_ref, *, perm):
    # In-tile permute.  On the trailing-axis-fixed path this only moves outer
    # axes (cheap sublane/VMEM moves); on the general path it is the
    # unavoidable minor-dim transpose, restricted to the tile's non-unit axes.
    o_ref[...] = jnp.transpose(x_ref[...], perm)


def _copy_kernel(x_ref, o_ref):
    # Pure-DMA path: no non-unit tile axis moves, the permutation lives
    # entirely in the index maps; only size-1 dims change position.
    o_ref[...] = x_ref[...].reshape(o_ref.shape)


def _permute_pallas(x, perm):
    """pallas_call for a canonical (no mergeable adjacent runs) permutation."""
    n = x.ndim
    shape = tuple(int(s) for s in x.shape)
    inv = [0] * n
    for k, p in enumerate(perm):
        inv[p] = k
    itemsize = jnp.dtype(x.dtype).itemsize
    out_shape = tuple(shape[p] for p in perm)
    total_bytes = _prod(shape) * itemsize

    # Sublane granularity: f32 -> 8, bf16 -> 16, int8/fp8 -> 32.
    sub_mult = 8 * max(1, 4 // itemsize)

    copy_like = (perm[-1] == n - 1)          # trailing (lane) axis untouched
    cap = _COPY_CAP if copy_like else _GEN_CAP
    target = _COPY_TARGET if copy_like else _GEN_TARGET

    # Axes that must stay whole or aligned: minor & second-minor of both the
    # input tile and the output tile.  Everything else goes to the grid
    # (block 1) unless cheap to pack (growth below).
    lane_axes = {n - 1, perm[-1]}
    constrained = set(lane_axes)
    constrained.add(n - 2)
    constrained.add(perm[-2])

    blocks = [shape[i] if i in constrained else 1 for i in range(n)]

    def footprint():
        in_b = _padded_bytes(blocks, itemsize, sub_mult)
        out_b = _padded_bytes([blocks[p] for p in perm], itemsize, sub_mult)
        return in_b + out_b

    def shrink(order):
        for ax, mult in order:
            while footprint() > cap and blocks[ax] > mult:
                new = max(mult, ((blocks[ax] // 2) // mult) * mult)
                if new >= blocks[ax]:
                    break
                blocks[ax] = new

    # Shrink second-minor-only axes first (sublane-aligned), then the input
    # lane axis, and the output lane axis last (lane-dense stores are the
    # biggest measured lever).
    second_minor_only = sorted(constrained - lane_axes)
    order = [(ax, sub_mult) for ax in second_minor_only]
    if perm[-1] != n - 1:
        order += [(n - 1, 128), (perm[-1], 128)]
    else:
        order += [(n - 1, 128)]
    shrink(order)
    if footprint() > cap and sub_mult > 8:
        shrink([(ax, 8) for ax in second_minor_only])  # packed-dtype relief

    # Grow cheap axes so each grid step moves >= ~0.5-1 MiB (amortizes the
    # ~0.35us/step overhead).  Only axes that do not make the in-tile
    # transpose harder are packed: non-moving (batch) axes always, any outer
    # axis when the lane axis stays put (outer-only transpose).
    growable = [i for i in range(n)
                if i not in constrained and (copy_like or inv[i] == i)]
    for ax in sorted(growable, reverse=True):          # innermost first
        if footprint() >= target:
            break
        limit = max(1, cap // footprint())
        blocks[ax] = _largest_divisor(shape[ax], limit)

    in_block = tuple(blocks)
    out_block = tuple(blocks[p] for p in perm)

    # Pure DMA if no non-unit tile axis actually moves.
    nonunit = [i for i in range(n) if blocks[i] > 1]
    if [p for p in perm if blocks[p] > 1] == nonunit:
        kernel = _copy_kernel
    else:
        kernel = functools.partial(_transpose_kernel, perm=perm)

    # Grid over output axes with >1 block (ordered by output axis so
    # consecutive steps write consecutive output tiles).
    nb_out = [_cdiv(out_shape[k], out_block[k]) for k in range(n)]
    grid_axes = [k for k in range(n) if nb_out[k] > 1]
    if grid_axes:
        pos = {k: i for i, k in enumerate(grid_axes)}

        def out_map(*g):
            return tuple(g[pos[k]] if k in pos else 0 for k in range(n))

        def in_map(*g):
            # input axis i lives at output axis inv[i]
            return tuple(g[pos[inv[i]]] if inv[i] in pos else 0
                         for i in range(n))

        grid = tuple(nb_out[k] for k in grid_axes)
    else:
        def out_map(*g):
            return (0,) * n

        def in_map(*g):
            return (0,) * n

        grid = (1,)

    # Explicit scoped-VMEM limit: double-buffered padded tiles plus relayout
    # headroom, clamped to half this generation's physical capacity.
    vmem_cap = _vmem_capacity_bytes()
    need = 3 * footprint() + (8 << 20)
    vmem_limit = int(min(vmem_cap // 2, max(32 << 20, need)))

    return pl.pallas_call(
        kernel,
        out_shape=jax.ShapeDtypeStruct(out_shape, x.dtype),
        grid_spec=pltpu.PrefetchScalarGridSpec(
            num_scalar_prefetch=0,
            grid=grid,
            in_specs=[pl.BlockSpec(in_block, in_map)],
            out_specs=pl.BlockSpec(out_block, out_map),
        ),
        compiler_params=pltpu.CompilerParams(
            dimension_semantics=("parallel",) * len(grid),
            vmem_limit_bytes=vmem_limit,
        ),
        cost_estimate=pl.CostEstimate(
            flops=0, transcendentals=0, bytes_accessed=2 * total_bytes),
    )(x)


def custom_permute(x, new_dims):
    """Pallas implementation of CustomPermute(*dims)(x) == x.permute(dims)."""
    n = x.ndim
    if n == 0:
        return x
    perm0 = tuple(int(d) % n for d in new_dims)
    assert sorted(perm0) == list(range(n)), f"invalid permutation {new_dims}"
    if perm0 == tuple(range(n)):
        return x  # identity permute (torch returns a view)

    shape0 = tuple(int(s) for s in x.shape)
    out_shape0 = tuple(shape0[p] for p in perm0)
    total_bytes = _prod(shape0) * jnp.dtype(x.dtype).itemsize
    if total_bytes <= _SMALL_BYPASS_BYTES:
        # Kernel launch + pipeline prologue dominates at KB scale.
        return jnp.transpose(x, perm0)

    # Canonicalize: merge runs of input axes that stay adjacent & in order in
    # the output.  The merging reshape and the final un-merging reshape only
    # combine / split contiguous dims, so both are free.
    groups = []                      # groups of input axes, in OUTPUT order
    for p in perm0:
        if groups and p == groups[-1][-1] + 1:
            groups[-1].append(p)
        else:
            groups.append([p])
    groups_in = sorted(groups, key=lambda g: g[0])       # in INPUT order
    merged_shape = tuple(_prod([shape0[a] for a in g]) for g in groups_in)
    start_to_idx = {g[0]: i for i, g in enumerate(groups_in)}
    perm = tuple(start_to_idx[g[0]] for g in groups)

    x_m = x if merged_shape == shape0 else x.reshape(merged_shape)
    out_m = _permute_pallas(x_m, perm)
    return out_m.reshape(out_shape0)


class CustomPermute:
    """JAX mirror of the PyTorch module: stores dims, applies permute."""

    def __init__(self, *args):
        self.new_dims = args

    def __call__(self, x):
        return custom_permute(x, self.new_dims)


if __name__ == "__main__":
    key = jax.random.PRNGKey(0)
    k1, k2, k3, k4 = jax.random.split(key, 4)

    # --- Spec-sized inputs (small -> bypass path; checks wrapper semantics).
    x4 = jax.random.normal(k1, (2, 4, 16, 16), dtype=jnp.float32)
    y4 = jax.block_until_ready(CustomPermute(0, 2, 3, 1)(x4))
    assert y4.shape == (2, 16, 16, 4)
    assert jnp.array_equal(y4, jnp.transpose(x4, (0, 2, 3, 1)))

    x3 = jax.random.normal(k2, (2, 8, 32), dtype=jnp.float32)
    y3 = jax.block_until_ready(CustomPermute(0, 2, 1)(x3))
    assert y3.shape == (2, 32, 8)
    assert jnp.array_equal(y3, jnp.transpose(x3, (0, 2, 1)))

    # --- Pallas path, trailing axes untouched: identity suffix merges into one
    # lane-dense trailing dim, outer-axis tile transpose, multi-step grid.
    xa = jax.random.normal(k3, (8, 64, 32, 128), dtype=jnp.float32)   # 8 MiB
    ya = jax.block_until_ready(custom_permute(xa, (1, 0, 2, 3)))
    assert ya.shape == (64, 8, 32, 128)
    assert jnp.array_equal(ya, jnp.transpose(xa, (1, 0, 2, 3)))

    # --- Pallas general path: NCHW -> NHWC style (minor-dim transpose).
    xb = jax.random.normal(k4, (4, 8, 256, 384), dtype=jnp.float32)   # 12 MiB
    yb = jax.block_until_ready(custom_permute(xb, (0, 2, 3, 1)))
    assert yb.shape == (4, 256, 384, 8)
    assert jnp.array_equal(yb, jnp.transpose(xb, (0, 2, 3, 1)))

    # --- Pallas general path where axis 0 moves (canonicalizes to a pure 2-D
    # transpose with a narrow output minor dim).
    yc = jax.block_until_ready(custom_permute(xb, (1, 2, 3, 0)))
    assert yc.shape == (8, 256, 384, 4)
    assert jnp.array_equal(yc, jnp.transpose(xb, (1, 2, 3, 0)))

    print("KERNEL_OK")
</pallas_src>

<mosaic_0001>
module attributes {stable_mosaic.version = 11 : i64} {
  func.func @_transpose_kernel(%arg0: i32, %arg1: memref<8x8x4096xf32, #tpu.memory_space<vmem>>, %arg2: memref<8x8x4096xf32, #tpu.memory_space<vmem>>) attributes {dimension_semantics = [#tpu.dimension_semantics<parallel>], iteration_bounds = array<i64: 8>, scalar_prefetch = 0 : i64, scratch_operands = 0 : i64, tpu.core_type = #tpu.core_type<tc>, window_params = [{transform_indices = @transform_0, window_bounds = array<i64: 8, 8, 4096>}, {transform_indices = @transform_1, window_bounds = array<i64: 8, 8, 4096>}]} {
    %c0 = arith.constant 0 : index
    %c0_0 = arith.constant 0 : index
    %c0_1 = arith.constant 0 : index
    %0 = vector.load %arg1[%c0, %c0_0, %c0_1] : memref<8x8x4096xf32, #tpu.memory_space<vmem>>, vector<8x8x4096xf32>
    %1 = tpu.transpose %0, [1, 0, 2] : vector<8x8x4096xf32> -> vector<8x8x4096xf32>
    %c0_2 = arith.constant 0 : index
    %c0_3 = arith.constant 0 : index
    %c0_4 = arith.constant 0 : index
    %2 = vector.load %arg2[%c0_2, %c0_3, %c0_4] : memref<8x8x4096xf32, #tpu.memory_space<vmem>>, vector<8x8x4096xf32>
    tpu.vector_store %arg2[%c0_2, %c0_3, %c0_4], %1 {strides = array<i32>} : memref<8x8x4096xf32, #tpu.memory_space<vmem>>, vector<8x8x4096xf32>,
    return
  }
  func.func @transform_0(%arg0: i32) -> (i32, i32, i32) {
    %c0_i32 = arith.constant 0 : i32
    %c0_i32_0 = arith.constant 0 : i32
    %c0_i32_1 = arith.constant 0 : i32
    return %c0_i32, %arg0, %c0_i32_0 : i32, i32, i32
  }
  func.func @transform_1(%arg0: i32) -> (i32, i32, i32) {
    %c0_i32 = arith.constant 0 : i32
    %c0_i32_0 = arith.constant 0 : i32
    %c0_i32_1 = arith.constant 0 : i32
    return %arg0, %c0_i32, %c0_i32_0 : i32, i32, i32
  }
}

</mosaic_0001>

<bundles_post_ra>
// kernel: tpu_custom_call.1
= control target key start
LH: loop header
LB: loop body
LE: loop exit
PB: predicated region body
PF: predicated region fallthrough
CT: control target
= control target key end

     0   :  { %6 = vsyncpa [#allocation3], 0  ;;  %s9015_s0 = inlined_call_operand.hbm [shape: f32[8,64,4096], index: 0, kind: input, shape index: {}]   ;;  %s9016_s1 = inlined_call_operand.hbm [shape: f32[64,8,4096], index: 1, kind: output, shape index: {}]  }
   0x1   :  { %8 = vsyncpa [#allocation3 + $0x1], 0 }
   0x2   :  { %9 = vsyncpa [#allocation4], 0 }
   0x3   :  { %11 = vsyncpa [#allocation4 + $0x1], 0  ;;  %s5528_s6 = smov 0   ;;  %s5530_s7 = smov 0  }
   0x4   :  { %s5532_s8 = smov 0   ;;  %s5534_s9 = smov 0  }
   0x5 LB: > { %s5549_s10 = sadd.s32 4294967295, %s5507_s9   ;;  %s5088_s11 = sadd.s32 4294967294, %s5507_s9   ;;  %s5507_s9 = sphi %s5534_s9, %s9956_s9   ;;  %s5503_s8 = sphi %s5532_s8, %s9955_s8   ;;  %s5499_s7 = sphi %s5530_s7, %s9954_s7   ;;  %s5495_s6 = sphi %s5528_s6, %s9953_s6  }
   0x6   : > { %s5553_s12 = sadd.s32 1, %s5507_s9   ;;  %s24_s13 = sadd.s32 1, %s5503_s8 }
   0x7   : > { %s21_s14 = ssub.s32 %s5507_s9, %s5553_s12  ;;  %p31_p0 = scmp.ne.s32.totalorder %s5503_s8, %s5499_s7 }
   0x8   : > { %p22_p1 = scmp.eq.s32.totalorder %s21_s14, 0  ;;  %p32_p2 = scmp.eq.s32.totalorder %s5507_s9, 0 }
   0x9   : > { %p37_p3 = scmp.ne.s32.totalorder %s5499_s7, %s5495_s6  ;;  %p38_p4 = scmp.eq.s32.totalorder %s5549_s10, 0 }
   0xa   : > { %s5565_s15 = scalar_select %p22_p1, %s5503_s8, %s24_s13  }
   0xb   : > { %p5567_p5 = por %p32_p2, %p31_p0  ;;  %p5571_p6 = por %p38_p4, %p37_p3 }
   0xc   : > { %p61_p7 = scmp.eq.s32.totalorder %s5549_s10, 7  ;;  %p67_p8 = scmp.eq.s32.totalorder %s5088_s11, 7 }
   0xd   : > { %s9329_s17 = scalar_select %p5571_p6, 1, 0 }
   0xe   : > { %p5118_p9 = scmp.lt.s32.totalorder %s5507_s9, 8  ;;  %p5577_p10 = por %p61_p7, %p31_p0 }
   0xf   : > { %p5581_p11 = por %p67_p8, %p37_p3  ;;  %s87_s20 = sand.u32 1, %s5503_s8  }
  0x10   : > { %s9330_s18 = scalar_select %p5577_p10, 1, 0 }
  0x11   : > { %s9331_s19 = scalar_select %p5581_p11, 1, 0 }
  0x12   : > { %s5103_s21 = sshll.u32 %s5507_s9, 12  ;;  %s5091_s22 = sshll.u32 %s87_s20, 11 }
  0x13   : > { %s5590_s25 = scalar_lea.hbm %s9015_s0, %s5103_s21  ;;  %s91_s26 = scalar_lea.vmem [#allocation2], %s5091_s22 }
  0x14   : > { %s98_s27 = sshll.u32 %s91_s26, 4  ;;  %p5594_p12 = pnand %p5118_p9, %p5567_p5  ;;  %s5598_s27 = int_to_ptr.vmem [resolvable:$true] %s98_s27 }
  0x15   : > { %s5601_s29 = scalar_lea.sflag [#allocation3], %s87_s20  ;;  %s5415_s30 = scalar_lea.hbm %s5590_s25, 32768 }
  0x16   : > { %p5416_p0 = scmp.ne.s32.totalorder %s5590_s25, %s5415_s30  ;;  %p5417_p1 = pneg %p5594_p12 }
  0x17   : > { %s5420_s4 = scalar_lea.hbm %s9015_s0, 262144  ;;  %p5421_p4 = scmp.lt.s32.totalorder %s5590_s25, %s9015_s0 }
  0x18   : > { %p5418_p2 = pnand %p5417_p1, %p5416_p0  ;;  %p5422_p5 = scmp.lt.s32.totalorder %s5420_s4, %s5415_s30 }
  0x1a   : > { %p5419_p3 = pneg %p5418_p2  ;;  %p5423_p7 = por %p5422_p5, %p5421_p4 }
  0x1c   : > { %p5424_p8 = pnand %p5423_p7, %p5419_p3 }
  0x1e   : > { %5427 = shalt.err (!%p5424_p8)
}
  0x1f   : > { %s5428_s13 = scalar_lea.vmem %s5598_s27, 32768  ;;  %s5509_s14 = smov [#allocation2]  }
  0x20   : > { %p5429_p9 = scmp.ne.s32.totalorder %s5598_s27, %s5428_s13  ;;  %s5433_s16 = sshll.u32 %s5509_s14, 4  ;;  %s5434_s16 = int_to_ptr.vmem [resolvable:$false] %s5433_s16 }
  0x21   : > { %s5435_s20 = scalar_lea.vmem %s5434_s16, 65536  ;;  %p5436_p2 = scmp.lt.s32.totalorder %s5598_s27, %s5434_s16 }
  0x22   : > { %p5431_p13 = pnand %p5429_p9, %p5417_p1  ;;  %p5437_p11 = scmp.lt.s32.totalorder %s5435_s20, %s5428_s13 }
  0x24   : > { %p5432_p0 = pneg %p5431_p13  ;;  %p5438_p10 = por %p5437_p11, %p5436_p2 }
  0x26   : > { %p5439_p6 = pnand %p5438_p10, %p5432_p0 }
  0x28   : > { %5442 = shalt.err (!%p5439_p6)
}
  0x29   : > { %s5510_s21 = smov 32768   ;;  %s5511_s22 = smov 4096  }
  0x2a   : > { %s5512_s23 = smov 256   ;;  %p106_p13 = scmp.lt.s32.totalorder %s5507_s9, 9 }
  0x2b   : > { %5113 = dma.hbm_to_vmem [thread:$0]  (!%p5594_p12), %s5590_s25, 32768, %s5598_s27, %s5601_s29, %s5510_s21, %s5511_s22, %s5512_s23  }
  0x2c   : > { %p9333_p1 = scmp.ge.s32.totalorder %s5507_s9, 1 }
  0x2e   : > { %p107_p3 = pnand %p9333_p1, %p106_p13 }
  0x30   : > { %110 = sbr.rel (%p107_p3) target bundleno = 478 (0x1de), region = 24 }
  0x35   : > { %s5626_s24 = sand.u32 1, %s5499_s7   ;;  %p9334_p6 = scmp.ne.s32.totalorder %s9329_s17, 0 }
  0x36   : > { %s5095_s26 = sshll.u32 %s5626_s24, 11  ;;  %s113_s30 = scalar_lea.sflag [#allocation3], %s5626_s24 }
  0x37   : > { %s5632_s2 = scalar_lea.vmem [#allocation2], %s5095_s26 }
  0x38   : > { %5486 = dma.done.wait (%p9334_p6), %s113_s30, 32768  }
  0x39   : > { %5488 = vsyncadd (%p9334_p6), %s113_s30, 4294934528  ;;  %v397_v0 = vlaneseq  ;;  %v5513_v1 = vmov 1983009808   ;;  %v5514_v5 = vmov 1934713408   ;;  %v136_v8 = vld [vmem:[%s5632_s2] sm:$0xff] }
  0x3a   : > { %v395_v2 = vunpack.c.l.s4 %v5513_v1  ;;  %v459_v6 = vunpack.c.l.s4 %v5514_v5  ;;  %v168_v9 = vld [vmem:[%s5632_s2 + $0x100] sm:$0xff]  ;;  %v137_v19 = vld [vmem:[%s5632_s2 + $0x8] sm:$0xff]  ;;  %v138_v37 = vld [vmem:[%s5632_s2 + $0x10] sm:$0xff]  ;;  %s5745_s17 = scalar_lea.vmem [#allocation5], %s5095_s26  ;;  %s5105_s25 = sshll.u32 %s5549_s10, 15 }
  0x3b   : > { %v398_v3 = vshrl.u32 %v397_v0, 7  ;;  %v200_v10 = vld [vmem:[%s5632_s2 + $0x200] sm:$0xff]  ;;  %v169_v23 = vld [vmem:[%s5632_s2 + $0x108] sm:$0xff]  ;;  %v170_v38 = vld [vmem:[%s5632_s2 + $0x110] sm:$0xff]  ;;  %s5015_s27 = sshll.u32 %s5745_s17, 4  ;;  %s8960_s29 = scalar_lea.hbm %s9016_s1, %s5105_s25  ;;  %s8962_s27 = int_to_ptr.vmem [resolvable:$true] %s5015_s27 }
  0x3c   : > { %v396_v4 = vunpack.c.0.s8 %v395_v2  ;;  %v460_v11 = vunpack.c.0.s8 %v459_v6  ;;  %v232_v12 = vld [vmem:[%s5632_s2 + $0x300] sm:$0xff]  ;;  %v392_v15 = vcombine.low %v136_v8, %v200_v10  ;;  %v201_v24 = vld [vmem:[%s5632_s2 + $0x208] sm:$0xff]  ;;  %v202_v43 = vld [vmem:[%s5632_s2 + $0x210] sm:$0xff]  ;;  %s5001_s3 = scalar_lea.sflag [#allocation4], %s5626_s24  ;;  %s5443_s4 = scalar_lea.vmem %s8962_s27, 32768 }
  0x3d   : > { %v264_v13 = vld [vmem:[%s5632_s2 + $0x400] sm:$0xff]  ;;  %v408_v18 = vcombine.low %v168_v9, %v232_v12  ;;  %v233_v25 = vld [vmem:[%s5632_s2 + $0x308] sm:$0xff]  ;;  %v528_v31 = vcombine.low %v137_v19, %v201_v24  ;;  %v234_v44 = vld [vmem:[%s5632_s2 + $0x310] sm:$0xff]  ;;  %v664_v51 = vcombine.low %v138_v37, %v202_v43  ;;  %p5444_p10 = scmp.ne.s32.totalorder %s8962_s27, %s5443_s4  ;;  %p9951_p11 = scmp.ne.s32.totalorder %s9330_s18, 0 }
  0x3e   : > { %v5638_v7 = vsub.s32 %v396_v4, %v398_v3  ;;  %v296_v14 = vld [vmem:[%s5632_s2 + $0x500] sm:$0xff]  ;;  %v5658_v27 = vsub.s32 %v460_v11, %v398_v3  ;;  %v265_v28 = vld [vmem:[%s5632_s2 + $0x408] sm:$0xff]  ;;  %v544_v32 = vcombine.low %v169_v23, %v233_v25  ;;  %v266_v45 = vld [vmem:[%s5632_s2 + $0x410] sm:$0xff]  ;;  %v680_v52 = vcombine.low %v170_v38, %v234_v44  ;;  %s5515_s5 = smov [#allocation5]  }
  0x3f   : > { %v328_v16 = vld [vmem:[%s5632_s2 + $0x600] sm:$0xff]  ;;  %v297_v29 = vld [vmem:[%s5632_s2 + $0x508] sm:$0xff]  ;;  %v298_v48 = vld [vmem:[%s5632_s2 + $0x510] sm:$0xff]  ;;  %p5445_p12 = pnand %p5444_p10, %p9951_p11  ;;  %s5447_s11 = sshll.u32 %s5515_s5, 4  ;;  %s5448_s11 = int_to_ptr.vmem [resolvable:$false] %s5447_s11 }
  0x40   : > { %9335 = vst [vmem:[#allocation8_spill] sm:$0xff] %v5638_v7  ;;  %v360_v17 = vld [vmem:[%s5632_s2 + $0x700] sm:$0xff]  ;;  %v5650_v20 = vrot.slane %v392_v15, %v5638_v7  ;;  %v424_v21 = vcombine.low %v264_v13, %v328_v16  ;;  %v5656_v26 = vrot.slane %v408_v18, %v5638_v7  ;;  %v329_v30 = vld [vmem:[%s5632_s2 + $0x608] sm:$0xff]  ;;  %v5675_v40 = vrot.slane %v528_v31, %v5638_v7  ;;  %v330_v49 = vld [vmem:[%s5632_s2 + $0x610] sm:$0xff]  ;;  %s5449_s13 = scalar_lea.vmem %s5448_s11, 65536  ;;  %p5450_p5 = scmp.lt.s32.totalorder %s8962_s27, %s5448_s11 }
  0x41   : > { %v440_v22 = vcombine.low %v296_v14, %v360_v17  ;;  %v361_v35 = vld [vmem:[%s5632_s2 + $0x708] sm:$0xff]  ;;  %v560_v36 = vcombine.low %v265_v28, %v329_v30  ;;  %v5678_v41 = vrot.slane %v544_v32, %v5638_v7  ;;  %v362_v50 = vld [vmem:[%s5632_s2 + $0x710] sm:$0xff]  ;;  %v696_v56 = vcombine.low %v266_v45, %v330_v49  ;;  %v139_v57 = vld [vmem:[%s5632_s2 + $0x18] sm:$0xff]  ;;  %p5446_p4 = pneg %p5445_p12  ;;  %p5451_p7 = scmp.lt.s32.totalorder %s5449_s13, %s5443_s4 }
  0x42   : > { %9336 = vst [vmem:[#allocation9_spill] sm:$0xff] %v5650_v20  ;;  %9337 = vst [vmem:[#allocation10_spill] sm:$0xff] %v5656_v26  ;;  %v5664_v33 = vrot.slane %v424_v21, %v5638_v7  ;;  %v456_v39 = vcombine.low %v5650_v20, %v5656_v26  ;;  %v576_v42 = vcombine.low %v297_v29, %v361_v35  ;;  %v171_v58 = vld [vmem:[%s5632_s2 + $0x118] sm:$0xff]  ;;  %v140_v10 = vld [vmem:[%s5632_s2 + $0x20] sm:$0xff] }
  0x43   : > { %v5667_v34 = vrot.slane %v440_v22, %v5638_v7  ;;  %9340 = vst [vmem:[#allocation13_spill] sm:$0xff] %v5675_v40  ;;  %9341 = vst [vmem:[#allocation14_spill] sm:$0xff] %v5678_v41  ;;  %v5686_v47 = vrot.slane %v560_v36, %v5638_v7  ;;  %v592_v55 = vcombine.low %v5675_v40, %v5678_v41  ;;  %v203_v59 = vld [vmem:[%s5632_s2 + $0x218] sm:$0xff]  ;;  %v172_v15 = vld [vmem:[%s5632_s2 + $0x120] sm:$0xff]  ;;  %p5452_p8 = por %p5451_p7, %p5450_p5 }
  0x44   : > { %9338 = vst [vmem:[#allocation11_spill] sm:$0xff] %v5664_v33  ;;  %v5692_v53 = vrot.slane %v456_v39, %v5658_v27  ;;  %v5695_v54 = vrot.slane %v576_v42, %v5638_v7  ;;  %v5706_v61 = vrot.slane %v664_v51, %v5638_v7  ;;  %v5709_v62 = vrot.slane %v680_v52, %v5638_v7  ;;  %v235_v0 = vld [vmem:[%s5632_s2 + $0x318] sm:$0xff]  ;;  %v204_v16 = vld [vmem:[%s5632_s2 + $0x220] sm:$0xff]  ;;  %v141_v35 = vld [vmem:[%s5632_s2 + $0x28] sm:$0xff] }
  0x45   : > { %9339 = vst [vmem:[#allocation12_spill] sm:$0xff] %v5667_v34  ;;  %v488_v46 = vcombine.low %v5664_v33, %v5667_v34  ;;  %9342 = vst [vmem:[#allocation15_spill] sm:$0xff] %v5686_v47  ;;  %v712_v63 = vcombine.low %v298_v48, %v362_v50  ;;  %v267_v1 = vld [vmem:[%s5632_s2 + $0x418] sm:$0xff]  ;;  %v5715_v3 = vrot.slane %v592_v55, %v5658_v27  ;;  %v236_v17 = vld [vmem:[%s5632_s2 + $0x320] sm:$0xff]  ;;  %p5453_p9 = pnand %p5452_p8, %p5446_p4 }
  0x46   : > { %9343 = vst [vmem:[#allocation16_spill] sm:$0xff] %v5695_v54  ;;  %9344 = vst [vmem:[#allocation17_spill] sm:$0xff] %v5706_v61  ;;  %v299_v2 = vld [vmem:[%s5632_s2 + $0x518] sm:$0xff]  ;;  %v624_v4 = vcombine.low %v5686_v47, %v5695_v54  ;;  %v5720_v5 = vrot.slane %v696_v56, %v5638_v7  ;;  %v800_v9 = vcombine.low %v139_v57, %v203_v59  ;;  %v268_v23 = vld [vmem:[%s5632_s2 + $0x420] sm:$0xff] }
  0x47   : > { %v5703_v60 = vrot.slane %v488_v46, %v5658_v27  ;;  %9345 = vst [vmem:[#allocation18_spill] sm:$0xff] %v5709_v62  ;;  %v331_v6 = vld [vmem:[%s5632_s2 + $0x618] sm:$0xff]  ;;  %v5728_v12 = vrot.slane %v712_v63, %v5638_v7  ;;  %v728_v13 = vcombine.low %v5706_v61, %v5709_v62  ;;  %v816_v14 = vcombine.low %v171_v58, %v235_v0  ;;  %v332_v24 = vld [vmem:[%s5632_s2 + $0x620] sm:$0xff]  ;;  %v173_v42 = vld [vmem:[%s5632_s2 + $0x128] sm:$0xff] }
  0x48   : > { %9346 = vst [vmem:[#allocation19_spill] sm:$0xff] %v5720_v5  ;;  %v363_v8 = vld [vmem:[%s5632_s2 + $0x718] sm:$0xff]  ;;  %v5736_v18 = vrot.slane %v624_v4, %v5658_v27  ;;  %v5739_v19 = vrot.slane %v800_v9, %v5638_v7  ;;  %v832_v21 = vcombine.low %v267_v1, %v331_v6  ;;  %v300_v30 = vld [vmem:[%s5632_s2 + $0x520] sm:$0xff]  ;;  %v936_v32 = vcombine.low %v140_v10, %v204_v16  ;;  %v205_v43 = vld [vmem:[%s5632_s2 + $0x228] sm:$0xff] }
  0x49   : > { %v520_v11 = vcombine.low %v5692_v53, %v5703_v60  ;;  %9347 = vst [vmem:[#allocation20_spill] sm:$0xff] %v5728_v12  ;;  %v848_v22 = vcombine.low %v299_v2, %v363_v8  ;;  %v5749_v25 = vrot.slane %v728_v13, %v5658_v27  ;;  %v760_v28 = vcombine.low %v5720_v5, %v5728_v12  ;;  %v364_v31 = vld [vmem:[%s5632_s2 + $0x720] sm:$0xff]  ;;  %v237_v44 = vld [vmem:[%s5632_s2 + $0x328] sm:$0xff]  ;;  %v142_v63 = vld [vmem:[%s5632_s2 + $0x30] sm:$0xff] }
  0x4a   : > { %9348 = vst [vmem:[#allocation21_spill] sm:$0xff] %v5739_v19  ;;  %v5754_v29 = vrot.slane %v816_v14, %v5638_v7  ;;  %v656_v36 = vcombine.low %v5715_v3, %v5736_v18  ;;  %v5762_v37 = vrot.slane %v832_v21, %v5638_v7  ;;  %v952_v39 = vcombine.low %v172_v15, %v236_v17  ;;  %v269_v50 = vld [vmem:[%s5632_s2 + $0x428] sm:$0xff]  ;;  %v206_v0 = vld [vmem:[%s5632_s2 + $0x230] sm:$0xff]  ;;  %v344_v5 = vld [vmem:[%s5632_s2 + $0x680] sm:$0xff] }
  0x4b   : > { %4744 = vst [vmem:[%s5745_s17] sm:$0xff] %v520_v11  ;;  %v5765_v38 = vrot.slane %v848_v22, %v5638_v7  ;;  %v5771_v45 = vrot.slane %v760_v28, %v5658_v27  ;;  %v5776_v48 = vrot.slane %v936_v32, %v5638_v7  ;;  %v968_v49 = vcombine.low %v268_v23, %v332_v24  ;;  %v301_v51 = vld [vmem:[%s5632_s2 + $0x528] sm:$0xff]  ;;  %v174_v8 = vld [vmem:[%s5632_s2 + $0x130] sm:$0xff]  ;;  %v347_v41 = vld [vmem:[%s5632_s2 + $0x698] sm:$0xff] }
  0x4c   : > { %9349 = vst [vmem:[#allocation22_spill] sm:$0xff] %v5754_v29  ;;  %9350 = vst [vmem:[#allocation23_spill] sm:$0xff] %v5762_v37  ;;  %v864_v46 = vcombine.low %v5739_v19, %v5754_v29  ;;  %v333_v52 = vld [vmem:[%s5632_s2 + $0x628] sm:$0xff]  ;;  %v5785_v56 = vrot.slane %v952_v39, %v5638_v7  ;;  %v984_v57 = vcombine.low %v300_v30, %v364_v31  ;;  %v238_v9 = vld [vmem:[%s5632_s2 + $0x330] sm:$0xff] }
  0x4d   : > { %9351 = vst [vmem:[#allocation24_spill] sm:$0xff] %v5765_v38  ;;  %9352 = vst [vmem:[#allocation25_spill] sm:$0xff] %v5776_v48  ;;  %v896_v55 = vcombine.low %v5762_v37, %v5765_v38  ;;  %v365_v58 = vld [vmem:[%s5632_s2 + $0x728] sm:$0xff]  ;;  %v1072_v59 = vcombine.low %v141_v35, %v205_v43  ;;  %v792_v1 = vcombine.low %v5749_v25, %v5771_v45  ;;  %v270_v15 = vld [vmem:[%s5632_s2 + $0x430] sm:$0xff] }
  0x4e   : > { %4745 = vst [vmem:[%s5745_s17 + $0x8] sm:$0xff] %v656_v36  ;;  %9353 = vst [vmem:[#allocation26_spill] sm:$0xff] %v5785_v56  ;;  %v5793_v2 = vrot.slane %v864_v46, %v5658_v27  ;;  %v5796_v4 = vrot.slane %v968_v49, %v5638_v7  ;;  %v1088_v6 = vcombine.low %v173_v42, %v237_v44  ;;  %v302_v16 = vld [vmem:[%s5632_s2 + $0x530] sm:$0xff]  ;;  %v143_v30 = vld [vmem:[%s5632_s2 + $0x38] sm:$0xff] }
  0x4f   : > { %v5801_v10 = vrot.slane %v896_v55, %v5658_v27  ;;  %v5804_v11 = vrot.slane %v984_v57, %v5638_v7  ;;  %v1000_v13 = vcombine.low %v5776_v48, %v5785_v56  ;;  %v5809_v14 = vrot.slane %v1072_v59, %v5638_v7  ;;  %4746 = vst [vmem:[%s5745_s17 + $0x10] sm:$0xff] %v792_v1  ;;  %v334_v23 = vld [vmem:[%s5632_s2 + $0x630] sm:$0xff]  ;;  %v175_v39 = vld [vmem:[%s5632_s2 + $0x138] sm:$0xff]  ;;  %v277_v48 = vld [vmem:[%s5632_s2 + $0x468] sm:$0xff] }
  0x50   : > { %9354 = vst [vmem:[#allocation27_spill] sm:$0xff] %v5796_v4  ;;  %v5815_v17 = vrot.slane %v1088_v6, %v5638_v7  ;;  %v1104_v21 = vcombine.low %v269_v50, %v333_v52  ;;  %v1120_v22 = vcombine.low %v301_v51, %v365_v58  ;;  %v366_v24 = vld [vmem:[%s5632_s2 + $0x730] sm:$0xff]  ;;  %v1208_v28 = vcombine.low %v142_v63, %v206_v0  ;;  %v207_v42 = vld [vmem:[%s5632_s2 + $0x238] sm:$0xff]  ;;  %v309_v56 = vld [vmem:[%s5632_s2 + $0x568] sm:$0xff] }
  0x51   : > { %9355 = vst [vmem:[#allocation28_spill] sm:$0xff] %v5804_v11  ;;  %9356 = vst [vmem:[#allocation29_spill] sm:$0xff] %v5809_v14  ;;  %v928_v31 = vcombine.low %v5793_v2, %v5801_v10  ;;  %v5823_v32 = vrot.slane %v1000_v13, %v5658_v27  ;;  %v1032_v35 = vcombine.low %v5796_v4, %v5804_v11  ;;  %v239_v43 = vld [vmem:[%s5632_s2 + $0x338] sm:$0xff]  ;;  %v144_v13 = vld [vmem:[%s5632_s2 + $0x40] sm:$0xff] }
  0x52   : > { %9357 = vst [vmem:[#allocation30_spill] sm:$0xff] %v5815_v17  ;;  %v1224_v36 = vcombine.low %v174_v8, %v238_v9  ;;  %v5831_v44 = vrot.slane %v1104_v21, %v5638_v7  ;;  %v5834_v46 = vrot.slane %v1120_v22, %v5638_v7  ;;  %v1136_v49 = vcombine.low %v5809_v14, %v5815_v17  ;;  %v271_v58 = vld [vmem:[%s5632_s2 + $0x438] sm:$0xff]  ;;  %v370_v14 = vld [vmem:[%s5632_s2 + $0x750] sm:$0xff]  ;;  %v340_v4 = vld [vmem:[%s5632_s2 + $0x660] sm:$0xff] }
  0x53   : > { %v5839_v50 = vrot.slane %v1208_v28, %v5638_v7  ;;  %4747 = vst [vmem:[%s5745_s17 + $0x18] sm:$0xff] %v928_v31  ;;  %v5843_v51 = vrot.slane %v1032_v35, %v5658_v27  ;;  %v1240_v55 = vcombine.low %v270_v15, %v334_v23  ;;  %v1256_v57 = vcombine.low %v302_v16, %v366_v24  ;;  %v303_v59 = vld [vmem:[%s5632_s2 + $0x538] sm:$0xff]  ;;  %v208_v15 = vld [vmem:[%s5632_s2 + $0x240] sm:$0xff]  ;;  %v374_v19 = vld [vmem:[%s5632_s2 + $0x770] sm:$0xff] }
  0x54   : > { %9358 = vst [vmem:[#allocation31_spill] sm:$0xff] %v5831_v44  ;;  %9359 = vst [vmem:[#allocation32_spill] sm:$0xff] %v5834_v46  ;;  %v5846_v52 = vrot.slane %v1224_v36, %v5638_v7  ;;  %v335_v63 = vld [vmem:[%s5632_s2 + $0x638] sm:$0xff]  ;;  %v5852_v0 = vrot.slane %v1136_v49, %v5658_v27  ;;  %v1168_v1 = vcombine.low %v5831_v44, %v5834_v46  ;;  %v176_v24 = vld [vmem:[%s5632_s2 + $0x140] sm:$0xff] }
  0x55   : > { %9360 = vst [vmem:[#allocation33_spill] sm:$0xff] %v5839_v50  ;;  %v367_v6 = vld [vmem:[%s5632_s2 + $0x738] sm:$0xff]  ;;  %v1344_v8 = vcombine.low %v143_v30, %v207_v42  ;;  %v1360_v9 = vcombine.low %v175_v39, %v239_v43  ;;  %v1064_v16 = vcombine.low %v5823_v32, %v5843_v51  ;;  %v5862_v21 = vrot.slane %v1240_v55, %v5638_v7  ;;  %v240_v28 = vld [vmem:[%s5632_s2 + $0x340] sm:$0xff]  ;;  %v281_v61 = vld [vmem:[%s5632_s2 + $0x488] sm:$0xff] }
  0x56   : > { %9361 = vst [vmem:[#allocation34_spill] sm:$0xff] %v5846_v52  ;;  %v5865_v22 = vrot.slane %v1256_v57, %v5638_v7  ;;  %v1272_v23 = vcombine.low %v5839_v50, %v5846_v52  ;;  %v5872_v30 = vrot.slane %v1168_v1, %v5658_v27  ;;  %v1376_v36 = vcombine.low %v271_v58, %v335_v63  ;;  %v272_v39 = vld [vmem:[%s5632_s2 + $0x440] sm:$0xff]  ;;  %v145_v58 = vld [vmem:[%s5632_s2 + $0x48] sm:$0xff]  ;;  %v339_v17 = vld [vmem:[%s5632_s2 + $0x658] sm:$0xff] }
  0x57   : > { %9362 = vst [vmem:[#allocation35_spill] sm:$0xff] %v5862_v21  ;;  %v5875_v31 = vrot.slane %v1344_v8, %v5638_v7  ;;  %v5878_v35 = vrot.slane %v1360_v9, %v5638_v7  ;;  %v304_v42 = vld [vmem:[%s5632_s2 + $0x540] sm:$0xff]  ;;  %4748 = vst [vmem:[%s5745_s17 + $0x20] sm:$0xff] %v1064_v16  ;;  %v1392_v57 = vcombine.low %v303_v59, %v367_v6  ;;  %v209_v63 = vld [vmem:[%s5632_s2 + $0x248] sm:$0xff] }
  0x58   : > { %9363 = vst [vmem:[#allocation36_spill] sm:$0xff] %v5865_v22  ;;  %v336_v43 = vld [vmem:[%s5632_s2 + $0x640] sm:$0xff]  ;;  %v5885_v49 = vrot.slane %v1272_v23, %v5658_v27  ;;  %v1304_v55 = vcombine.low %v5862_v21, %v5865_v22  ;;  %v1480_v8 = vcombine.low %v144_v13, %v208_v15  ;;  %v1200_v9 = vcombine.low %v5852_v0, %v5872_v30  ;;  %v177_v59 = vld [vmem:[%s5632_s2 + $0x148] sm:$0xff]  ;;  %v343_v29 = vld [vmem:[%s5632_s2 + $0x678] sm:$0xff] }
  0x59   : > { %9364 = vst [vmem:[#allocation37_spill] sm:$0xff] %v5875_v31  ;;  %9365 = vst [vmem:[#allocation38_spill] sm:$0xff] %v5878_v35  ;;  %v368_v1 = vld [vmem:[%s5632_s2 + $0x740] sm:$0xff]  ;;  %v5895_v16 = vrot.slane %v1376_v36, %v5638_v7  ;;  %v1408_v23 = vcombine.low %v5875_v31, %v5878_v35  ;;  %v1496_v21 = vcombine.low %v176_v24, %v240_v28  ;;  %v241_v6 = vld [vmem:[%s5632_s2 + $0x348] sm:$0xff] }
  0x5a   : > { %v5902_v13 = vrot.slane %v1304_v55, %v5658_v27  ;;  %v5905_v15 = vrot.slane %v1392_v57, %v5638_v7  ;;  %v5908_v22 = vrot.slane %v1480_v8, %v5638_v7  ;;  %v1512_v36 = vcombine.low %v272_v39, %v336_v43  ;;  %v273_v50 = vld [vmem:[%s5632_s2 + $0x448] sm:$0xff]  ;;  %4749 = vst [vmem:[%s5745_s17 + $0x28] sm:$0xff] %v1200_v9  ;;  %v146_v35 = vld [vmem:[%s5632_s2 + $0x50] sm:$0xff]  ;;  %v348_v33 = vld [vmem:[%s5632_s2 + $0x6a0] sm:$0xff] }
  0x5b   : > { %9366 = vst [vmem:[#allocation39_spill] sm:$0xff] %v5895_v16  ;;  %v305_v52 = vld [vmem:[%s5632_s2 + $0x548] sm:$0xff]  ;;  %v5915_v24 = vrot.slane %v1408_v23, %v5658_v27  ;;  %v5918_v28 = vrot.slane %v1496_v21, %v5638_v7  ;;  %v1528_v55 = vcombine.low %v304_v42, %v368_v1  ;;  %v1616_v8 = vcombine.low %v145_v58, %v209_v63  ;;  %v210_v39 = vld [vmem:[%s5632_s2 + $0x250] sm:$0xff] }
  0x5c   : > { %9367 = vst [vmem:[#allocation40_spill] sm:$0xff] %v5905_v15  ;;  %9368 = vst [vmem:[#allocation41_spill] sm:$0xff] %v5908_v22  ;;  %v337_v31 = vld [vmem:[%s5632_s2 + $0x648] sm:$0xff]  ;;  %v1336_v43 = vcombine.low %v5885_v49, %v5902_v13  ;;  %v1440_v9 = vcombine.low %v5895_v16, %v5905_v15  ;;  %v5928_v23 = vrot.slane %v1512_v36, %v5638_v7  ;;  %v178_v42 = vld [vmem:[%s5632_s2 + $0x150] sm:$0xff] }
  0x5d   : > { %9369 = vst [vmem:[#allocation42_spill] sm:$0xff] %v5918_v28  ;;  %v369_v57 = vld [vmem:[%s5632_s2 + $0x748] sm:$0xff]  ;;  %v1632_v21 = vcombine.low %v177_v59, %v241_v6  ;;  %v242_v1 = vld [vmem:[%s5632_s2 + $0x350] sm:$0xff]  ;;  %v5933_v44 = vrot.slane %v1528_v55, %v5638_v7  ;;  %v1544_v58 = vcombine.low %v5908_v22, %v5918_v28  ;;  %v5938_v63 = vrot.slane %v1616_v8, %v5638_v7  ;;  %v147_v28 = vld [vmem:[%s5632_s2 + $0x58] sm:$0xff] }
  0x5e   : > { %9370 = vst [vmem:[#allocation43_spill] sm:$0xff] %v5928_v23  ;;  %v1648_v46 = vcombine.low %v273_v50, %v337_v31  ;;  %v274_v16 = vld [vmem:[%s5632_s2 + $0x450] sm:$0xff]  ;;  %4750 = vst [vmem:[%s5745_s17 + $0x30] sm:$0xff] %v1336_v43  ;;  %v5944_v59 = vrot.slane %v1440_v9, %v5658_v27  ;;  %v1664_v55 = vcombine.low %v305_v52, %v369_v57  ;;  %v179_v9 = vld [vmem:[%s5632_s2 + $0x158] sm:$0xff] }
  0x5f   : > { %9371 = vst [vmem:[#allocation44_spill] sm:$0xff] %v5933_v44  ;;  %9372 = vst [vmem:[#allocation45_spill] sm:$0xff] %v5938_v63  ;;  %v306_v36 = vld [vmem:[%s5632_s2 + $0x550] sm:$0xff]  ;;  %v5947_v6 = vrot.slane %v1632_v21, %v5638_v7  ;;  %v1752_v22 = vcombine.low %v146_v35, %v210_v39  ;;  %v5953_v8 = vrot.slane %v1544_v58, %v5658_v27  ;;  %v211_v52 = vld [vmem:[%s5632_s2 + $0x258] sm:$0xff] }
  0x60   : > { %v338_v15 = vld [vmem:[%s5632_s2 + $0x650] sm:$0xff]  ;;  %v1576_v50 = vcombine.low %v5928_v23, %v5933_v44  ;;  %v5958_v31 = vrot.slane %v1648_v46, %v5638_v7  ;;  %v1768_v43 = vcombine.low %v178_v42, %v242_v1  ;;  %v243_v57 = vld [vmem:[%s5632_s2 + $0x358] sm:$0xff]  ;;  %v1472_v35 = vcombine.low %v5915_v24, %v5944_v59  ;;  %v313_v62 = vld [vmem:[%s5632_s2 + $0x588] sm:$0xff] }
  0x61   : > { %9373 = vst [vmem:[#allocation46_spill] sm:$0xff] %v5947_v6  ;;  %v5966_v39 = vrot.slane %v1664_v55, %v5638_v7  ;;  %v1680_v21 = vcombine.low %v5938_v63, %v5947_v6  ;;  %v5971_v46 = vrot.slane %v1752_v22, %v5638_v7  ;;  %v1784_v58 = vcombine.low %v274_v16, %v338_v15  ;;  %v275_v44 = vld [vmem:[%s5632_s2 + $0x458] sm:$0xff]  ;;  %v212_v16 = vld [vmem:[%s5632_s2 + $0x260] sm:$0xff]  ;;  %v378_v40 = vld [vmem:[%s5632_s2 + $0x790] sm:$0xff] }
  0x62   : > { %9374 = vst [vmem:[#allocation47_spill] sm:$0xff] %v5958_v31  ;;  %v5974_v42 = vrot.slane %v1576_v50, %v5658_v27  ;;  %v5977_v1 = vrot.slane %v1768_v43, %v5638_v7  ;;  %v1800_v23 = vcombine.low %v306_v36, %v370_v14  ;;  %v307_v55 = vld [vmem:[%s5632_s2 + $0x558] sm:$0xff]  ;;  %4751 = vst [vmem:[%s5745_s17 + $0x38] sm:$0xff] %v1472_v35  ;;  %v148_v14 = vld [vmem:[%s5632_s2 + $0x60] sm:$0xff] }
  0x63   : > { %9375 = vst [vmem:[#allocation48_spill] sm:$0xff] %v5966_v39  ;;  %9376 = vst [vmem:[#allocation49_spill] sm:$0xff] %v5971_v46  ;;  %v5984_v63 = vrot.slane %v1680_v21, %v5658_v27  ;;  %v1712_v22 = vcombine.low %v5958_v31, %v5966_v39  ;;  %v371_v50 = vld [vmem:[%s5632_s2 + $0x758] sm:$0xff]  ;;  %v1888_v6 = vcombine.low %v147_v28, %v211_v52  ;;  %v180_v28 = vld [vmem:[%s5632_s2 + $0x160] sm:$0xff] }
  0x64   : > { %9377 = vst [vmem:[#allocation50_spill] sm:$0xff] %v5977_v1  ;;  %v1904_v43 = vcombine.low %v179_v9, %v243_v57  ;;  %v1608_v15 = vcombine.low %v5953_v8, %v5974_v42  ;;  %v5994_v36 = vrot.slane %v1784_v58, %v5638_v7  ;;  %v5997_v35 = vrot.slane %v1800_v23, %v5638_v7  ;;  %v244_v9 = vld [vmem:[%s5632_s2 + $0x360] sm:$0xff]  ;;  %v285_v20 = vld [vmem:[%s5632_s2 + $0x4a8] sm:$0xff] }
  0x65   : > { %v1816_v21 = vcombine.low %v5971_v46, %v5977_v1  ;;  %v6004_v52 = vrot.slane %v1712_v22, %v5658_v27  ;;  %v6007_v57 = vrot.slane %v1888_v6, %v5638_v7  ;;  %v1920_v31 = vcombine.low %v275_v44, %v339_v17  ;;  %v276_v23 = vld [vmem:[%s5632_s2 + $0x460] sm:$0xff]  ;;  %v149_v17 = vld [vmem:[%s5632_s2 + $0x68] sm:$0xff] }
  0x66   : > { %9378 = vst [vmem:[#allocation51_spill] sm:$0xff] %v5994_v36  ;;  %9379 = vst [vmem:[#allocation52_spill] sm:$0xff] %v5997_v35  ;;  %v6010_v58 = vrot.slane %v1904_v43, %v5638_v7  ;;  %v308_v39 = vld [vmem:[%s5632_s2 + $0x560] sm:$0xff]  ;;  %v1848_v22 = vcombine.low %v5994_v36, %v5997_v35  ;;  %v1936_v1 = vcombine.low %v307_v55, %v371_v50  ;;  %v213_v44 = vld [vmem:[%s5632_s2 + $0x268] sm:$0xff] }
  0x67   : > { %9380 = vst [vmem:[#allocation53_spill] sm:$0xff] %v6007_v57  ;;  %4752 = vst [vmem:[%s5745_s17 + $0x40] sm:$0xff] %v1608_v15  ;;  %v6017_v46 = vrot.slane %v1816_v21, %v5658_v27  ;;  %v372_v6 = vld [vmem:[%s5632_s2 + $0x760] sm:$0xff]  ;;  %v2024_v43 = vcombine.low %v148_v14, %v212_v16  ;;  %v1744_v11 = vcombine.low %v5984_v63, %v6004_v52  ;;  %v181_v55 = vld [vmem:[%s5632_s2 + $0x168] sm:$0xff] }
  0x68   : > { %9381 = vst [vmem:[#allocation54_spill] sm:$0xff] %v6010_v58  ;;  %v6027_v15 = vrot.slane %v1920_v31, %v5638_v7  ;;  %v1952_v21 = vcombine.low %v6007_v57, %v6010_v58  ;;  %v2040_v36 = vcombine.low %v180_v28, %v244_v9  ;;  %v245_v50 = vld [vmem:[%s5632_s2 + $0x368] sm:$0xff]  ;;  %v6034_v14 = vrot.slane %v1848_v22, %v5658_v27  ;;  %v150_v58 = vld [vmem:[%s5632_s2 + $0x70] sm:$0xff] }
  0x69   : > { %v6037_v16 = vrot.slane %v1936_v1, %v5638_v7  ;;  %v6040_v35 = vrot.slane %v2024_v43, %v5638_v7  ;;  %v2056_v31 = vcombine.low %v276_v23, %v340_v4  ;;  %v341_v57 = vld [vmem:[%s5632_s2 + $0x668] sm:$0xff]  ;;  %4753 = vst [vmem:[%s5745_s17 + $0x48] sm:$0xff] %v1744_v11  ;;  %v2072_v22 = vcombine.low %v308_v39, %v372_v6  ;;  %v214_v4 = vld [vmem:[%s5632_s2 + $0x270] sm:$0xff] }
  0x6a   : > { %9382 = vst [vmem:[#allocation55_spill] sm:$0xff] %v6027_v15  ;;  %v6047_v28 = vrot.slane %v1952_v21, %v5658_v27  ;;  %v6050_v9 = vrot.slane %v2040_v36, %v5638_v7  ;;  %v373_v1 = vld [vmem:[%s5632_s2 + $0x768] sm:$0xff]  ;;  %v2160_v43 = vcombine.low %v149_v17, %v213_v44  ;;  %v1880_v23 = vcombine.low %v6017_v46, %v6034_v14  ;;  %v182_v39 = vld [vmem:[%s5632_s2 + $0x170] sm:$0xff] }
  0x6b   : > { %9383 = vst [vmem:[#allocation56_spill] sm:$0xff] %v6037_v16  ;;  %9384 = vst [vmem:[#allocation57_spill] sm:$0xff] %v6040_v35  ;;  %v1984_v11 = vcombine.low %v6027_v15, %v6037_v16  ;;  %v6060_v21 = vrot.slane %v2056_v31, %v5638_v7  ;;  %v2176_v36 = vcombine.low %v181_v55, %v245_v50  ;;  %v246_v6 = vld [vmem:[%s5632_s2 + $0x370] sm:$0xff]  ;;  %v317_v26 = vld [vmem:[%s5632_s2 + $0x5a8] sm:$0xff] }
  0x6c   : > { %9385 = vst [vmem:[#allocation58_spill] sm:$0xff] %v6050_v9  ;;  %v6065_v37 = vrot.slane %v2072_v22, %v5638_v7  ;;  %v2088_v17 = vcombine.low %v6040_v35, %v6050_v9  ;;  %v6070_v44 = vrot.slane %v2160_v43, %v5638_v7  ;;  %v2192_v38 = vcombine.low %v277_v48, %v341_v57  ;;  %v278_v15 = vld [vmem:[%s5632_s2 + $0x470] sm:$0xff]  ;;  %v151_v9 = vld [vmem:[%s5632_s2 + $0x78] sm:$0xff] }
  0x6d   : > { %9386 = vst [vmem:[#allocation59_spill] sm:$0xff] %v6060_v21  ;;  %v310_v31 = vld [vmem:[%s5632_s2 + $0x570] sm:$0xff]  ;;  %4754 = vst [vmem:[%s5745_s17 + $0x50] sm:$0xff] %v1880_v23  ;;  %v6076_v55 = vrot.slane %v1984_v11, %v5658_v27  ;;  %v6079_v50 = vrot.slane %v2176_v36, %v5638_v7  ;;  %v2208_v22 = vcombine.low %v309_v56, %v373_v1  ;;  %v183_v11 = vld [vmem:[%s5632_s2 + $0x178] sm:$0xff] }
  0x6e   : > { %9387 = vst [vmem:[#allocation60_spill] sm:$0xff] %v6065_v37  ;;  %9388 = vst [vmem:[#allocation61_spill] sm:$0xff] %v6070_v44  ;;  %v342_v16 = vld [vmem:[%s5632_s2 + $0x670] sm:$0xff]  ;;  %v2296_v35 = vcombine.low %v150_v58, %v214_v4  ;;  %v6085_v43 = vrot.slane %v2088_v17, %v5658_v27  ;;  %v2120_v48 = vcombine.low %v6060_v21, %v6065_v37  ;;  %v215_v56 = vld [vmem:[%s5632_s2 + $0x278] sm:$0xff] }
  0x6f   : > { %9389 = vst [vmem:[#allocation62_spill] sm:$0xff] %v6079_v50  ;;  %v6090_v57 = vrot.slane %v2192_v38, %v5638_v7  ;;  %v2312_v23 = vcombine.low %v182_v39, %v246_v6  ;;  %v247_v1 = vld [vmem:[%s5632_s2 + $0x378] sm:$0xff]  ;;  %v2016_v58 = vcombine.low %v6047_v28, %v6076_v55  ;;  %v6098_v4 = vrot.slane %v2208_v22, %v5638_v7 }
  0x70   : > { %v2224_v36 = vcombine.low %v6070_v44, %v6079_v50  ;;  %v6103_v38 = vrot.slane %v2296_v35, %v5638_v7  ;;  %v6106_v39 = vrot.slane %v2120_v48, %v5658_v27  ;;  %v2328_v17 = vcombine.low %v278_v15, %v342_v16  ;;  %v279_v37 = vld [vmem:[%s5632_s2 + $0x478] sm:$0xff]  ;;  %v216_v15 = vld [vmem:[%s5632_s2 + $0x280] sm:$0xff] }
  0x71   : > { %9390 = vst [vmem:[#allocation63_spill] sm:$0xff] %v6090_v57  ;;  %9391 = vst [vmem:[#allocation64_spill] sm:$0xff] %v6098_v4  ;;  %v6109_v6 = vrot.slane %v2312_v23, %v5638_v7  ;;  %v2344_v21 = vcombine.low %v310_v31, %v374_v19  ;;  %v311_v22 = vld [vmem:[%s5632_s2 + $0x578] sm:$0xff]  ;;  %v2256_v35 = vcombine.low %v6090_v57, %v6098_v4  ;;  %v152_v19 = vld [vmem:[%s5632_s2 + $0x80] sm:$0xff] }
  0x72   : > { %9392 = vst [vmem:[#allocation65_spill] sm:$0xff] %v6103_v38  ;;  %4755 = vst [vmem:[%s5745_s17 + $0x58] sm:$0xff] %v2016_v58  ;;  %v6116_v44 = vrot.slane %v2224_v36, %v5658_v27  ;;  %v375_v48 = vld [vmem:[%s5632_s2 + $0x778] sm:$0xff]  ;;  %v2432_v50 = vcombine.low %v151_v9, %v215_v56  ;;  %v2448_v23 = vcombine.low %v183_v11, %v247_v1  ;;  %v184_v9 = vld [vmem:[%s5632_s2 + $0x180] sm:$0xff] }
  0x73   : > { %9393 = vst [vmem:[#allocation66_spill] sm:$0xff] %v6109_v6  ;;  %v2152_v16 = vcombine.low %v6085_v43, %v6106_v39  ;;  %v6126_v31 = vrot.slane %v2328_v17, %v5638_v7  ;;  %v6129_v58 = vrot.slane %v2344_v21, %v5638_v7  ;;  %v2360_v36 = vcombine.low %v6103_v38, %v6109_v6  ;;  %v248_v11 = vld [vmem:[%s5632_s2 + $0x380] sm:$0xff] }
  0x74   : > { %v6136_v56 = vrot.slane %v2256_v35, %v5658_v27  ;;  %v6139_v1 = vrot.slane %v2432_v50, %v5638_v7  ;;  %v6142_v17 = vrot.slane %v2448_v23, %v5638_v7  ;;  %v2464_v57 = vcombine.low %v279_v37, %v343_v29  ;;  %v280_v21 = vld [vmem:[%s5632_s2 + $0x480] sm:$0xff]  ;;  %v153_v29 = vld [vmem:[%s5632_s2 + $0x88] sm:$0xff] }
  0x75   : > { %9394 = vst [vmem:[#allocation67_spill] sm:$0xff] %v6126_v31  ;;  %9395 = vst [vmem:[#allocation68_spill] sm:$0xff] %v6129_v58  ;;  %v312_v4 = vld [vmem:[%s5632_s2 + $0x580] sm:$0xff]  ;;  %v6149_v38 = vrot.slane %v2360_v36, %v5658_v27  ;;  %v2392_v35 = vcombine.low %v6126_v31, %v6129_v58  ;;  %v2480_v6 = vcombine.low %v311_v22, %v375_v48  ;;  %v217_v37 = vld [vmem:[%s5632_s2 + $0x288] sm:$0xff] }
  0x76   : > { %9396 = vst [vmem:[#allocation69_spill] sm:$0xff] %v6139_v1  ;;  %9397 = vst [vmem:[#allocation70_spill] sm:$0xff] %v6142_v17  ;;  %v376_v50 = vld [vmem:[%s5632_s2 + $0x780] sm:$0xff]  ;;  %v2568_v23 = vcombine.low %v152_v19, %v216_v15  ;;  %v2288_v12 = vcombine.low %v6116_v44, %v6136_v56  ;;  %v2496_v36 = vcombine.low %v6139_v1, %v6142_v17  ;;  %v185_v22 = vld [vmem:[%s5632_s2 + $0x188] sm:$0xff] }
  0x77   : > { %4756 = vst [vmem:[%s5745_s17 + $0x60] sm:$0xff] %v2152_v16  ;;  %v6159_v16 = vrot.slane %v2464_v57, %v5638_v7  ;;  %v2584_v31 = vcombine.low %v184_v9, %v248_v11  ;;  %v249_v48 = vld [vmem:[%s5632_s2 + $0x388] sm:$0xff]  ;;  %v6166_v19 = vrot.slane %v2392_v35, %v5658_v27  ;;  %v6169_v15 = vrot.slane %v2480_v6, %v5638_v7  ;;  %v154_v17 = vld [vmem:[%s5632_s2 + $0x90] sm:$0xff] }
  0x78   : > { %v6172_v58 = vrot.slane %v2568_v23, %v5638_v7  ;;  %v2600_v57 = vcombine.low %v280_v21, %v344_v5  ;;  %v345_v1 = vld [vmem:[%s5632_s2 + $0x688] sm:$0xff]  ;;  %4757 = vst [vmem:[%s5745_s17 + $0x68] sm:$0xff] %v2288_v12  ;;  %v6179_v9 = vrot.slane %v2496_v36, %v5658_v27  ;;  %v2616_v35 = vcombine.low %v312_v4, %v376_v50  ;;  %v218_v5 = vld [vmem:[%s5632_s2 + $0x290] sm:$0xff] }
  0x79   : > { %9398 = vst [vmem:[#allocation71_spill] sm:$0xff] %v6159_v16  ;;  %9399 = vst [vmem:[#allocation72_spill] sm:$0xff] %v6169_v15  ;;  %v6182_v11 = vrot.slane %v2584_v31, %v5638_v7  ;;  %v377_v6 = vld [vmem:[%s5632_s2 + $0x788] sm:$0xff]  ;;  %v2704_v23 = vcombine.low %v153_v29, %v217_v37  ;;  %v2424_v21 = vcombine.low %v6149_v38, %v6166_v19  ;;  %v186_v4 = vld [vmem:[%s5632_s2 + $0x190] sm:$0xff] }
  0x7a   : > { %9400 = vst [vmem:[#allocation73_spill] sm:$0xff] %v6172_v58  ;;  %v2528_v12 = vcombine.low %v6159_v16, %v6169_v15  ;;  %v6192_v36 = vrot.slane %v2600_v57, %v5638_v7  ;;  %v2720_v31 = vcombine.low %v185_v22, %v249_v48  ;;  %v250_v50 = vld [vmem:[%s5632_s2 + $0x390] sm:$0xff]  ;;  %v6197_v47 = vrot.slane %v2616_v35, %v5638_v7 }
  0x7b   : > { %9401 = vst [vmem:[#allocation74_spill] sm:$0xff] %v6182_v11  ;;  %v2632_v29 = vcombine.low %v6172_v58, %v6182_v11  ;;  %v6202_v37 = vrot.slane %v2704_v23, %v5638_v7  ;;  %v2736_v54 = vcombine.low %v281_v61, %v345_v1  ;;  %v282_v16 = vld [vmem:[%s5632_s2 + $0x490] sm:$0xff]  ;;  %4758 = vst [vmem:[%s5745_s17 + $0x70] sm:$0xff] %v2424_v21  ;;  %v155_v11 = vld [vmem:[%s5632_s2 + $0x98] sm:$0xff] }
  0x7c   : > { %9402 = vst [vmem:[#allocation75_spill] sm:$0xff] %v6192_v36  ;;  %9403 = vst [vmem:[#allocation76_spill] sm:$0xff] %v6197_v47  ;;  %v314_v57 = vld [vmem:[%s5632_s2 + $0x590] sm:$0xff]  ;;  %v6208_v22 = vrot.slane %v2528_v12, %v5658_v27  ;;  %v6211_v48 = vrot.slane %v2720_v31, %v5638_v7  ;;  %v2752_v35 = vcombine.low %v313_v62, %v377_v6  ;;  %v187_v12 = vld [vmem:[%s5632_s2 + $0x198] sm:$0xff] }
  0x7d   : > { %9404 = vst [vmem:[#allocation77_spill] sm:$0xff] %v6202_v37  ;;  %v346_v15 = vld [vmem:[%s5632_s2 + $0x690] sm:$0xff]  ;;  %v2840_v58 = vcombine.low %v154_v17, %v218_v5  ;;  %v6217_v23 = vrot.slane %v2632_v29, %v5658_v27  ;;  %v2664_v61 = vcombine.low %v6192_v36, %v6197_v47  ;;  %v6222_v1 = vrot.slane %v2736_v54, %v5638_v7  ;;  %v219_v62 = vld [vmem:[%s5632_s2 + $0x298] sm:$0xff] }
  0x7e   : > { %9405 = vst [vmem:[#allocation78_spill] sm:$0xff] %v6211_v48  ;;  %v2856_v21 = vcombine.low %v186_v4, %v250_v50  ;;  %v251_v6 = vld [vmem:[%s5632_s2 + $0x398] sm:$0xff]  ;;  %v2560_v17 = vcombine.low %v6179_v9, %v6208_v22  ;;  %v6230_v5 = vrot.slane %v2752_v35, %v5638_v7  ;;  %v2768_v31 = vcombine.low %v6202_v37, %v6211_v48 }
  0x7f   : > { %9406 = vst [vmem:[#allocation79_spill] sm:$0xff] %v6222_v1  ;;  %v6235_v54 = vrot.slane %v2840_v58, %v5638_v7  ;;  %v6238_v4 = vrot.slane %v2664_v61, %v5658_v27  ;;  %v2872_v29 = vcombine.low %v282_v16, %v346_v15  ;;  %v2888_v36 = vcombine.low %v314_v57, %v378_v40  ;;  %v283_v47 = vld [vmem:[%s5632_s2 + $0x498] sm:$0xff]  ;;  %v156_v40 = vld [vmem:[%s5632_s2 + $0xa0] sm:$0xff] }
  0x80   : > { %9407 = vst [vmem:[#allocation80_spill] sm:$0xff] %v6230_v5  ;;  %v6241_v50 = vrot.slane %v2856_v21, %v5638_v7  ;;  %v315_v35 = vld [vmem:[%s5632_s2 + $0x598] sm:$0xff]  ;;  %4759 = vst [vmem:[%s5745_s17 + $0x78] sm:$0xff] %v2560_v17  ;;  %v6248_v37 = vrot.slane %v2768_v31, %v5658_v27  ;;  %v2800_v58 = vcombine.low %v6222_v1, %v6230_v5  ;;  %v220_v16 = vld [vmem:[%s5632_s2 + $0x2a0] sm:$0xff] }
  0x81   : > { %9408 = vst [vmem:[#allocation81_spill] sm:$0xff] %v6235_v54  ;;  %v379_v61 = vld [vmem:[%s5632_s2 + $0x798] sm:$0xff]  ;;  %v2976_v48 = vcombine.low %v155_v11, %v219_v62  ;;  %v2992_v21 = vcombine.low %v187_v12, %v251_v6  ;;  %v2696_v15 = vcombine.low %v6217_v23, %v6238_v4  ;;  %v6258_v57 = vrot.slane %v2872_v29, %v5638_v7  ;;  %v188_v11 = vld [vmem:[%s5632_s2 + $0x1a0] sm:$0xff] }
  0x82   : > { %9409 = vst [vmem:[#allocation82_spill] sm:$0xff] %v6241_v50  ;;  %9410 = vst [vmem:[#allocation83_spill] sm:$0xff] %v6248_v37  ;;  %v6261_v17 = vrot.slane %v2888_v36, %v5638_v7  ;;  %v2904_v31 = vcombine.low %v6235_v54, %v6241_v50  ;;  %v252_v12 = vld [vmem:[%s5632_s2 + $0x3a0] sm:$0xff]  ;;  %v6268_v62 = vrot.slane %v2800_v58, %v5658_v27 }
  0x83   : > { %9411 = vst [vmem:[#allocation84_spill] sm:$0xff] %v6258_v57  ;;  %v6271_v6 = vrot.slane %v2976_v48, %v5638_v7  ;;  %v6274_v29 = vrot.slane %v2992_v21, %v5638_v7  ;;  %v3008_v1 = vcombine.low %v283_v47, %v347_v41  ;;  %v284_v36 = vld [vmem:[%s5632_s2 + $0x4a0] sm:$0xff]  ;;  %4760 = vst [vmem:[%s5745_s17 + $0x80] sm:$0xff] %v2696_v15  ;;  %v157_v41 = vld [vmem:[%s5632_s2 + $0xa8] sm:$0xff] }
  0x84   : > { %9412 = vst [vmem:[#allocation85_spill] sm:$0xff] %v6261_v17  ;;  %9413 = vst [vmem:[#allocation86_spill] sm:$0xff] %v6268_v62  ;;  %v316_v5 = vld [vmem:[%s5632_s2 + $0x5a0] sm:$0xff]  ;;  %v6281_v54 = vrot.slane %v2904_v31, %v5658_v27  ;;  %v2936_v58 = vcombine.low %v6258_v57, %v6261_v17  ;;  %v3024_v50 = vcombine.low %v315_v35, %v379_v61  ;;  %v221_v47 = vld [vmem:[%s5632_s2 + $0x2a8] sm:$0xff] }
  0x85   : > { %9414 = vst [vmem:[#allocation87_spill] sm:$0xff] %v6271_v6  ;;  %9415 = vst [vmem:[#allocation88_spill] sm:$0xff] %v6274_v29  ;;  %v380_v48 = vld [vmem:[%s5632_s2 + $0x7a0] sm:$0xff]  ;;  %v3112_v21 = vcombine.low %v156_v40, %v220_v16  ;;  %v2832_v34 = vcombine.low %v6248_v37, %v6268_v62  ;;  %v6291_v15 = vrot.slane %v3008_v1, %v5638_v7  ;;  %v189_v35 = vld [vmem:[%s5632_s2 + $0x1a8] sm:$0xff] }
  0x86   : > { %9416 = vst [vmem:[#allocation89_spill] sm:$0xff] %v6281_v54  ;;  %v3040_v31 = vcombine.low %v6271_v6, %v6274_v29  ;;  %v3128_v57 = vcombine.low %v188_v11, %v252_v12  ;;  %v253_v61 = vld [vmem:[%s5632_s2 + $0x3a8] sm:$0xff]  ;;  %v6298_v40 = vrot.slane %v2936_v58, %v5658_v27  ;;  %v6301_v16 = vrot.slane %v3024_v50, %v5638_v7  ;;  %v158_v29 = vld [vmem:[%s5632_s2 + $0xb0] sm:$0xff]  ;;  %v359_v62 = vld [vmem:[%s5632_s2 + $0x6f8] sm:$0xff] }
  0x87   : > { %9417 = vst [vmem:[#allocation90_spill] sm:$0xff] %v6291_v15  ;;  %v6304_v17 = vrot.slane %v3112_v21, %v5638_v7  ;;  %v3144_v1 = vcombine.low %v284_v36, %v348_v33  ;;  %v349_v6 = vld [vmem:[%s5632_s2 + $0x6a8] sm:$0xff]  ;;  %4761 = vst [vmem:[%s5745_s17 + $0x88] sm:$0xff] %v2832_v34  ;;  %v3160_v58 = vcombine.low %v316_v5, %v380_v48  ;;  %v222_v33 = vld [vmem:[%s5632_s2 + $0x2b0] sm:$0xff] }
  0x88   : > { %9418 = vst [vmem:[#allocation91_spill] sm:$0xff] %v6298_v40  ;;  %9419 = vst [vmem:[#allocation92_spill] sm:$0xff] %v6301_v16  ;;  %v6311_v11 = vrot.slane %v3040_v31, %v5658_v27  ;;  %v6314_v12 = vrot.slane %v3128_v57, %v5638_v7  ;;  %v381_v50 = vld [vmem:[%s5632_s2 + $0x7a8] sm:$0xff]  ;;  %v3248_v21 = vcombine.low %v157_v41, %v221_v47  ;;  %v190_v5 = vld [vmem:[%s5632_s2 + $0x1b0] sm:$0xff] }
  0x89   : > { %9420 = vst [vmem:[#allocation93_spill] sm:$0xff] %v6304_v17  ;;  %v2968_v36 = vcombine.low %v6281_v54, %v6298_v40  ;;  %v3072_v34 = vcombine.low %v6291_v15, %v6301_v16  ;;  %v6324_v31 = vrot.slane %v3144_v1, %v5638_v7  ;;  %v3264_v57 = vcombine.low %v189_v35, %v253_v61  ;;  %v254_v48 = vld [vmem:[%s5632_s2 + $0x3b0] sm:$0xff] }
  0x8a   : > { %9421 = vst [vmem:[#allocation94_spill] sm:$0xff] %v6311_v11  ;;  %9422 = vst [vmem:[#allocation95_spill] sm:$0xff] %v6314_v12  ;;  %v6329_v37 = vrot.slane %v3160_v58, %v5638_v7  ;;  %v3176_v41 = vcombine.low %v6304_v17, %v6314_v12  ;;  %v6334_v47 = vrot.slane %v3248_v21, %v5638_v7  ;;  %v286_v15 = vld [vmem:[%s5632_s2 + $0x4b0] sm:$0xff]  ;;  %v159_v12 = vld [vmem:[%s5632_s2 + $0xb8] sm:$0xff] }
  0x8b   : > { %9423 = vst [vmem:[#allocation96_spill] sm:$0xff] %v6324_v31  ;;  %v3280_v54 = vcombine.low %v285_v20, %v349_v6  ;;  %v318_v1 = vld [vmem:[%s5632_s2 + $0x5b0] sm:$0xff]  ;;  %4762 = vst [vmem:[%s5745_s17 + $0x90] sm:$0xff] %v2968_v36  ;;  %v6340_v35 = vrot.slane %v3072_v34, %v5658_v27  ;;  %v6343_v61 = vrot.slane %v3264_v57, %v5638_v7  ;;  %v191_v34 = vld [vmem:[%s5632_s2 + $0x1b8] sm:$0xff] }
  0x8c   : > { %9424 = vst [vmem:[#allocation97_spill] sm:$0xff] %v6329_v37  ;;  %9425 = vst [vmem:[#allocation98_spill] sm:$0xff] %v6334_v47  ;;  %v3296_v58 = vcombine.low %v317_v26, %v381_v50  ;;  %v350_v16 = vld [vmem:[%s5632_s2 + $0x6b0] sm:$0xff]  ;;  %v3384_v17 = vcombine.low %v158_v29, %v222_v33  ;;  %v6349_v21 = vrot.slane %v3176_v41, %v5658_v27  ;;  %v223_v26 = vld [vmem:[%s5632_s2 + $0x2b8] sm:$0xff] }
  0x8d   : > { %9426 = vst [vmem:[#allocation99_spill] sm:$0xff] %v6340_v35  ;;  %9427 = vst [vmem:[#allocation100_spill] sm:$0xff] %v6343_v61  ;;  %v382_v40 = vld [vmem:[%s5632_s2 + $0x7b0] sm:$0xff]  ;;  %v3208_v20 = vcombine.low %v6324_v31, %v6329_v37  ;;  %v6354_v6 = vrot.slane %v3280_v54, %v5638_v7  ;;  %v3400_v36 = vcombine.low %v190_v5, %v254_v48  ;;  %v255_v50 = vld [vmem:[%s5632_s2 + $0x3b8] sm:$0xff] }
  0x8e   : > { %9428 = vst [vmem:[#allocation101_spill] sm:$0xff] %v6349_v21  ;;  %v3104_v29 = vcombine.low %v6311_v11, %v6340_v35  ;;  %v6362_v33 = vrot.slane %v3296_v58, %v5638_v7  ;;  %v3312_v57 = vcombine.low %v6334_v47, %v6343_v61  ;;  %v6367_v54 = vrot.slane %v3384_v17, %v5638_v7  ;;  %v287_v37 = vld [vmem:[%s5632_s2 + $0x4b8] sm:$0xff] }
  0x8f   : > { %9429 = vst [vmem:[#allocation102_spill] sm:$0xff] %v6354_v6  ;;  %v6370_v5 = vrot.slane %v3208_v20, %v5658_v27  ;;  %v6373_v48 = vrot.slane %v3400_v36, %v5638_v7  ;;  %v3416_v41 = vcombine.low %v286_v15, %v350_v16  ;;  %v3432_v31 = vcombine.low %v318_v1, %v382_v40  ;;  %v319_v58 = vld [vmem:[%s5632_s2 + $0x5b8] sm:$0xff]  ;;  %v160_v15 = vld [vmem:[%s5632_s2 + $0xc0] sm:$0xff] }
  0x90   : > { %9430 = vst [vmem:[#allocation103_spill] sm:$0xff] %v6362_v33  ;;  %9431 = vst [vmem:[#allocation104_spill] sm:$0xff] %v6367_v54  ;;  %v351_v11 = vld [vmem:[%s5632_s2 + $0x6b8] sm:$0xff]  ;;  %v6380_v47 = vrot.slane %v3312_v57, %v5658_v27  ;;  %v3344_v17 = vcombine.low %v6354_v6, %v6362_v33  ;;  %v3520_v61 = vcombine.low %v159_v12, %v223_v26  ;;  %v224_v40 = vld [vmem:[%s5632_s2 + $0x2c0] sm:$0xff] }
  0x91   : > { %9432 = vst [vmem:[#allocation105_spill] sm:$0xff] %v6370_v5  ;;  %9433 = vst [vmem:[#allocation106_spill] sm:$0xff] %v6373_v48  ;;  %v383_v20 = vld [vmem:[%s5632_s2 + $0x7b8] sm:$0xff]  ;;  %v3536_v36 = vcombine.low %v191_v34, %v255_v50  ;;  %v3240_v16 = vcombine.low %v6349_v21, %v6370_v5  ;;  %v6390_v1 = vrot.slane %v3416_v41, %v5638_v7  ;;  %v192_v12 = vld [vmem:[%s5632_s2 + $0x1c0] sm:$0xff] }
  0x92   : > { %4763 = vst [vmem:[%s5745_s17 + $0x98] sm:$0xff] %v3104_v29  ;;  %9434 = vst [vmem:[#allocation107_spill] sm:$0xff] %v6380_v47  ;;  %v6393_v29 = vrot.slane %v3432_v31, %v5638_v7  ;;  %v3448_v57 = vcombine.low %v6367_v54, %v6373_v48  ;;  %v256_v34 = vld [vmem:[%s5632_s2 + $0x3c0] sm:$0xff]  ;;  %v6400_v26 = vrot.slane %v3344_v17, %v5658_v27 }
  0x93   : > { %9435 = vst [vmem:[#allocation108_spill] sm:$0xff] %v6390_v1  ;;  %v6403_v50 = vrot.slane %v3520_v61, %v5638_v7  ;;  %v6406_v41 = vrot.slane %v3536_v36, %v5638_v7  ;;  %v3552_v6 = vcombine.low %v287_v37, %v351_v11  ;;  %v288_v31 = vld [vmem:[%s5632_s2 + $0x4c0] sm:$0xff]  ;;  %4764 = vst [vmem:[%s5745_s17 + $0xa0] sm:$0xff] %v3240_v16  ;;  %v161_v37 = vld [vmem:[%s5632_s2 + $0xc8] sm:$0xff] }
  0x94   : > { %9436 = vst [vmem:[#allocation109_spill] sm:$0xff] %v6393_v29  ;;  %9437 = vst [vmem:[#allocation110_spill] sm:$0xff] %v6400_v26  ;;  %v320_v33 = vld [vmem:[%s5632_s2 + $0x5c0] sm:$0xff]  ;;  %v6413_v54 = vrot.slane %v3448_v57, %v5658_v27  ;;  %v3480_v17 = vcombine.low %v6390_v1, %v6393_v29  ;;  %v3568_v48 = vcombine.low %v319_v58, %v383_v20  ;;  %v225_v11 = vld [vmem:[%s5632_s2 + $0x2c8] sm:$0xff] }
  0x95   : > { %9438 = vst [vmem:[#allocation111_spill] sm:$0xff] %v6403_v50  ;;  %9439 = vst [vmem:[#allocation112_spill] sm:$0xff] %v6406_v41  ;;  %v352_v21 = vld [vmem:[%s5632_s2 + $0x6c0] sm:$0xff]  ;;  %v3656_v36 = vcombine.low %v160_v15, %v224_v40  ;;  %v3376_v5 = vcombine.low %v6380_v47, %v6400_v26  ;;  %v6423_v16 = vrot.slane %v3552_v6, %v5638_v7  ;;  %v193_v58 = vld [vmem:[%s5632_s2 + $0x1c8] sm:$0xff] }
  0x96   : > { %9440 = vst [vmem:[#allocation113_spill] sm:$0xff] %v6413_v54  ;;  %v384_v61 = vld [vmem:[%s5632_s2 + $0x7c0] sm:$0xff]  ;;  %v3584_v57 = vcombine.low %v6403_v50, %v6406_v41  ;;  %v3672_v1 = vcombine.low %v192_v12, %v256_v34  ;;  %v257_v20 = vld [vmem:[%s5632_s2 + $0x3c8] sm:$0xff]  ;;  %v6430_v15 = vrot.slane %v3480_v17, %v5658_v27  ;;  %v6433_v40 = vrot.slane %v3568_v48, %v5638_v7  ;;  %v162_v41 = vld [vmem:[%s5632_s2 + $0xd0] sm:$0xff] }
  0x97   : > { %9441 = vst [vmem:[#allocation114_spill] sm:$0xff] %v6423_v16  ;;  %v6436_v29 = vrot.slane %v3656_v36, %v5638_v7  ;;  %v3688_v6 = vcombine.low %v288_v31, %v352_v21  ;;  %v289_v47 = vld [vmem:[%s5632_s2 + $0x4c8] sm:$0xff]  ;;  %4765 = vst [vmem:[%s5745_s17 + $0xa8] sm:$0xff] %v3376_v5  ;;  %v3704_v17 = vcombine.low %v320_v33, %v384_v61  ;;  %v226_v21 = vld [vmem:[%s5632_s2 + $0x2d0] sm:$0xff] }
  0x98   : > { %9442 = vst [vmem:[#allocation115_spill] sm:$0xff] %v6430_v15  ;;  %9443 = vst [vmem:[#allocation116_spill] sm:$0xff] %v6433_v40  ;;  %v321_v26 = vld [vmem:[%s5632_s2 + $0x5c8] sm:$0xff]  ;;  %v6443_v12 = vrot.slane %v3584_v57, %v5658_v27  ;;  %v6446_v34 = vrot.slane %v3672_v1, %v5638_v7  ;;  %v3792_v36 = vcombine.low %v161_v37, %v225_v11  ;;  %v194_v33 = vld [vmem:[%s5632_s2 + $0x1d0] sm:$0xff] }
  0x99   : > { %9444 = vst [vmem:[#allocation117_spill] sm:$0xff] %v6436_v29  ;;  %v353_v50 = vld [vmem:[%s5632_s2 + $0x6c8] sm:$0xff]  ;;  %v3512_v31 = vcombine.low %v6413_v54, %v6430_v15  ;;  %v3616_v5 = vcombine.low %v6423_v16, %v6433_v40  ;;  %v6456_v57 = vrot.slane %v3688_v6, %v5638_v7  ;;  %v3808_v1 = vcombine.low %v193_v58, %v257_v20  ;;  %v258_v61 = vld [vmem:[%s5632_s2 + $0x3d0] sm:$0xff] }
  0x9a   : > { %9445 = vst [vmem:[#allocation118_spill] sm:$0xff] %v6443_v12  ;;  %9446 = vst [vmem:[#allocation119_spill] sm:$0xff] %v6446_v34  ;;  %v385_v48 = vld [vmem:[%s5632_s2 + $0x7c8] sm:$0xff]  ;;  %v6461_v35 = vrot.slane %v3704_v17, %v5638_v7  ;;  %v3720_v37 = vcombine.low %v6436_v29, %v6446_v34  ;;  %v6466_v11 = vrot.slane %v3792_v36, %v5638_v7  ;;  %v290_v16 = vld [vmem:[%s5632_s2 + $0x4d0] sm:$0xff] }
  0x9b   : > { %9447 = vst [vmem:[#allocation120_spill] sm:$0xff] %v6456_v57  ;;  %v3824_v54 = vcombine.low %v289_v47, %v353_v50  ;;  %v322_v6 = vld [vmem:[%s5632_s2 + $0x5d0] sm:$0xff]  ;;  %4766 = vst [vmem:[%s5745_s17 + $0xb0] sm:$0xff] %v3512_v31  ;;  %v6472_v58 = vrot.slane %v3616_v5, %v5658_v27  ;;  %v6475_v20 = vrot.slane %v3808_v1, %v5638_v7  ;;  %v163_v34 = vld [vmem:[%s5632_s2 + $0xd8] sm:$0xff] }
  0x9c   : > { %9448 = vst [vmem:[#allocation121_spill] sm:$0xff] %v6461_v35  ;;  %9449 = vst [vmem:[#allocation122_spill] sm:$0xff] %v6466_v11  ;;  %v3840_v17 = vcombine.low %v321_v26, %v385_v48  ;;  %v354_v40 = vld [vmem:[%s5632_s2 + $0x6d0] sm:$0xff]  ;;  %v3928_v29 = vcombine.low %v162_v41, %v226_v21  ;;  %v6481_v36 = vrot.slane %v3720_v37, %v5658_v27  ;;  %v195_v5 = vld [vmem:[%s5632_s2 + $0x1d8] sm:$0xff] }
  0x9d   : > { %9450 = vst [vmem:[#allocation123_spill] sm:$0xff] %v6472_v58  ;;  %9451 = vst [vmem:[#allocation124_spill] sm:$0xff] %v6475_v20  ;;  %v386_v15 = vld [vmem:[%s5632_s2 + $0x7d0] sm:$0xff]  ;;  %v3752_v47 = vcombine.low %v6456_v57, %v6461_v35  ;;  %v6486_v50 = vrot.slane %v3824_v54, %v5638_v7  ;;  %v3944_v31 = vcombine.low %v194_v33, %v258_v61  ;;  %v227_v26 = vld [vmem:[%s5632_s2 + $0x2d8] sm:$0xff] }
  0x9e   : > { %9452 = vst [vmem:[#allocation125_spill] sm:$0xff] %v6481_v36  ;;  %v259_v48 = vld [vmem:[%s5632_s2 + $0x3d8] sm:$0xff]  ;;  %v3648_v41 = vcombine.low %v6443_v12, %v6472_v58  ;;  %v6494_v21 = vrot.slane %v3840_v17, %v5638_v7  ;;  %v3856_v1 = vcombine.low %v6466_v11, %v6475_v20  ;;  %v6499_v54 = vrot.slane %v3928_v29, %v5638_v7 }
  0x9f   : > { %9453 = vst [vmem:[#allocation126_spill] sm:$0xff] %v6486_v50  ;;  %v6502_v33 = vrot.slane %v3752_v47, %v5658_v27  ;;  %v6505_v61 = vrot.slane %v3944_v31, %v5638_v7  ;;  %v3960_v37 = vcombine.low %v290_v16, %v354_v40  ;;  %v3976_v57 = vcombine.low %v322_v6, %v386_v15  ;;  %v291_v35 = vld [vmem:[%s5632_s2 + $0x4d8] sm:$0xff]  ;;  %v164_v16 = vld [vmem:[%s5632_s2 + $0xe0] sm:$0xff] }
  0xa0   : > { %9454 = vst [vmem:[#allocation127_spill] sm:$0xff] %v6494_v21  ;;  %9455 = vst [vmem:[#allocation128_spill] sm:$0xff] %v6499_v54  ;;  %v323_v17 = vld [vmem:[%s5632_s2 + $0x5d8] sm:$0xff]  ;;  %v6512_v11 = vrot.slane %v3856_v1, %v5658_v27  ;;  %v3888_v29 = vcombine.low %v6486_v50, %v6494_v21  ;;  %v4064_v20 = vcombine.low %v163_v34, %v227_v26  ;;  %v228_v15 = vld [vmem:[%s5632_s2 + $0x2e0] sm:$0xff] }
  0xa1   : > { %9456 = vst [vmem:[#allocation129_spill] sm:$0xff] %v6502_v33  ;;  %9457 = vst [vmem:[#allocation130_spill] sm:$0xff] %v6505_v61  ;;  %v355_v12 = vld [vmem:[%s5632_s2 + $0x6d8] sm:$0xff]  ;;  %v4080_v31 = vcombine.low %v195_v5, %v259_v48  ;;  %v3784_v40 = vcombine.low %v6481_v36, %v6502_v33  ;;  %v6522_v6 = vrot.slane %v3960_v37, %v5638_v7  ;;  %v196_v34 = vld [vmem:[%s5632_s2 + $0x1e0] sm:$0xff] }
  0xa2   : > { %4767 = vst [vmem:[%s5745_s17 + $0xb8] sm:$0xff] %v3648_v41  ;;  %9458 = vst [vmem:[#allocation131_spill] sm:$0xff] %v6512_v11  ;;  %v387_v47 = vld [vmem:[%s5632_s2 + $0x7d8] sm:$0xff]  ;;  %v6525_v41 = vrot.slane %v3976_v57, %v5638_v7  ;;  %v3992_v1 = vcombine.low %v6499_v54, %v6505_v61  ;;  %v260_v5 = vld [vmem:[%s5632_s2 + $0x3e0] sm:$0xff]  ;;  %v6532_v26 = vrot.slane %v3888_v29, %v5658_v27 }
  0xa3   : > { %9459 = vst [vmem:[#allocation132_spill] sm:$0xff] %v6522_v6  ;;  %v6535_v48 = vrot.slane %v4064_v20, %v5638_v7  ;;  %v6538_v37 = vrot.slane %v4080_v31, %v5638_v7  ;;  %v4096_v50 = vcombine.low %v291_v35, %v355_v12  ;;  %v292_v57 = vld [vmem:[%s5632_s2 + $0x4e0] sm:$0xff]  ;;  %4768 = vst [vmem:[%s5745_s17 + $0xc0] sm:$0xff] %v3784_v40  ;;  %v165_v35 = vld [vmem:[%s5632_s2 + $0xe8] sm:$0xff] }
  0xa4   : > { %9460 = vst [vmem:[#allocation133_spill] sm:$0xff] %v6525_v41  ;;  %9461 = vst [vmem:[#allocation134_spill] sm:$0xff] %v6532_v26  ;;  %v324_v21 = vld [vmem:[%s5632_s2 + $0x5e0] sm:$0xff]  ;;  %v6545_v54 = vrot.slane %v3992_v1, %v5658_v27  ;;  %v4024_v29 = vcombine.low %v6522_v6, %v6525_v41  ;;  %v4112_v61 = vcombine.low %v323_v17, %v387_v47  ;;  %v229_v12 = vld [vmem:[%s5632_s2 + $0x2e8] sm:$0xff] }
  0xa5   : > { %9462 = vst [vmem:[#allocation135_spill] sm:$0xff] %v6535_v48  ;;  %9463 = vst [vmem:[#allocation136_spill] sm:$0xff] %v6538_v37  ;;  %v356_v36 = vld [vmem:[%s5632_s2 + $0x6e0] sm:$0xff]  ;;  %v4200_v31 = vcombine.low %v164_v16, %v228_v15  ;;  %v3920_v33 = vcombine.low %v6512_v11, %v6532_v26  ;;  %v6555_v40 = vrot.slane %v4096_v50, %v5638_v7  ;;  %v197_v17 = vld [vmem:[%s5632_s2 + $0x1e8] sm:$0xff] }
  0xa6   : > { %9464 = vst [vmem:[#allocation137_spill] sm:$0xff] %v6545_v54  ;;  %v388_v20 = vld [vmem:[%s5632_s2 + $0x7e0] sm:$0xff]  ;;  %v4128_v1 = vcombine.low %v6535_v48, %v6538_v37  ;;  %v4216_v6 = vcombine.low %v196_v34, %v260_v5  ;;  %v261_v47 = vld [vmem:[%s5632_s2 + $0x3e8] sm:$0xff]  ;;  %v6562_v16 = vrot.slane %v4024_v29, %v5658_v27  ;;  %v6565_v15 = vrot.slane %v4112_v61, %v5638_v7  ;;  %v166_v37 = vld [vmem:[%s5632_s2 + $0xf0] sm:$0xff] }
  0xa7   : > { %9465 = vst [vmem:[#allocation138_spill] sm:$0xff] %v6555_v40  ;;  %v6568_v41 = vrot.slane %v4200_v31, %v5638_v7  ;;  %v4232_v50 = vcombine.low %v292_v57, %v356_v36  ;;  %v293_v11 = vld [vmem:[%s5632_s2 + $0x4e8] sm:$0xff]  ;;  %4769 = vst [vmem:[%s5745_s17 + $0xc8] sm:$0xff] %v3920_v33  ;;  %v4248_v29 = vcombine.low %v324_v21, %v388_v20  ;;  %v230_v36 = vld [vmem:[%s5632_s2 + $0x2f0] sm:$0xff] }
  0xa8   : > { %9466 = vst [vmem:[#allocation139_spill] sm:$0xff] %v6562_v16  ;;  %9467 = vst [vmem:[#allocation140_spill] sm:$0xff] %v6565_v15  ;;  %v325_v26 = vld [vmem:[%s5632_s2 + $0x5e8] sm:$0xff]  ;;  %v6575_v34 = vrot.slane %v4128_v1, %v5658_v27  ;;  %v6578_v5 = vrot.slane %v4216_v6, %v5638_v7  ;;  %v4336_v31 = vcombine.low %v165_v35, %v229_v12  ;;  %v198_v21 = vld [vmem:[%s5632_s2 + $0x1f0] sm:$0xff] }
  0xa9   : > { %9468 = vst [vmem:[#allocation141_spill] sm:$0xff] %v6568_v41  ;;  %v357_v48 = vld [vmem:[%s5632_s2 + $0x6e8] sm:$0xff]  ;;  %v4056_v57 = vcombine.low %v6545_v54, %v6562_v16  ;;  %v4160_v33 = vcombine.low %v6555_v40, %v6565_v15  ;;  %v6588_v1 = vrot.slane %v4232_v50, %v5638_v7  ;;  %v4352_v6 = vcombine.low %v197_v17, %v261_v47  ;;  %v262_v20 = vld [vmem:[%s5632_s2 + $0x3f0] sm:$0xff] }
  0xaa   : > { %9469 = vst [vmem:[#allocation142_spill] sm:$0xff] %v6575_v34  ;;  %9470 = vst [vmem:[#allocation143_spill] sm:$0xff] %v6578_v5  ;;  %v389_v61 = vld [vmem:[%s5632_s2 + $0x7e8] sm:$0xff]  ;;  %v6593_v58 = vrot.slane %v4248_v29, %v5638_v7  ;;  %v4264_v35 = vcombine.low %v6568_v41, %v6578_v5  ;;  %v6598_v12 = vrot.slane %v4336_v31, %v5638_v7  ;;  %v294_v40 = vld [vmem:[%s5632_s2 + $0x4f0] sm:$0xff] }
  0xab   : > { %9471 = vst [vmem:[#allocation144_spill] sm:$0xff] %v6588_v1  ;;  %v4368_v54 = vcombine.low %v293_v11, %v357_v48  ;;  %v326_v50 = vld [vmem:[%s5632_s2 + $0x5f0] sm:$0xff]  ;;  %4770 = vst [vmem:[%s5745_s17 + $0xd0] sm:$0xff] %v4056_v57  ;;  %v6604_v17 = vrot.slane %v4160_v33, %v5658_v27  ;;  %v6607_v47 = vrot.slane %v4352_v6, %v5638_v7  ;;  %v167_v5 = vld [vmem:[%s5632_s2 + $0xf8] sm:$0xff] }
  0xac   : > { %9472 = vst [vmem:[#allocation145_spill] sm:$0xff] %v6593_v58  ;;  %9473 = vst [vmem:[#allocation146_spill] sm:$0xff] %v6598_v12  ;;  %v4384_v29 = vcombine.low %v325_v26, %v389_v61  ;;  %v358_v15 = vld [vmem:[%s5632_s2 + $0x6f0] sm:$0xff]  ;;  %v4472_v41 = vcombine.low %v166_v37, %v230_v36  ;;  %v6613_v31 = vrot.slane %v4264_v35, %v5658_v27  ;;  %v199_v33 = vld [vmem:[%s5632_s2 + $0x1f8] sm:$0xff] }
  0xad   : > { %9474 = vst [vmem:[#allocation147_spill] sm:$0xff] %v6607_v47  ;;  %v390_v16 = vld [vmem:[%s5632_s2 + $0x7f0] sm:$0xff]  ;;  %v4296_v11 = vcombine.low %v6588_v1, %v6593_v58  ;;  %v6618_v48 = vrot.slane %v4368_v54, %v5638_v7  ;;  %v4488_v57 = vcombine.low %v198_v21, %v262_v20  ;;  %v231_v26 = vld [vmem:[%s5632_s2 + $0x2f8] sm:$0xff]  ;;  %v4192_v37 = vcombine.low %v6575_v34, %v6604_v17 }
  0xae   : > { %v263_v61 = vld [vmem:[%s5632_s2 + $0x3f8] sm:$0xff]  ;;  %v6626_v36 = vrot.slane %v4384_v29, %v5638_v7  ;;  %v4400_v6 = vcombine.low %v6598_v12, %v6607_v47  ;;  %v6631_v35 = vrot.slane %v4472_v41, %v5638_v7  ;;  %v4504_v20 = vcombine.low %v294_v40, %v358_v15 }
  0xaf   : > { %v6634_v54 = vrot.slane %v4296_v11, %v5658_v27  ;;  %v6637_v21 = vrot.slane %v4488_v57, %v5638_v7  ;;  %v4520_v1 = vcombine.low %v326_v50, %v390_v16  ;;  %v295_v58 = vld [vmem:[%s5632_s2 + $0x4f8] sm:$0xff]  ;;  %4771 = vst [vmem:[%s5745_s17 + $0xd8] sm:$0xff] %v4192_v37  ;;  %v4608_v34 = vcombine.low %v167_v5, %v231_v26 }
  0xb0   : > { %v6643_v29 = vrot.slane %v4400_v6, %v5658_v27  ;;  %v4432_v12 = vcombine.low %v6618_v48, %v6626_v36  ;;  %v327_v41 = vld [vmem:[%s5632_s2 + $0x5f8] sm:$0xff]  ;;  %v4624_v11 = vcombine.low %v199_v33, %v263_v61  ;;  %v6652_v40 = vrot.slane %v4504_v20, %v5638_v7 }
  0xb1   : > { %v391_v47 = vld [vmem:[%s5632_s2 + $0x7f8] sm:$0xff]  ;;  %v4328_v57 = vcombine.low %v6613_v31, %v6634_v54  ;;  %v6655_v16 = vrot.slane %v4520_v1, %v5638_v7  ;;  %v4536_v15 = vcombine.low %v6631_v35, %v6637_v21  ;;  %v6663_v37 = vrot.slane %v4608_v34, %v5638_v7 }
  0xb2   : > { %v6660_v50 = vrot.slane %v4432_v12, %v5658_v27  ;;  %v6666_v5 = vrot.slane %v4624_v11, %v5638_v7  ;;  %v4640_v33 = vcombine.low %v295_v58, %v359_v62  ;;  %v4656_v61 = vcombine.low %v327_v41, %v391_v47 }
  0xb3   : > { %4772 = vst [vmem:[%s5745_s17 + $0xe0] sm:$0xff] %v4328_v57  ;;  %v6670_v1 = vrot.slane %v4536_v15, %v5658_v27  ;;  %v4568_v26 = vcombine.low %v6652_v40, %v6655_v16  ;;  %v521_v12 = vcombine.high %v5692_v53, %v5703_v60  ;;  %v657_v58 = vcombine.high %v5715_v3, %v5736_v18  ;;  %v9486_v57 = vld [vmem:[#allocation113_spill] sm:$0xff] }
  0xb4   : > { %v4464_v34 = vcombine.low %v6643_v29, %v6660_v50  ;;  %v6679_v6 = vrot.slane %v4640_v33, %v5638_v7  ;;  %v4672_v62 = vcombine.low %v6663_v37, %v6666_v5  ;;  %v6689_v47 = vrot.slane %v4656_v61, %v5638_v7  ;;  %v9487_v33 = vld [vmem:[#allocation123_spill] sm:$0xff] }
  0xb5   : > { %v6686_v20 = vrot.slane %v4568_v26, %v5658_v27  ;;  %4776 = vst [vmem:[%s5745_s17 + $0x100] sm:$0xff] %v521_v12  ;;  %v793_v53 = vcombine.high %v5749_v25, %v5771_v45  ;;  %v929_v60 = vcombine.high %v5793_v2, %v5801_v10  ;;  %4777 = vst [vmem:[%s5745_s17 + $0x108] sm:$0xff] %v657_v58  ;;  %v9488_v26 = vld [vmem:[#allocation118_spill] sm:$0xff]  ;;  %v9489_v12 = vld [vmem:[#allocation129_spill] sm:$0xff] }
  0xb6   : > { %4773 = vst [vmem:[%s5745_s17 + $0xe8] sm:$0xff] %v4464_v34  ;;  %v6698_v41 = vrot.slane %v4672_v62, %v5658_v27  ;;  %v1065_v3 = vcombine.high %v5823_v32, %v5843_v51  ;;  %v1201_v18 = vcombine.high %v5852_v0, %v5872_v30  ;;  %v1337_v11 = vcombine.high %v5885_v49, %v5902_v13  ;;  %v9490_v34 = vld [vmem:[#allocation125_spill] sm:$0xff]  ;;  %v9491_v58 = vld [vmem:[#allocation134_spill] sm:$0xff] }
  0xb7   : > { %v4600_v25 = vcombine.low %v6670_v1, %v6686_v20  ;;  %v4704_v45 = vcombine.low %v6679_v6, %v6689_v47  ;;  %4778 = vst [vmem:[%s5745_s17 + $0x110] sm:$0xff] %v793_v53  ;;  %4779 = vst [vmem:[%s5745_s17 + $0x118] sm:$0xff] %v929_v60  ;;  %v1473_v2 = vcombine.high %v5915_v24, %v5944_v59  ;;  %v9492_v53 = vld [vmem:[#allocation131_spill] sm:$0xff] }
  0xb8   : > { %v1609_v10 = vcombine.high %v5953_v8, %v5974_v42  ;;  %4780 = vst [vmem:[%s5745_s17 + $0x120] sm:$0xff] %v1065_v3  ;;  %4781 = vst [vmem:[%s5745_s17 + $0x128] sm:$0xff] %v1201_v18  ;;  %v1745_v32 = vcombine.high %v5984_v63, %v6004_v52  ;;  %v1881_v51 = vcombine.high %v6017_v46, %v6034_v14  ;;  %v9475_v8 = vld [vmem:[#allocation86_spill] sm:$0xff]  ;;  %v9476_v46 = vld [vmem:[#allocation83_spill] sm:$0xff] }
  0xb9   : > { %4782 = vst [vmem:[%s5745_s17 + $0x130] sm:$0xff] %v1337_v11  ;;  %v2017_v0 = vcombine.high %v6047_v28, %v6076_v55  ;;  %v2153_v30 = vcombine.high %v6085_v43, %v6106_v39  ;;  %4774 = vst [vmem:[%s5745_s17 + $0xf0] sm:$0xff] %v4600_v25  ;;  %v4712_v49 = vrot.slane %v4704_v45, %v5658_v27  ;;  %v9477_v52 = vld [vmem:[#allocation91_spill] sm:$0xff]  ;;  %v9478_v14 = vld [vmem:[#allocation89_spill] sm:$0xff] }
  0xba   : > { %4783 = vst [vmem:[%s5745_s17 + $0x138] sm:$0xff] %v1473_v2  ;;  %4784 = vst [vmem:[%s5745_s17 + $0x140] sm:$0xff] %v1609_v10  ;;  %v2289_v13 = vcombine.high %v6116_v44, %v6136_v56  ;;  %v2425_v24 = vcombine.high %v6149_v38, %v6166_v19  ;;  %v2561_v63 = vcombine.high %v6179_v9, %v6208_v22  ;;  %v9479_v44 = vld [vmem:[#allocation99_spill] sm:$0xff]  ;;  %v9480_v55 = vld [vmem:[#allocation94_spill] sm:$0xff] }
  0xbb   : > { %4785 = vst [vmem:[%s5745_s17 + $0x148] sm:$0xff] %v1745_v32  ;;  %4786 = vst [vmem:[%s5745_s17 + $0x150] sm:$0xff] %v1881_v51  ;;  %v2697_v59 = vcombine.high %v6217_v23, %v6238_v4  ;;  %v2833_v42 = vcombine.high %v9476_v46, %v9475_v8  ;;  %v2969_v28 = vcombine.high %v9478_v14, %v9477_v52  ;;  %v9481_v39 = vld [vmem:[#allocation105_spill] sm:$0xff]  ;;  %v9483_v9 = vld [vmem:[#allocation110_spill] sm:$0xff] }
  0xbc   : > { %4787 = vst [vmem:[%s5745_s17 + $0x158] sm:$0xff] %v2017_v0  ;;  %4788 = vst [vmem:[%s5745_s17 + $0x160] sm:$0xff] %v2153_v30  ;;  %v3105_v43 = vcombine.high %v9480_v55, %v9479_v44  ;;  %v4736_v38 = vcombine.low %v6698_v41, %v4712_v49  ;;  %v9482_v56 = vld [vmem:[#allocation101_spill] sm:$0xff]  ;;  %v9484_v22 = vld [vmem:[#allocation107_spill] sm:$0xff]  ;;  %v3649_v61 = vcombine.high %v9488_v26, %v9487_v33 }
  0xbd   : > { %4789 = vst [vmem:[%s5745_s17 + $0x168] sm:$0xff] %v2289_v13  ;;  %4790 = vst [vmem:[%s5745_s17 + $0x170] sm:$0xff] %v2425_v24  ;;  %v3241_v19 = vcombine.high %v9482_v56, %v9481_v39  ;;  %v3377_v23 = vcombine.high %v9484_v22, %v9483_v9  ;;  %v9485_v4 = vld [vmem:[#allocation115_spill] sm:$0xff]  ;;  %v3785_v62 = vcombine.high %v9490_v34, %v9489_v12  ;;  %v9494_v18 = vld [vmem:[#allocation137_spill] sm:$0xff] }
  0xbe   : > { %4791 = vst [vmem:[%s5745_s17 + $0x178] sm:$0xff] %v2561_v63  ;;  %v3513_v15 = vcombine.high %v9486_v57, %v9485_v4  ;;  %4792 = vst [vmem:[%s5745_s17 + $0x180] sm:$0xff] %v2697_v59  ;;  %v3921_v60 = vcombine.high %v9492_v53, %v9491_v58  ;;  %v9493_v3 = vld [vmem:[#allocation139_spill] sm:$0xff]  ;;  %v9495_v25 = vld [vmem:[#allocation142_spill] sm:$0xff]  ;;  %v4329_v2 = vcombine.high %v6613_v31, %v6634_v54 }
  0xbf   : > { %4793 = vst [vmem:[%s5745_s17 + $0x188] sm:$0xff] %v2833_v42  ;;  %4794 = vst [vmem:[%s5745_s17 + $0x190] sm:$0xff] %v2969_v28  ;;  %v4057_v11 = vcombine.high %v9494_v18, %v9493_v3  ;;  %v4193_v45 = vcombine.high %v9495_v25, %v6604_v17  ;;  %v4465_v10 = vcombine.high %v6643_v29, %v6660_v50  ;;  %v9496_v0 = vld [vmem:[#allocation10_spill] sm:$0xff]  ;;  %v9497_v30 = vld [vmem:[#allocation9_spill] sm:$0xff] }
  0xc0   : > { %4795 = vst [vmem:[%s5745_s17 + $0x198] sm:$0xff] %v3105_v43  ;;  %4775 = vst [vmem:[%s5745_s17 + $0xf8] sm:$0xff] %v4736_v38  ;;  %v4601_v32 = vcombine.high %v6670_v1, %v6686_v20  ;;  %v4737_v51 = vcombine.high %v6698_v41, %v4712_v49  ;;  %v457_v13 = vcombine.high %v9497_v30, %v9496_v0  ;;  %v9498_v17 = vld [vmem:[#allocation12_spill] sm:$0xff]  ;;  %v9499_v24 = vld [vmem:[#allocation11_spill] sm:$0xff] }
  0xc1   : > { %4796 = vst [vmem:[%s5745_s17 + $0x1a0] sm:$0xff] %v3241_v19  ;;  %4797 = vst [vmem:[%s5745_s17 + $0x1a8] sm:$0xff] %v3377_v23  ;;  %v489_v63 = vcombine.high %v9499_v24, %v9498_v17  ;;  %v9500_v31 = vld [vmem:[#allocation14_spill] sm:$0xff]  ;;  %v9501_v54 = vld [vmem:[#allocation13_spill] sm:$0xff] }
  0xc2   : > { %4798 = vst [vmem:[%s5745_s17 + $0x1b0] sm:$0xff] %v3513_v15  ;;  %4799 = vst [vmem:[%s5745_s17 + $0x1b8] sm:$0xff] %v3649_v61  ;;  %v593_v59 = vcombine.high %v9501_v54, %v9500_v31  ;;  %v9502_v29 = vld [vmem:[#allocation16_spill] sm:$0xff]  ;;  %v9503_v50 = vld [vmem:[#allocation15_spill] sm:$0xff]  ;;  %v6809_v44 = vrot.slane %v457_v13, %v5658_v27 }
  0xc3   : > { %4800 = vst [vmem:[%s5745_s17 + $0x1c0] sm:$0xff] %v3785_v62  ;;  %4801 = vst [vmem:[%s5745_s17 + $0x1c8] sm:$0xff] %v3921_v60  ;;  %v625_v1 = vcombine.high %v9503_v50, %v9502_v29  ;;  %v9504_v20 = vld [vmem:[#allocation18_spill] sm:$0xff]  ;;  %v9505_v8 = vld [vmem:[#allocation17_spill] sm:$0xff]  ;;  %v6812_v55 = vrot.slane %v489_v63, %v5658_v27 }
  0xc4   : > { %4802 = vst [vmem:[%s5745_s17 + $0x1d0] sm:$0xff] %v4057_v11  ;;  %4803 = vst [vmem:[%s5745_s17 + $0x1d8] sm:$0xff] %v4193_v45  ;;  %v729_v46 = vcombine.high %v9505_v8, %v9504_v20  ;;  %v9506_v41 = vld [vmem:[#allocation20_spill] sm:$0xff]  ;;  %v9507_v49 = vld [vmem:[#allocation19_spill] sm:$0xff]  ;;  %v6815_v43 = vrot.slane %v593_v59, %v5658_v27 }
  0xc5   : > { %4804 = vst [vmem:[%s5745_s17 + $0x1e0] sm:$0xff] %v4329_v2  ;;  %4805 = vst [vmem:[%s5745_s17 + $0x1e8] sm:$0xff] %v4465_v10  ;;  %v761_v42 = vcombine.high %v9507_v49, %v9506_v41  ;;  %v9508_v52 = vld [vmem:[#allocation22_spill] sm:$0xff]  ;;  %v9509_v14 = vld [vmem:[#allocation21_spill] sm:$0xff]  ;;  %v6820_v19 = vrot.slane %v625_v1, %v5658_v27  ;;  %v522_v4 = vcombine.low %v6809_v44, %v6812_v55 }
  0xc6   : > { %4806 = vst [vmem:[%s5745_s17 + $0x1f0] sm:$0xff] %v4601_v32  ;;  %v865_v28 = vcombine.high %v9509_v14, %v9508_v52  ;;  %4807 = vst [vmem:[%s5745_s17 + $0x1f8] sm:$0xff] %v4737_v51  ;;  %v9510_v38 = vld [vmem:[#allocation24_spill] sm:$0xff]  ;;  %v9511_v39 = vld [vmem:[#allocation23_spill] sm:$0xff]  ;;  %v6823_v9 = vrot.slane %v729_v46, %v5658_v27 }
  0xc7   : > { %v897_v56 = vcombine.high %v9511_v39, %v9510_v38  ;;  %v6826_v22 = vrot.slane %v761_v42, %v5658_v27  ;;  %v9512_v15 = vld [vmem:[#allocation26_spill] sm:$0xff]  ;;  %v9513_v33 = vld [vmem:[#allocation25_spill] sm:$0xff]  ;;  %v9514_v61 = vld [vmem:[#allocation28_spill] sm:$0xff]  ;;  %v658_v62 = vcombine.low %v6815_v43, %v6820_v19  ;;  %4808 = vst [vmem:[%s5745_s17 + $0x200] sm:$0xff] %v522_v4 }
  0xc8   : > { %v6829_v23 = vrot.slane %v865_v28, %v5658_v27  ;;  %v1001_v26 = vcombine.high %v9513_v33, %v9512_v15  ;;  %v9515_v12 = vld [vmem:[#allocation27_spill] sm:$0xff]  ;;  %v9516_v53 = vld [vmem:[#allocation30_spill] sm:$0xff]  ;;  %v9517_v60 = vld [vmem:[#allocation29_spill] sm:$0xff] }
  0xc9   : > { %v6834_v57 = vrot.slane %v897_v56, %v5658_v27  ;;  %v1033_v34 = vcombine.high %v9515_v12, %v9514_v61  ;;  %v794_v58 = vcombine.low %v6823_v9, %v6826_v22  ;;  %v1137_v3 = vcombine.high %v9517_v60, %v9516_v53  ;;  %v9518_v18 = vld [vmem:[#allocation32_spill] sm:$0xff]  ;;  %v9519_v11 = vld [vmem:[#allocation31_spill] sm:$0xff]  ;;  %v9520_v32 = vld [vmem:[#allocation34_spill] sm:$0xff]  ;;  %4809 = vst [vmem:[%s5745_s17 + $0x208] sm:$0xff] %v658_v62 }
  0xca   : > { %v1169_v25 = vcombine.high %v9519_v11, %v9518_v18  ;;  %v6852_v2 = vrot.slane %v1001_v26, %v5658_v27  ;;  %v9521_v51 = vld [vmem:[#allocation33_spill] sm:$0xff]  ;;  %v9522_v17 = vld [vmem:[#allocation36_spill] sm:$0xff]  ;;  %v9523_v24 = vld [vmem:[#allocation35_spill] sm:$0xff] }
  0xcb   : > { %v930_v45 = vcombine.low %v6829_v23, %v6834_v57  ;;  %v6855_v10 = vrot.slane %v1033_v34, %v5658_v27  ;;  %v1273_v0 = vcombine.high %v9521_v51, %v9520_v32  ;;  %4810 = vst [vmem:[%s5745_s17 + $0x210] sm:$0xff] %v794_v58  ;;  %v6862_v30 = vrot.slane %v1137_v3, %v5658_v27  ;;  %v9524_v31 = vld [vmem:[#allocation38_spill] sm:$0xff]  ;;  %v9525_v54 = vld [vmem:[#allocation37_spill] sm:$0xff]  ;;  %v9526_v1 = vld [vmem:[#allocation40_spill] sm:$0xff] }
  0xcc   : > { %v6865_v13 = vrot.slane %v1169_v25, %v5658_v27  ;;  %v1305_v63 = vcombine.high %v9523_v24, %v9522_v17  ;;  %v1409_v59 = vcombine.high %v9525_v54, %v9524_v31  ;;  %v9527_v20 = vld [vmem:[#allocation39_spill] sm:$0xff]  ;;  %v9528_v46 = vld [vmem:[#allocation42_spill] sm:$0xff]  ;;  %v9529_v41 = vld [vmem:[#allocation41_spill] sm:$0xff] }
  0xcd   : > { %4811 = vst [vmem:[%s5745_s17 + $0x218] sm:$0xff] %v930_v45  ;;  %v1066_v29 = vcombine.low %v6852_v2, %v6855_v10  ;;  %v6875_v50 = vrot.slane %v1273_v0, %v5658_v27  ;;  %v1441_v8 = vcombine.high %v9527_v20, %v9526_v1  ;;  %v1545_v49 = vcombine.high %v9529_v41, %v9528_v46  ;;  %v9530_v28 = vld [vmem:[#allocation44_spill] sm:$0xff]  ;;  %v9531_v38 = vld [vmem:[#allocation43_spill] sm:$0xff]  ;;  %v9532_v15 = vld [vmem:[#allocation46_spill] sm:$0xff] }
  0xce   : > { %v1202_v42 = vcombine.low %v6862_v30, %v6865_v13  ;;  %v6884_v52 = vrot.slane %v1305_v63, %v5658_v27  ;;  %v6887_v14 = vrot.slane %v1409_v59, %v5658_v27  ;;  %v1577_v39 = vcombine.high %v9531_v38, %v9530_v28  ;;  %v9533_v33 = vld [vmem:[#allocation45_spill] sm:$0xff]  ;;  %v9534_v61 = vld [vmem:[#allocation48_spill] sm:$0xff]  ;;  %v9535_v12 = vld [vmem:[#allocation47_spill] sm:$0xff] }
  0xcf   : > { %4812 = vst [vmem:[%s5745_s17 + $0x220] sm:$0xff] %v1066_v29  ;;  %v6893_v56 = vrot.slane %v1441_v8, %v5658_v27  ;;  %v6896_v4 = vrot.slane %v1545_v49, %v5658_v27  ;;  %v1681_v26 = vcombine.high %v9533_v33, %v9532_v15  ;;  %v1713_v34 = vcombine.high %v9535_v12, %v9534_v61  ;;  %v9536_v53 = vld [vmem:[#allocation50_spill] sm:$0xff]  ;;  %v9537_v60 = vld [vmem:[#allocation49_spill] sm:$0xff]  ;;  %v9538_v18 = vld [vmem:[#allocation52_spill] sm:$0xff] }
  0xd0   : > { %4813 = vst [vmem:[%s5745_s17 + $0x228] sm:$0xff] %v1202_v42  ;;  %v1338_v62 = vcombine.low %v6875_v50, %v6884_v52  ;;  %v6906_v58 = vrot.slane %v1577_v39, %v5658_v27  ;;  %v1817_v3 = vcombine.high %v9537_v60, %v9536_v53  ;;  %v9539_v11 = vld [vmem:[#allocation51_spill] sm:$0xff]  ;;  %v9540_v0 = vld [vmem:[#allocation54_spill] sm:$0xff]  ;;  %v9541_v17 = vld [vmem:[#allocation53_spill] sm:$0xff] }
  0xd1   : > { %v1849_v25 = vcombine.high %v9539_v11, %v9538_v18  ;;  %v1474_v45 = vcombine.low %v6887_v14, %v6893_v56  ;;  %v6915_v32 = vrot.slane %v1681_v26, %v5658_v27  ;;  %v6918_v51 = vrot.slane %v1713_v34, %v5658_v27  ;;  %v9542_v59 = vld [vmem:[#allocation56_spill] sm:$0xff]  ;;  %v9543_v29 = vld [vmem:[#allocation55_spill] sm:$0xff]  ;;  %v9544_v46 = vld [vmem:[#allocation58_spill] sm:$0xff] }
  0xd2   : > { %v1953_v24 = vcombine.high %v9541_v17, %v9540_v0  ;;  %4814 = vst [vmem:[%s5745_s17 + $0x230] sm:$0xff] %v1338_v62  ;;  %v1610_v63 = vcombine.low %v6896_v4, %v6906_v58  ;;  %v6926_v31 = vrot.slane %v1817_v3, %v5658_v27  ;;  %v1985_v1 = vcombine.high %v9543_v29, %v9542_v59  ;;  %v9545_v41 = vld [vmem:[#allocation57_spill] sm:$0xff]  ;;  %v9546_v42 = vld [vmem:[#allocation60_spill] sm:$0xff]  ;;  %v9547_v28 = vld [vmem:[#allocation59_spill] sm:$0xff] }
  0xd3   : > { %v6929_v54 = vrot.slane %v1849_v25, %v5658_v27  ;;  %4815 = vst [vmem:[%s5745_s17 + $0x238] sm:$0xff] %v1474_v45  ;;  %v1746_v20 = vcombine.low %v6915_v32, %v6918_v51  ;;  %v2089_v49 = vcombine.high %v9545_v41, %v9544_v46  ;;  %v2121_v38 = vcombine.high %v9547_v28, %v9546_v42  ;;  %v9548_v33 = vld [vmem:[#allocation62_spill] sm:$0xff]  ;;  %v9549_v26 = vld [vmem:[#allocation61_spill] sm:$0xff]  ;;  %v9550_v12 = vld [vmem:[#allocation64_spill] sm:$0xff] }
  0xd4   : > { %v6937_v8 = vrot.slane %v1953_v24, %v5658_v27  ;;  %4816 = vst [vmem:[%s5745_s17 + $0x240] sm:$0xff] %v1610_v63  ;;  %v6947_v15 = vrot.slane %v1985_v1, %v5658_v27  ;;  %v2225_v61 = vcombine.high %v9549_v26, %v9548_v33  ;;  %v9551_v34 = vld [vmem:[#allocation63_spill] sm:$0xff]  ;;  %v9552_v3 = vld [vmem:[#allocation66_spill] sm:$0xff]  ;;  %v9553_v18 = vld [vmem:[#allocation65_spill] sm:$0xff] }
  0xd5   : > { %v1882_v39 = vcombine.low %v6926_v31, %v6929_v54  ;;  %v2257_v62 = vcombine.high %v9551_v34, %v9550_v12  ;;  %4817 = vst [vmem:[%s5745_s17 + $0x248] sm:$0xff] %v1746_v20  ;;  %v6955_v53 = vrot.slane %v2089_v49, %v5658_v27  ;;  %v6958_v60 = vrot.slane %v2121_v38, %v5658_v27  ;;  %v9554_v25 = vld [vmem:[#allocation68_spill] sm:$0xff]  ;;  %v9555_v45 = vld [vmem:[#allocation67_spill] sm:$0xff]  ;;  %v9556_v59 = vld [vmem:[#allocation70_spill] sm:$0xff] }
  0xd6   : > { %v2361_v11 = vcombine.high %v9553_v18, %v9552_v3  ;;  %v2393_v0 = vcombine.high %v9555_v45, %v9554_v25  ;;  %v2018_v17 = vcombine.low %v6937_v8, %v6947_v15  ;;  %v6968_v24 = vrot.slane %v2225_v61, %v5658_v27  ;;  %v9557_v29 = vld [vmem:[#allocation69_spill] sm:$0xff]  ;;  %v9558_v49 = vld [vmem:[#allocation72_spill] sm:$0xff]  ;;  %v9559_v42 = vld [vmem:[#allocation71_spill] sm:$0xff] }
  0xd7   : > { %4818 = vst [vmem:[%s5745_s17 + $0x250] sm:$0xff] %v1882_v39  ;;  %v6971_v63 = vrot.slane %v2257_v62, %v5658_v27  ;;  %v2497_v1 = vcombine.high %v9557_v29, %v9556_v59  ;;  %v2154_v20 = vcombine.low %v6955_v53, %v6958_v60  ;;  %v2529_v28 = vcombine.high %v9559_v42, %v9558_v49  ;;  %v9560_v33 = vld [vmem:[#allocation74_spill] sm:$0xff]  ;;  %v9561_v26 = vld [vmem:[#allocation73_spill] sm:$0xff]  ;;  %v9562_v12 = vld [vmem:[#allocation76_spill] sm:$0xff] }
  0xd8   : > { %v6978_v46 = vrot.slane %v2361_v11, %v5658_v27  ;;  %v6981_v41 = vrot.slane %v2393_v0, %v5658_v27  ;;  %4819 = vst [vmem:[%s5745_s17 + $0x258] sm:$0xff] %v2018_v17  ;;  %v2633_v61 = vcombine.high %v9561_v26, %v9560_v33  ;;  %v9563_v34 = vld [vmem:[#allocation75_spill] sm:$0xff]  ;;  %v9564_v11 = vld [vmem:[#allocation78_spill] sm:$0xff]  ;;  %v9565_v25 = vld [vmem:[#allocation77_spill] sm:$0xff] }
  0xd9   : > { %v2290_v38 = vcombine.low %v6968_v24, %v6971_v63  ;;  %v6989_v39 = vrot.slane %v2497_v1, %v5658_v27  ;;  %v2665_v62 = vcombine.high %v9563_v34, %v9562_v12  ;;  %4820 = vst [vmem:[%s5745_s17 + $0x260] sm:$0xff] %v2154_v20  ;;  %v6999_v18 = vrot.slane %v2529_v28, %v5658_v27  ;;  %v9566_v0 = vld [vmem:[#allocation80_spill] sm:$0xff]  ;;  %v9567_v17 = vld [vmem:[#allocation79_spill] sm:$0xff]  ;;  %v9569_v20 = vld [vmem:[#allocation82_spill] sm:$0xff] }
  0xda   : > { %v2426_v3 = vcombine.low %v6978_v46, %v6981_v41  ;;  %v2769_v45 = vcombine.high %v9565_v25, %v9564_v11  ;;  %v2801_v59 = vcombine.high %v9567_v17, %v9566_v0  ;;  %v7007_v29 = vrot.slane %v2633_v61, %v5658_v27  ;;  %v9570_v49 = vld [vmem:[#allocation81_spill] sm:$0xff]  ;;  %v9572_v28 = vld [vmem:[#allocation84_spill] sm:$0xff] }
  0xdb   : > { %4821 = vst [vmem:[%s5745_s17 + $0x268] sm:$0xff] %v2290_v38  ;;  %v7010_v1 = vrot.slane %v2665_v62, %v5658_v27  ;;  %v2905_v42 = vcombine.high %v9570_v49, %v9569_v20  ;;  %v9571_v33 = vld [vmem:[#allocation85_spill] sm:$0xff]  ;;  %v2562_v12 = vcombine.low %v6989_v39, %v6999_v18  ;;  %v9575_v61 = vld [vmem:[#allocation88_spill] sm:$0xff]  ;;  %v9576_v62 = vld [vmem:[#allocation87_spill] sm:$0xff] }
  0xdc   : > { %9568 = vst [vmem:[#allocation86_spill] sm:$0xff] %v7007_v29  ;;  %v2937_v26 = vcombine.high %v9572_v28, %v9571_v33  ;;  %4822 = vst [vmem:[%s5745_s17 + $0x270] sm:$0xff] %v2426_v3  ;;  %v7020_v34 = vrot.slane %v2769_v45, %v5658_v27  ;;  %v7023_v38 = vrot.slane %v2801_v59, %v5658_v27  ;;  %v9579_v17 = vld [vmem:[#allocation92_spill] sm:$0xff]  ;;  %v9580_v20 = vld [vmem:[#allocation90_spill] sm:$0xff] }
  0xdd   : > { %v3041_v11 = vcombine.high %v9576_v62, %v9575_v61  ;;  %v2698_v25 = vcombine.low %v7007_v29, %v7010_v1  ;;  %v7030_v0 = vrot.slane %v2905_v42, %v5658_v27  ;;  %v3073_v45 = vcombine.high %v9580_v20, %v9579_v17  ;;  %4823 = vst [vmem:[%s5745_s17 + $0x278] sm:$0xff] %v2562_v12  ;;  %v9582_v33 = vld [vmem:[#allocation95_spill] sm:$0xff]  ;;  %v9583_v28 = vld [vmem:[#allocation93_spill] sm:$0xff]  ;;  %v9585_v42 = vld [vmem:[#allocation96_spill] sm:$0xff] }
  0xde   : > { %9573 = vst [vmem:[#allocation83_spill] sm:$0xff] %v7020_v34  ;;  %9574 = vst [vmem:[#allocation91_spill] sm:$0xff] %v7023_v38  ;;  %v7033_v3 = vrot.slane %v2937_v26, %v5658_v27  ;;  %v2834_v59 = vcombine.low %v7020_v34, %v7023_v38  ;;  %v3177_v61 = vcombine.high %v9583_v28, %v9582_v33  ;;  %v9584_v62 = vld [vmem:[#allocation97_spill] sm:$0xff]  ;;  %v9587_v12 = vld [vmem:[#allocation100_spill] sm:$0xff] }
  0xdf   : > { %9577 = vst [vmem:[#allocation89_spill] sm:$0xff] %v7030_v0  ;;  %v7041_v49 = vrot.slane %v3041_v11, %v5658_v27  ;;  %v3209_v7 = vcombine.high %v9585_v42, %v9584_v62  ;;  %4824 = vst [vmem:[%s5745_s17 + $0x280] sm:$0xff] %v2698_v25  ;;  %v7051_v17 = vrot.slane %v3073_v45, %v5658_v27  ;;  %v9588_v20 = vld [vmem:[#allocation98_spill] sm:$0xff]  ;;  %v9589_v34 = vld [vmem:[#allocation103_spill] sm:$0xff] }
  0xe0   : > { %9578 = vst [vmem:[#allocation99_spill] sm:$0xff] %v7033_v3  ;;  %v2970_v26 = vcombine.low %v7030_v0, %v7033_v3  ;;  %v3313_v29 = vcombine.high %v9588_v20, %v9587_v12  ;;  %v9590_v38 = vld [vmem:[#allocation102_spill] sm:$0xff]  ;;  %4825 = vst [vmem:[%s5745_s17 + $0x288] sm:$0xff] %v2834_v59  ;;  %v7059_v33 = vrot.slane %v3177_v61, %v5658_v27  ;;  %v9594_v62 = vld [vmem:[#allocation104_spill] sm:$0xff] }
  0xe1   : > { %9581 = vst [vmem:[#allocation94_spill] sm:$0xff] %v7041_v49  ;;  %9586 = vst [vmem:[#allocation105_spill] sm:$0xff] %v7051_v17  ;;  %v3345_v11 = vcombine.high %v9590_v38, %v9589_v34  ;;  %v7062_v28 = vrot.slane %v3209_v7, %v5658_v27  ;;  %v9593_v25 = vld [vmem:[#allocation106_spill] sm:$0xff]  ;;  %v9595_v0 = vld [vmem:[#allocation109_spill] sm:$0xff]  ;;  %v3106_v12 = vcombine.low %v7041_v49, %v7051_v17 }
  0xe2   : > { %9591 = vst [vmem:[#allocation101_spill] sm:$0xff] %v7059_v33  ;;  %v3449_v42 = vcombine.high %v9594_v62, %v9593_v25  ;;  %v9596_v45 = vld [vmem:[#allocation108_spill] sm:$0xff]  ;;  %4826 = vst [vmem:[%s5745_s17 + $0x290] sm:$0xff] %v2970_v26  ;;  %v7072_v34 = vrot.slane %v3313_v29, %v5658_v27  ;;  %v9600_v7 = vld [vmem:[#allocation111_spill] sm:$0xff] }
  0xe3   : > { %9592 = vst [vmem:[#allocation110_spill] sm:$0xff] %v7062_v28  ;;  %v3481_v3 = vcombine.high %v9596_v45, %v9595_v0  ;;  %v7075_v38 = vrot.slane %v3345_v11, %v5658_v27  ;;  %v9599_v59 = vld [vmem:[#allocation112_spill] sm:$0xff]  ;;  %v3242_v20 = vcombine.low %v7059_v33, %v7062_v28  ;;  %v9604_v62 = vld [vmem:[#allocation114_spill] sm:$0xff]  ;;  %4827 = vst [vmem:[%s5745_s17 + $0x298] sm:$0xff] %v3106_v12 }
  0xe4   : > { %9597 = vst [vmem:[#allocation107_spill] sm:$0xff] %v7072_v34  ;;  %v3585_v61 = vcombine.high %v9600_v7, %v9599_v59  ;;  %v7082_v25 = vrot.slane %v3449_v42, %v5658_v27  ;;  %v9603_v26 = vld [vmem:[#allocation116_spill] sm:$0xff]  ;;  %v9606_v59 = vld [vmem:[#allocation119_spill] sm:$0xff]  ;;  %v9607_v7 = vld [vmem:[#allocation117_spill] sm:$0xff] }
  0xe5   : > { %9598 = vst [vmem:[#allocation115_spill] sm:$0xff] %v7075_v38  ;;  %v7085_v0 = vrot.slane %v3481_v3, %v5658_v27  ;;  %v3617_v29 = vcombine.high %v9604_v62, %v9603_v26  ;;  %v3378_v11 = vcombine.low %v7072_v34, %v7075_v38  ;;  %v3721_v33 = vcombine.high %v9607_v7, %v9606_v59  ;;  %v9608_v28 = vld [vmem:[#allocation121_spill] sm:$0xff]  ;;  %v9609_v42 = vld [vmem:[#allocation120_spill] sm:$0xff]  ;;  %v9612_v62 = vld [vmem:[#allocation122_spill] sm:$0xff] }
  0xe6   : > { %9601 = vst [vmem:[#allocation113_spill] sm:$0xff] %v7082_v25  ;;  %v7093_v45 = vrot.slane %v3585_v61, %v5658_v27  ;;  %v3753_v49 = vcombine.high %v9609_v42, %v9608_v28  ;;  %4828 = vst [vmem:[%s5745_s17 + $0x2a0] sm:$0xff] %v3242_v20  ;;  %v9611_v12 = vld [vmem:[#allocation124_spill] sm:$0xff]  ;;  %v9613_v34 = vld [vmem:[#allocation127_spill] sm:$0xff] }
  0xe7   : > { %9602 = vst [vmem:[#allocation123_spill] sm:$0xff] %v7085_v0  ;;  %v3514_v3 = vcombine.low %v7082_v25, %v7085_v0  ;;  %v7103_v26 = vrot.slane %v3617_v29, %v5658_v27  ;;  %v3857_v17 = vcombine.high %v9612_v62, %v9611_v12  ;;  %v9614_v38 = vld [vmem:[#allocation126_spill] sm:$0xff]  ;;  %4829 = vst [vmem:[%s5745_s17 + $0x2a8] sm:$0xff] %v3378_v11  ;;  %v9618_v7 = vld [vmem:[#allocation128_spill] sm:$0xff] }
  0xe8   : > { %9605 = vst [vmem:[#allocation118_spill] sm:$0xff] %v7093_v45  ;;  %v3889_v61 = vcombine.high %v9614_v38, %v9613_v34  ;;  %v7111_v59 = vrot.slane %v3721_v33, %v5658_v27  ;;  %v7114_v28 = vrot.slane %v3753_v49, %v5658_v27  ;;  %v9617_v20 = vld [vmem:[#allocation130_spill] sm:$0xff]  ;;  %v9619_v25 = vld [vmem:[#allocation133_spill] sm:$0xff]  ;;  %v9620_v29 = vld [vmem:[#allocation132_spill] sm:$0xff] }
  0xe9   : > { %9610 = vst [vmem:[#allocation129_spill] sm:$0xff] %v7103_v26  ;;  %v3993_v42 = vcombine.high %v9618_v7, %v9617_v20  ;;  %v4025_v0 = vcombine.high %v9620_v29, %v9619_v25  ;;  %4830 = vst [vmem:[%s5745_s17 + $0x2b0] sm:$0xff] %v3514_v3  ;;  %v3650_v12 = vcombine.low %v7093_v45, %v7103_v26  ;;  %v9621_v38 = vld [vmem:[#allocation136_spill] sm:$0xff]  ;;  %v9622_v49 = vld [vmem:[#allocation135_spill] sm:$0xff] }
  0xea   : > { %9615 = vst [vmem:[#allocation125_spill] sm:$0xff] %v7111_v59  ;;  %9616 = vst [vmem:[#allocation134_spill] sm:$0xff] %v7114_v28  ;;  %v7124_v34 = vrot.slane %v3857_v17, %v5658_v27  ;;  %v7127_v33 = vrot.slane %v3889_v61, %v5658_v27  ;;  %v4129_v11 = vcombine.high %v9622_v49, %v9621_v38  ;;  %v9623_v3 = vld [vmem:[#allocation140_spill] sm:$0xff]  ;;  %v9624_v7 = vld [vmem:[#allocation138_spill] sm:$0xff] }
  0xeb   : > { %v3786_v62 = vcombine.low %v7111_v59, %v7114_v28  ;;  %v7134_v20 = vrot.slane %v3993_v42, %v5658_v27  ;;  %v7137_v25 = vrot.slane %v4025_v0, %v5658_v27  ;;  %v4161_v17 = vcombine.high %v9624_v7, %v9623_v3  ;;  %4831 = vst [vmem:[%s5745_s17 + $0x2b8] sm:$0xff] %v3650_v12  ;;  %v9625_v38 = vld [vmem:[#allocation143_spill] sm:$0xff]  ;;  %v9626_v49 = vld [vmem:[#allocation141_spill] sm:$0xff]  ;;  %v9628_v42 = vld [vmem:[#allocation144_spill] sm:$0xff] }
  0xec   : > { %v3922_v61 = vcombine.low %v7124_v34, %v7127_v33  ;;  %v7145_v29 = vrot.slane %v4129_v11, %v5658_v27  ;;  %v4265_v59 = vcombine.high %v9626_v49, %v9625_v38  ;;  %v9627_v28 = vld [vmem:[#allocation145_spill] sm:$0xff]  ;;  %v9629_v12 = vld [vmem:[#allocation147_spill] sm:$0xff]  ;;  %v9630_v7 = vld [vmem:[#allocation146_spill] sm:$0xff]  ;;  %v4433_v11 = vcombine.high %v6618_v48, %v6626_v36 }
  0xed   : > { %v4297_v45 = vcombine.high %v9628_v42, %v9627_v28  ;;  %4832 = vst [vmem:[%s5745_s17 + $0x2c0] sm:$0xff] %v3786_v62  ;;  %v4058_v0 = vcombine.low %v7134_v20, %v7137_v25  ;;  %v7155_v3 = vrot.slane %v4161_v17, %v5658_v27  ;;  %v4401_v26 = vcombine.high %v9630_v7, %v9629_v12 }
  0xee   : > { %4833 = vst [vmem:[%s5745_s17 + $0x2c8] sm:$0xff] %v3922_v61  ;;  %v7163_v38 = vrot.slane %v4265_v59, %v5658_v27  ;;  %v4537_v62 = vcombine.high %v6631_v35, %v6637_v21  ;;  %v4569_v17 = vcombine.high %v6652_v40, %v6655_v16  ;;  %v7179_v36 = vrot.slane %v4433_v11, %v5658_v27 }
  0xef   : > { %v7166_v28 = vrot.slane %v4297_v45, %v5658_v27  ;;  %4834 = vst [vmem:[%s5745_s17 + $0x2d0] sm:$0xff] %v4058_v0  ;;  %v4194_v49 = vcombine.low %v7145_v29, %v7155_v3  ;;  %v7176_v48 = vrot.slane %v4401_v26, %v5658_v27  ;;  %v4673_v45 = vcombine.high %v6663_v37, %v6666_v5  ;;  %v9645_v12 = vld [vmem:[#allocation118_spill] sm:$0xff] }
  0xf0   : > { %v7186_v21 = vrot.slane %v4537_v62, %v5658_v27  ;;  %v7189_v40 = vrot.slane %v4569_v17, %v5658_v27  ;;  %v4705_v16 = vcombine.high %v6679_v6, %v6689_v47  ;;  %v523_v5 = vcombine.high %v6809_v44, %v6812_v55  ;;  %v9644_v0 = vld [vmem:[#allocation129_spill] sm:$0xff] }
  0xf1   : > { %v4330_v35 = vcombine.low %v7163_v38, %v7166_v28  ;;  %4835 = vst [vmem:[%s5745_s17 + $0x2d8] sm:$0xff] %v4194_v49  ;;  %v4466_v26 = vcombine.low %v7176_v48, %v7179_v36  ;;  %v7197_v37 = vrot.slane %v4673_v45, %v5658_v27  ;;  %v659_v59 = vcombine.high %v6815_v43, %v6820_v19  ;;  %v9646_v11 = vld [vmem:[#allocation134_spill] sm:$0xff]  ;;  %v9647_v62 = vld [vmem:[#allocation125_spill] sm:$0xff] }
  0xf2   : > { %v4602_v6 = vcombine.low %v7186_v21, %v7189_v40  ;;  %v7207_v47 = vrot.slane %v4705_v16, %v5658_v27  ;;  %v795_v61 = vcombine.high %v6823_v9, %v6826_v22  ;;  %v931_v42 = vcombine.high %v6829_v23, %v6834_v57  ;;  %4840 = vst [vmem:[%s5745_s17 + $0x300] sm:$0xff] %v523_v5 }
  0xf3   : > { %4836 = vst [vmem:[%s5745_s17 + $0x2e0] sm:$0xff] %v4330_v35  ;;  %4837 = vst [vmem:[%s5745_s17 + $0x2e8] sm:$0xff] %v4466_v26  ;;  %v1067_v44 = vcombine.high %v6852_v2, %v6855_v10  ;;  %v1203_v55 = vcombine.high %v6862_v30, %v6865_v13  ;;  %v1339_v43 = vcombine.high %v6875_v50, %v6884_v52  ;;  %v9631_v52 = vld [vmem:[#allocation86_spill] sm:$0xff]  ;;  %v5165_v26 = vld [vmem:[%s5632_s2 + $0x500] sm:$0xff] }
  0xf4   : > { %4841 = vst [vmem:[%s5745_s17 + $0x308] sm:$0xff] %v659_v59  ;;  %v1475_v19 = vcombine.high %v6887_v14, %v6893_v56  ;;  %4838 = vst [vmem:[%s5745_s17 + $0x2f0] sm:$0xff] %v4602_v6  ;;  %v4738_v9 = vcombine.low %v7197_v37, %v7207_v47  ;;  %v1611_v22 = vcombine.high %v6896_v4, %v6906_v58  ;;  %v9632_v56 = vld [vmem:[#allocation91_spill] sm:$0xff]  ;;  %v5167_v59 = vld [vmem:[%s5632_s2 + $0x8] sm:$0xff] }
  0xf5   : > { %4842 = vst [vmem:[%s5745_s17 + $0x310] sm:$0xff] %v795_v61  ;;  %4843 = vst [vmem:[%s5745_s17 + $0x318] sm:$0xff] %v931_v42  ;;  %v1747_v23 = vcombine.high %v6915_v32, %v6918_v51  ;;  %v1883_v57 = vcombine.high %v6926_v31, %v6929_v54  ;;  %v2019_v2 = vcombine.high %v6937_v8, %v6947_v15  ;;  %v9633_v4 = vld [vmem:[#allocation83_spill] sm:$0xff]  ;;  %v9635_v51 = vld [vmem:[#allocation89_spill] sm:$0xff] }
  0xf6   : > { %4844 = vst [vmem:[%s5745_s17 + $0x320] sm:$0xff] %v1067_v44  ;;  %4845 = vst [vmem:[%s5745_s17 + $0x328] sm:$0xff] %v1203_v55  ;;  %v2155_v10 = vcombine.high %v6955_v53, %v6958_v60  ;;  %v2291_v30 = vcombine.high %v6968_v24, %v6971_v63  ;;  %v2427_v13 = vcombine.high %v6978_v46, %v6981_v41  ;;  %v9634_v32 = vld [vmem:[#allocation99_spill] sm:$0xff]  ;;  %v9636_v54 = vld [vmem:[#allocation105_spill] sm:$0xff] }
  0xf7   : > { %4846 = vst [vmem:[%s5745_s17 + $0x330] sm:$0xff] %v1339_v43  ;;  %4847 = vst [vmem:[%s5745_s17 + $0x338] sm:$0xff] %v1475_v19  ;;  %v2563_v50 = vcombine.high %v6989_v39, %v6999_v18  ;;  %v2699_v14 = vcombine.high %v9631_v52, %v7010_v1  ;;  %v2835_v58 = vcombine.high %v9633_v4, %v9632_v56  ;;  %v9637_v8 = vld [vmem:[#allocation94_spill] sm:$0xff]  ;;  %v9639_v60 = vld [vmem:[#allocation101_spill] sm:$0xff] }
  0xf8   : > { %4839 = vst [vmem:[%s5745_s17 + $0x2f8] sm:$0xff] %v4738_v9  ;;  %4848 = vst [vmem:[%s5745_s17 + $0x340] sm:$0xff] %v1611_v22  ;;  %v2971_v31 = vcombine.high %v9635_v51, %v9634_v32  ;;  %v3107_v15 = vcombine.high %v9637_v8, %v9636_v54  ;;  %v9638_v53 = vld [vmem:[#allocation110_spill] sm:$0xff]  ;;  %v9640_v63 = vld [vmem:[#allocation115_spill] sm:$0xff]  ;;  %v3651_v7 = vcombine.high %v9645_v12, %v9644_v0 }
  0xf9   : > { %4849 = vst [vmem:[%s5745_s17 + $0x348] sm:$0xff] %v1747_v23  ;;  %4850 = vst [vmem:[%s5745_s17 + $0x350] sm:$0xff] %v1883_v57  ;;  %v3243_v24 = vcombine.high %v9639_v60, %v9638_v53  ;;  %v9641_v46 = vld [vmem:[#allocation107_spill] sm:$0xff]  ;;  %v9643_v18 = vld [vmem:[#allocation113_spill] sm:$0xff]  ;;  %v3787_v17 = vcombine.high %v9647_v62, %v9646_v11  ;;  %v3923_v49 = vcombine.high %v7124_v34, %v7127_v33 }
  0xfa   : > { %4851 = vst [vmem:[%s5745_s17 + $0x358] sm:$0xff] %v2019_v2  ;;  %4852 = vst [vmem:[%s5745_s17 + $0x360] sm:$0xff] %v2155_v10  ;;  %v3379_v41 = vcombine.high %v9641_v46, %v9640_v63  ;;  %v9642_v39 = vld [vmem:[#allocation123_spill] sm:$0xff]  ;;  %v4059_v45 = vcombine.high %v7134_v20, %v7137_v25  ;;  %v4195_v35 = vcombine.high %v7145_v29, %v7155_v3  ;;  %v5159_v25 = vld [vmem:[%s5632_s2] sm:$0xff] }
  0xfb   : > { %4853 = vst [vmem:[%s5745_s17 + $0x368] sm:$0xff] %v2291_v30  ;;  %4854 = vst [vmem:[%s5745_s17 + $0x370] sm:$0xff] %v2427_v13  ;;  %v3515_v1 = vcombine.high %v9643_v18, %v9642_v39  ;;  %v4331_v16 = vcombine.high %v7163_v38, %v7166_v28  ;;  %v4467_v34 = vcombine.high %v7176_v48, %v7179_v36  ;;  %v5160_v29 = vld [vmem:[%s5632_s2 + $0x200] sm:$0xff]  ;;  %v5168_v6 = vld [vmem:[%s5632_s2 + $0x208] sm:$0xff] }
  0xfc   : > { %4855 = vst [vmem:[%s5745_s17 + $0x378] sm:$0xff] %v2563_v50  ;;  %4856 = vst [vmem:[%s5745_s17 + $0x380] sm:$0xff] %v2699_v14  ;;  %v4603_v33 = vcombine.high %v7186_v21, %v7189_v40  ;;  %v4739_v20 = vcombine.high %v7197_v37, %v7207_v47  ;;  %v393_v3 = vcombine.high %v5159_v25, %v5160_v29  ;;  %v5161_v38 = vld [vmem:[%s5632_s2 + $0x100] sm:$0xff]  ;;  %v5169_v61 = vld [vmem:[%s5632_s2 + $0x108] sm:$0xff] }
  0xfd   : > { %4857 = vst [vmem:[%s5745_s17 + $0x388] sm:$0xff] %v2835_v58  ;;  %4858 = vst [vmem:[%s5745_s17 + $0x390] sm:$0xff] %v2971_v31  ;;  %v5162_v28 = vld [vmem:[%s5632_s2 + $0x300] sm:$0xff]  ;;  %v529_v47 = vcombine.high %v5167_v59, %v5168_v6  ;;  %v5170_v42 = vld [vmem:[%s5632_s2 + $0x308] sm:$0xff] }
  0xfe   : > { %4859 = vst [vmem:[%s5745_s17 + $0x398] sm:$0xff] %v3107_v15  ;;  %4860 = vst [vmem:[%s5745_s17 + $0x3a0] sm:$0xff] %v3243_v24  ;;  %v409_v48 = vcombine.high %v5161_v38, %v5162_v28  ;;  %v5163_v36 = vld [vmem:[%s5632_s2 + $0x400] sm:$0xff]  ;;  %v545_v44 = vcombine.high %v5169_v61, %v5170_v42  ;;  %v5171_v55 = vld [vmem:[%s5632_s2 + $0x408] sm:$0xff] }
  0xff   : > { %4861 = vst [vmem:[%s5745_s17 + $0x3a8] sm:$0xff] %v3379_v41  ;;  %4862 = vst [vmem:[%s5745_s17 + $0x3b0] sm:$0xff] %v3515_v1  ;;  %v5164_v21 = vld [vmem:[%s5632_s2 + $0x600] sm:$0xff]  ;;  %v5172_v43 = vld [vmem:[%s5632_s2 + $0x608] sm:$0xff] }
 0x100   : > { %4863 = vst [vmem:[%s5745_s17 + $0x3b8] sm:$0xff] %v3651_v7  ;;  %4864 = vst [vmem:[%s5745_s17 + $0x3c0] sm:$0xff] %v3787_v17  ;;  %v425_v40 = vcombine.high %v5163_v36, %v5164_v21  ;;  %v5166_v37 = vld [vmem:[%s5632_s2 + $0x700] sm:$0xff]  ;;  %v561_v19 = vcombine.high %v5171_v55, %v5172_v43  ;;  %v5173_v2 = vld [vmem:[%s5632_s2 + $0x508] sm:$0xff] }
 0x101   : > { %4865 = vst [vmem:[%s5745_s17 + $0x3c8] sm:$0xff] %v3923_v49  ;;  %4866 = vst [vmem:[%s5745_s17 + $0x3d0] sm:$0xff] %v4059_v45  ;;  %v441_v5 = vcombine.high %v5165_v26, %v5166_v37  ;;  %v9648_v9 = vld [vmem:[#allocation8_spill] sm:$0xff]  ;;  %v5174_v10 = vld [vmem:[%s5632_s2 + $0x708] sm:$0xff] }
 0x102   : > { %4867 = vst [vmem:[%s5745_s17 + $0x3d8] sm:$0xff] %v4195_v35  ;;  %4868 = vst [vmem:[%s5745_s17 + $0x3e0] sm:$0xff] %v4331_v16  ;;  %v7321_v22 = vrot.slane %v393_v3, %v9648_v9  ;;  %v7324_v23 = vrot.slane %v409_v48, %v9648_v9  ;;  %v7327_v57 = vrot.slane %v425_v40, %v9648_v9  ;;  %v5175_v58 = vld [vmem:[%s5632_s2 + $0x10] sm:$0xff]  ;;  %v5183_v35 = vld [vmem:[%s5632_s2 + $0x18] sm:$0xff] }
 0x103   : > { %4869 = vst [vmem:[%s5745_s17 + $0x3e8] sm:$0xff] %v4467_v34  ;;  %4870 = vst [vmem:[%s5745_s17 + $0x3f0] sm:$0xff] %v4603_v33  ;;  %v577_v30 = vcombine.high %v5173_v2, %v5174_v10  ;;  %v7332_v13 = vrot.slane %v441_v5, %v9648_v9  ;;  %v7335_v50 = vrot.slane %v529_v47, %v9648_v9  ;;  %v5176_v32 = vld [vmem:[%s5632_s2 + $0x210] sm:$0xff]  ;;  %v5184_v16 = vld [vmem:[%s5632_s2 + $0x218] sm:$0xff] }
 0x104   : > { %4871 = vst [vmem:[%s5745_s17 + $0x3f8] sm:$0xff] %v4739_v20  ;;  %9649 = vst [vmem:[#allocation131_spill] sm:$0xff] %v7321_v22  ;;  %v7338_v52 = vrot.slane %v545_v44, %v9648_v9  ;;  %v7341_v14 = vrot.slane %v561_v19, %v9648_v9  ;;  %v472_v56 = vcombine.low %v7321_v22, %v7324_v23  ;;  %v5177_v31 = vld [vmem:[%s5632_s2 + $0x110] sm:$0xff]  ;;  %v5185_v33 = vld [vmem:[%s5632_s2 + $0x118] sm:$0xff] }
 0x105   : > { %9650 = vst [vmem:[#allocation139_spill] sm:$0xff] %v7324_v23  ;;  %9651 = vst [vmem:[#allocation137_spill] sm:$0xff] %v7327_v57  ;;  %v7346_v4 = vrot.slane %v577_v30, %v9648_v9  ;;  %v665_v51 = vcombine.high %v5175_v58, %v5176_v32  ;;  %v5178_v54 = vld [vmem:[%s5632_s2 + $0x310] sm:$0xff]  ;;  %v504_v15 = vcombine.low %v7327_v57, %v7332_v13  ;;  %v5186_v20 = vld [vmem:[%s5632_s2 + $0x318] sm:$0xff] }
 0x106   : > { %9652 = vst [vmem:[#allocation142_spill] sm:$0xff] %v7332_v13  ;;  %9653 = vst [vmem:[#allocation10_spill] sm:$0xff] %v7335_v50  ;;  %v681_v8 = vcombine.high %v5177_v31, %v5178_v54  ;;  %v608_v53 = vcombine.low %v7335_v50, %v7338_v52  ;;  %v5179_v60 = vld [vmem:[%s5632_s2 + $0x410] sm:$0xff]  ;;  %v7361_v18 = vrot.slane %v472_v56, %v5658_v27  ;;  %v5187_v38 = vld [vmem:[%s5632_s2 + $0x418] sm:$0xff] }
 0x107   : > { %9654 = vst [vmem:[#allocation9_spill] sm:$0xff] %v7338_v52  ;;  %9655 = vst [vmem:[#allocation12_spill] sm:$0xff] %v7341_v14  ;;  %v5180_v24 = vld [vmem:[%s5632_s2 + $0x610] sm:$0xff]  ;;  %v640_v1 = vcombine.low %v7341_v14, %v7346_v4  ;;  %v7366_v0 = vrot.slane %v665_v51, %v9648_v9  ;;  %v7372_v7 = vrot.slane %v504_v15, %v5658_v27  ;;  %v5188_v28 = vld [vmem:[%s5632_s2 + $0x618] sm:$0xff] }
 0x108   : > { %9656 = vst [vmem:[#allocation11_spill] sm:$0xff] %v7346_v4  ;;  %v697_v63 = vcombine.high %v5179_v60, %v5180_v24  ;;  %v5181_v46 = vld [vmem:[%s5632_s2 + $0x510] sm:$0xff]  ;;  %v7369_v12 = vrot.slane %v681_v8, %v9648_v9  ;;  %v7375_v11 = vrot.slane %v608_v53, %v5658_v27  ;;  %v801_v34 = vcombine.high %v5183_v35, %v5184_v16  ;;  %v5189_v36 = vld [vmem:[%s5632_s2 + $0x518] sm:$0xff]  ;;  %v5191_v42 = vld [vmem:[%s5632_s2 + $0x20] sm:$0xff] }
 0x109   : > { %v5182_v41 = vld [vmem:[%s5632_s2 + $0x710] sm:$0xff]  ;;  %9657 = vst [vmem:[#allocation14_spill] sm:$0xff] %v7366_v0  ;;  %v7384_v49 = vrot.slane %v640_v1, %v5658_v27  ;;  %v817_v25 = vcombine.high %v5185_v33, %v5186_v20  ;;  %v524_v29 = vcombine.low %v7361_v18, %v7372_v7  ;;  %v833_v48 = vcombine.high %v5187_v38, %v5188_v28  ;;  %v5190_v21 = vld [vmem:[%s5632_s2 + $0x718] sm:$0xff]  ;;  %v5192_v44 = vld [vmem:[%s5632_s2 + $0x220] sm:$0xff] }
 0x10a   : > { %v713_v39 = vcombine.high %v5181_v46, %v5182_v41  ;;  %9658 = vst [vmem:[#allocation13_spill] sm:$0xff] %v7369_v12  ;;  %v7378_v62 = vrot.slane %v697_v63, %v9648_v9  ;;  %v744_v45 = vcombine.low %v7366_v0, %v7369_v12  ;;  %v849_v40 = vcombine.high %v5189_v36, %v5190_v21  ;;  %v5193_v19 = vld [vmem:[%s5632_s2 + $0x120] sm:$0xff]  ;;  %v5199_v53 = vld [vmem:[%s5632_s2 + $0x28] sm:$0xff]  ;;  %v5207_v36 = vld [vmem:[%s5632_s2 + $0x30] sm:$0xff] }
 0x10b   : > { %v660_v26 = vcombine.low %v7375_v11, %v7384_v49  ;;  %v7406_v5 = vrot.slane %v801_v34, %v9648_v9  ;;  %v7409_v59 = vrot.slane %v817_v25, %v9648_v9  ;;  %4872 = vst [vmem:[%s5745_s17 + $0x400] sm:$0xff] %v524_v29  ;;  %v7416_v47 = vrot.slane %v833_v48, %v9648_v9  ;;  %v5194_v2 = vld [vmem:[%s5632_s2 + $0x320] sm:$0xff]  ;;  %v5200_v60 = vld [vmem:[%s5632_s2 + $0x228] sm:$0xff]  ;;  %v5208_v21 = vld [vmem:[%s5632_s2 + $0x230] sm:$0xff] }
 0x10c   : > { %9659 = vst [vmem:[#allocation16_spill] sm:$0xff] %v7378_v62  ;;  %v7381_v17 = vrot.slane %v713_v39, %v9648_v9  ;;  %v7403_v37 = vrot.slane %v744_v45, %v5658_v27  ;;  %v7419_v61 = vrot.slane %v849_v40, %v9648_v9  ;;  %v937_v55 = vcombine.high %v5191_v42, %v5192_v44  ;;  %v5195_v30 = vld [vmem:[%s5632_s2 + $0x420] sm:$0xff]  ;;  %v5201_v35 = vld [vmem:[%s5632_s2 + $0x128] sm:$0xff]  ;;  %v5314_v0 = vld [vmem:[%s5632_s2 + $0x398] sm:$0xff] }
 0x10d   : > { %9661 = vst [vmem:[#allocation18_spill] sm:$0xff] %v7406_v5  ;;  %9662 = vst [vmem:[#allocation17_spill] sm:$0xff] %v7409_v59  ;;  %v880_v43 = vcombine.low %v7406_v5, %v7409_v59  ;;  %v953_v10 = vcombine.high %v5193_v19, %v5194_v2  ;;  %v5196_v56 = vld [vmem:[%s5632_s2 + $0x620] sm:$0xff]  ;;  %v1073_v24 = vcombine.high %v5199_v53, %v5200_v60  ;;  %v5202_v16 = vld [vmem:[%s5632_s2 + $0x328] sm:$0xff] }
 0x10e   : > { %9660 = vst [vmem:[#allocation15_spill] sm:$0xff] %v7381_v17  ;;  %v776_v3 = vcombine.low %v7378_v62, %v7381_v17  ;;  %9663 = vst [vmem:[#allocation20_spill] sm:$0xff] %v7416_v47  ;;  %v969_v58 = vcombine.high %v5195_v30, %v5196_v56  ;;  %v5197_v32 = vld [vmem:[%s5632_s2 + $0x520] sm:$0xff]  ;;  %v912_v8 = vcombine.low %v7416_v47, %v7419_v61  ;;  %v5203_v33 = vld [vmem:[%s5632_s2 + $0x428] sm:$0xff] }
 0x10f   : > { %9664 = vst [vmem:[#allocation19_spill] sm:$0xff] %v7419_v61  ;;  %4873 = vst [vmem:[%s5745_s17 + $0x408] sm:$0xff] %v660_v26  ;;  %v5198_v51 = vld [vmem:[%s5632_s2 + $0x720] sm:$0xff]  ;;  %v7437_v15 = vrot.slane %v937_v55, %v9648_v9  ;;  %v7442_v63 = vrot.slane %v880_v43, %v5658_v27  ;;  %v7445_v46 = vrot.slane %v953_v10, %v9648_v9  ;;  %v5204_v20 = vld [vmem:[%s5632_s2 + $0x628] sm:$0xff] }
 0x110   : > { %v7413_v6 = vrot.slane %v776_v3, %v5658_v27  ;;  %v985_v31 = vcombine.high %v5197_v32, %v5198_v51  ;;  %v7448_v41 = vrot.slane %v969_v58, %v9648_v9  ;;  %v7455_v1 = vrot.slane %v912_v8, %v5658_v27  ;;  %v5205_v38 = vld [vmem:[%s5632_s2 + $0x528] sm:$0xff]  ;;  %v5209_v55 = vld [vmem:[%s5632_s2 + $0x130] sm:$0xff]  ;;  %v5313_v17 = vld [vmem:[%s5632_s2 + $0x198] sm:$0xff] }
 0x111   : > { %9665 = vst [vmem:[#allocation22_spill] sm:$0xff] %v7437_v15  ;;  %9666 = vst [vmem:[#allocation21_spill] sm:$0xff] %v7445_v46  ;;  %v7458_v45 = vrot.slane %v1073_v24, %v9648_v9  ;;  %v1089_v34 = vcombine.high %v5201_v35, %v5202_v16  ;;  %v1105_v25 = vcombine.high %v5203_v33, %v5204_v20  ;;  %v5206_v28 = vld [vmem:[%s5632_s2 + $0x728] sm:$0xff]  ;;  %v5210_v43 = vld [vmem:[%s5632_s2 + $0x330] sm:$0xff] }
 0x112   : > { %v796_v54 = vcombine.low %v7403_v37, %v7413_v6  ;;  %9667 = vst [vmem:[#allocation24_spill] sm:$0xff] %v7448_v41  ;;  %v7451_v39 = vrot.slane %v985_v31, %v9648_v9  ;;  %v1016_v29 = vcombine.low %v7437_v15, %v7445_v46  ;;  %v1121_v48 = vcombine.high %v5205_v38, %v5206_v28  ;;  %v5211_v51 = vld [vmem:[%s5632_s2 + $0x430] sm:$0xff]  ;;  %v5215_v16 = vld [vmem:[%s5632_s2 + $0x38] sm:$0xff]  ;;  %v5299_v61 = vld [vmem:[%s5632_s2 + $0x488] sm:$0xff] }
 0x113   : > { %9669 = vst [vmem:[#allocation26_spill] sm:$0xff] %v7458_v45  ;;  %v1209_v40 = vcombine.high %v5207_v36, %v5208_v21  ;;  %v932_v26 = vcombine.low %v7442_v63, %v7455_v1  ;;  %v7475_v42 = vrot.slane %v1089_v34, %v9648_v9  ;;  %v7478_v44 = vrot.slane %v1105_v25, %v9648_v9  ;;  %v5212_v31 = vld [vmem:[%s5632_s2 + $0x630] sm:$0xff]  ;;  %v5216_v34 = vld [vmem:[%s5632_s2 + $0x238] sm:$0xff]  ;;  %v5331_v4 = vld [vmem:[%s5632_s2 + $0x4a8] sm:$0xff] }
 0x114   : > { %9668 = vst [vmem:[#allocation23_spill] sm:$0xff] %v7451_v39  ;;  %4874 = vst [vmem:[%s5745_s17 + $0x410] sm:$0xff] %v796_v54  ;;  %v1048_v3 = vcombine.low %v7448_v41, %v7451_v39  ;;  %v1225_v19 = vcombine.high %v5209_v55, %v5210_v43  ;;  %v7483_v2 = vrot.slane %v1016_v29, %v5658_v27  ;;  %v5213_v8 = vld [vmem:[%s5632_s2 + $0x530] sm:$0xff]  ;;  %v5217_v20 = vld [vmem:[%s5632_s2 + $0x138] sm:$0xff] }
 0x115   : > { %9670 = vst [vmem:[#allocation25_spill] sm:$0xff] %v7475_v42  ;;  %9671 = vst [vmem:[#allocation28_spill] sm:$0xff] %v7478_v44  ;;  %v7489_v30 = vrot.slane %v1121_v48, %v9648_v9  ;;  %v7492_v56 = vrot.slane %v1209_v40, %v9648_v9  ;;  %v1152_v58 = vcombine.low %v7458_v45, %v7475_v42  ;;  %v5214_v53 = vld [vmem:[%s5632_s2 + $0x730] sm:$0xff]  ;;  %v5218_v25 = vld [vmem:[%s5632_s2 + $0x338] sm:$0xff] }
 0x116   : > { %v7486_v10 = vrot.slane %v1048_v3, %v5658_v27  ;;  %4875 = vst [vmem:[%s5745_s17 + $0x418] sm:$0xff] %v932_v26  ;;  %v7498_v32 = vrot.slane %v1225_v19, %v9648_v9  ;;  %v1241_v54 = vcombine.high %v5211_v51, %v5212_v31  ;;  %v1257_v60 = vcombine.high %v5213_v8, %v5214_v53  ;;  %v5219_v26 = vld [vmem:[%s5632_s2 + $0x438] sm:$0xff]  ;;  %v5223_v8 = vld [vmem:[%s5632_s2 + $0x40] sm:$0xff] }
 0x117   : > { %9672 = vst [vmem:[#allocation27_spill] sm:$0xff] %v7489_v30  ;;  %9673 = vst [vmem:[#allocation30_spill] sm:$0xff] %v7492_v56  ;;  %v1184_v35 = vcombine.low %v7478_v44, %v7489_v30  ;;  %v1345_v33 = vcombine.high %v5215_v16, %v5216_v34  ;;  %v1361_v29 = vcombine.high %v5217_v20, %v5218_v25  ;;  %v5220_v55 = vld [vmem:[%s5632_s2 + $0x638] sm:$0xff]  ;;  %v5224_v53 = vld [vmem:[%s5632_s2 + $0x240] sm:$0xff] }
 0x118   : > { %9674 = vst [vmem:[#allocation29_spill] sm:$0xff] %v7498_v32  ;;  %v1068_v24 = vcombine.low %v7483_v2, %v7486_v10  ;;  %v7513_v3 = vrot.slane %v1152_v58, %v5658_v27  ;;  %v7516_v38 = vrot.slane %v1241_v54, %v9648_v9  ;;  %v7519_v28 = vrot.slane %v1257_v60, %v9648_v9  ;;  %v5221_v51 = vld [vmem:[%s5632_s2 + $0x538] sm:$0xff]  ;;  %v5225_v34 = vld [vmem:[%s5632_s2 + $0x140] sm:$0xff]  ;;  %v5267_v30 = vld [vmem:[%s5632_s2 + $0x468] sm:$0xff] }
 0x119   : > { %v1288_v48 = vcombine.low %v7492_v56, %v7498_v32  ;;  %v7525_v36 = vrot.slane %v1184_v35, %v5658_v27  ;;  %v7528_v21 = vrot.slane %v1345_v33, %v9648_v9  ;;  %v7531_v40 = vrot.slane %v1361_v29, %v9648_v9  ;;  %v5222_v31 = vld [vmem:[%s5632_s2 + $0x738] sm:$0xff]  ;;  %v5226_v33 = vld [vmem:[%s5632_s2 + $0x340] sm:$0xff] }
 0x11a   : > { %9675 = vst [vmem:[#allocation32_spill] sm:$0xff] %v7516_v38  ;;  %9676 = vst [vmem:[#allocation31_spill] sm:$0xff] %v7519_v28  ;;  %v1377_v43 = vcombine.high %v5219_v26, %v5220_v55  ;;  %v1320_v58 = vcombine.low %v7516_v38, %v7519_v28  ;;  %v1393_v54 = vcombine.high %v5221_v51, %v5222_v31  ;;  %v5227_v26 = vld [vmem:[%s5632_s2 + $0x440] sm:$0xff]  ;;  %v5249_v28 = vld [vmem:[%s5632_s2 + $0x158] sm:$0xff] }
 0x11b   : > { %4876 = vst [vmem:[%s5745_s17 + $0x420] sm:$0xff] %v1068_v24  ;;  %9677 = vst [vmem:[#allocation34_spill] sm:$0xff] %v7528_v21  ;;  %v7536_v19 = vrot.slane %v1288_v48, %v5658_v27  ;;  %v1481_v60 = vcombine.high %v5223_v8, %v5224_v53  ;;  %v1204_v24 = vcombine.low %v7513_v3, %v7525_v36  ;;  %v5228_v55 = vld [vmem:[%s5632_s2 + $0x640] sm:$0xff]  ;;  %v5231_v53 = vld [vmem:[%s5632_s2 + $0x48] sm:$0xff] }
 0x11c   : > { %9678 = vst [vmem:[#allocation33_spill] sm:$0xff] %v7531_v40  ;;  %v7547_v35 = vrot.slane %v1377_v43, %v9648_v9  ;;  %v1424_v16 = vcombine.low %v7528_v21, %v7531_v40  ;;  %v1497_v20 = vcombine.high %v5225_v34, %v5226_v33  ;;  %v7554_v25 = vrot.slane %v1320_v58, %v5658_v27  ;;  %v5229_v58 = vld [vmem:[%s5632_s2 + $0x540] sm:$0xff]  ;;  %v5250_v56 = vld [vmem:[%s5632_s2 + $0x358] sm:$0xff] }
 0x11d   : > { %v7557_v29 = vrot.slane %v1393_v54, %v9648_v9  ;;  %v7560_v48 = vrot.slane %v1481_v60, %v9648_v9  ;;  %v1513_v43 = vcombine.high %v5227_v26, %v5228_v55  ;;  %4877 = vst [vmem:[%s5745_s17 + $0x428] sm:$0xff] %v1204_v24  ;;  %v5230_v54 = vld [vmem:[%s5632_s2 + $0x740] sm:$0xff]  ;;  %v5232_v60 = vld [vmem:[%s5632_s2 + $0x248] sm:$0xff]  ;;  %v5281_v39 = vld [vmem:[%s5632_s2 + $0x178] sm:$0xff] }
 0x11e   : > { %9679 = vst [vmem:[#allocation36_spill] sm:$0xff] %v7547_v35  ;;  %v7566_v51 = vrot.slane %v1424_v16, %v5658_v27  ;;  %v7569_v31 = vrot.slane %v1497_v20, %v9648_v9  ;;  %v1529_v8 = vcombine.high %v5229_v58, %v5230_v54  ;;  %v1617_v34 = vcombine.high %v5231_v53, %v5232_v60  ;;  %v5233_v20 = vld [vmem:[%s5632_s2 + $0x148] sm:$0xff]  ;;  %v5282_v15 = vld [vmem:[%s5632_s2 + $0x378] sm:$0xff] }
 0x11f   : > { %9680 = vst [vmem:[#allocation35_spill] sm:$0xff] %v7557_v29  ;;  %9681 = vst [vmem:[#allocation38_spill] sm:$0xff] %v7560_v48  ;;  %v1340_v33 = vcombine.low %v7536_v19, %v7554_v25  ;;  %v1456_v24 = vcombine.low %v7547_v35, %v7557_v29  ;;  %v7580_v16 = vrot.slane %v1513_v43, %v9648_v9  ;;  %v5234_v26 = vld [vmem:[%s5632_s2 + $0x348] sm:$0xff]  ;;  %v5345_v13 = vld [vmem:[%s5632_s2 + $0x1b8] sm:$0xff] }
 0x120   : > { %9682 = vst [vmem:[#allocation37_spill] sm:$0xff] %v7569_v31  ;;  %v1633_v55 = vcombine.high %v5233_v20, %v5234_v26  ;;  %v7585_v58 = vrot.slane %v1529_v8, %v9648_v9  ;;  %v1560_v54 = vcombine.low %v7560_v48, %v7569_v31  ;;  %v7590_v53 = vrot.slane %v1617_v34, %v9648_v9  ;;  %v5235_v60 = vld [vmem:[%s5632_s2 + $0x448] sm:$0xff]  ;;  %v5239_v48 = vld [vmem:[%s5632_s2 + $0x50] sm:$0xff]  ;;  %v5346_v22 = vld [vmem:[%s5632_s2 + $0x3b8] sm:$0xff] }
 0x121   : > { %9683 = vst [vmem:[#allocation40_spill] sm:$0xff] %v7580_v16  ;;  %v5236_v35 = vld [vmem:[%s5632_s2 + $0x648] sm:$0xff]  ;;  %4878 = vst [vmem:[%s5745_s17 + $0x430] sm:$0xff] %v1340_v33  ;;  %v7596_v29 = vrot.slane %v1456_v24, %v5658_v27  ;;  %v5240_v34 = vld [vmem:[%s5632_s2 + $0x250] sm:$0xff] }
 0x122   : > { %9684 = vst [vmem:[#allocation39_spill] sm:$0xff] %v7585_v58  ;;  %9685 = vst [vmem:[#allocation42_spill] sm:$0xff] %v7590_v53  ;;  %v1649_v43 = vcombine.high %v5235_v60, %v5236_v35  ;;  %v7599_v20 = vrot.slane %v1633_v55, %v9648_v9  ;;  %v5237_v8 = vld [vmem:[%s5632_s2 + $0x548] sm:$0xff]  ;;  %v1753_v31 = vcombine.high %v5239_v48, %v5240_v34  ;;  %v5241_v24 = vld [vmem:[%s5632_s2 + $0x150] sm:$0xff] }
 0x123   : > { %v5238_v26 = vld [vmem:[%s5632_s2 + $0x748] sm:$0xff]  ;;  %v7606_v40 = vrot.slane %v1560_v54, %v5658_v27  ;;  %v1592_v35 = vcombine.low %v7580_v16, %v7585_v58  ;;  %v5242_v55 = vld [vmem:[%s5632_s2 + $0x350] sm:$0xff] }
 0x124   : > { %9686 = vst [vmem:[#allocation41_spill] sm:$0xff] %v7599_v20  ;;  %v1665_v21 = vcombine.high %v5237_v8, %v5238_v26  ;;  %v7611_v33 = vrot.slane %v1649_v43, %v9648_v9  ;;  %v1769_v60 = vcombine.high %v5241_v24, %v5242_v55  ;;  %v1476_v8 = vcombine.low %v7566_v51, %v7596_v29  ;;  %v5243_v24 = vld [vmem:[%s5632_s2 + $0x450] sm:$0xff] }
 0x125   : > { %v1696_v54 = vcombine.low %v7590_v53, %v7599_v20  ;;  %v7623_v26 = vrot.slane %v1753_v31, %v9648_v9  ;;  %v7626_v43 = vrot.slane %v1592_v35, %v5658_v27  ;;  %v5244_v55 = vld [vmem:[%s5632_s2 + $0x650] sm:$0xff]  ;;  %v5247_v35 = vld [vmem:[%s5632_s2 + $0x58] sm:$0xff] }
 0x126   : > { %9687 = vst [vmem:[#allocation44_spill] sm:$0xff] %v7611_v33  ;;  %v7618_v48 = vrot.slane %v1665_v21, %v9648_v9  ;;  %v7629_v34 = vrot.slane %v1769_v60, %v9648_v9  ;;  %v1785_v16 = vcombine.high %v5243_v24, %v5244_v55  ;;  %v5245_v58 = vld [vmem:[%s5632_s2 + $0x550] sm:$0xff]  ;;  %4879 = vst [vmem:[%s5745_s17 + $0x438] sm:$0xff] %v1476_v8  ;;  %v5248_v20 = vld [vmem:[%s5632_s2 + $0x258] sm:$0xff] }
 0x127   : > { %9689 = vst [vmem:[#allocation46_spill] sm:$0xff] %v7623_v26  ;;  %v5246_v21 = vld [vmem:[%s5632_s2 + $0x750] sm:$0xff]  ;;  %v7637_v53 = vrot.slane %v1696_v54, %v5658_v27  ;;  %v1889_v60 = vcombine.high %v5247_v35, %v5248_v20  ;;  %v1905_v24 = vcombine.high %v5249_v28, %v5250_v56  ;;  %v5251_v28 = vld [vmem:[%s5632_s2 + $0x458] sm:$0xff] }
 0x128   : > { %9688 = vst [vmem:[#allocation43_spill] sm:$0xff] %v7618_v48  ;;  %9690 = vst [vmem:[#allocation45_spill] sm:$0xff] %v7629_v34  ;;  %v1801_v38 = vcombine.high %v5245_v58, %v5246_v21  ;;  %v1728_v31 = vcombine.low %v7611_v33, %v7618_v48  ;;  %v1612_v58 = vcombine.low %v7606_v40, %v7626_v43  ;;  %v5256_v33 = vld [vmem:[%s5632_s2 + $0x260] sm:$0xff] }
 0x129   : > { %v7648_v8 = vrot.slane %v1785_v16, %v9648_v9  ;;  %v1832_v55 = vcombine.low %v7623_v26, %v7629_v34  ;;  %v7659_v21 = vrot.slane %v1889_v60, %v9648_v9  ;;  %v7662_v56 = vrot.slane %v1905_v24, %v9648_v9  ;;  %v5252_v16 = vld [vmem:[%s5632_s2 + $0x658] sm:$0xff]  ;;  %v5255_v24 = vld [vmem:[%s5632_s2 + $0x60] sm:$0xff] }
 0x12a   : > { %v7651_v54 = vrot.slane %v1801_v38, %v9648_v9  ;;  %v7656_v20 = vrot.slane %v1728_v31, %v5658_v27  ;;  %v1921_v35 = vcombine.high %v5251_v28, %v5252_v16  ;;  %4880 = vst [vmem:[%s5745_s17 + $0x440] sm:$0xff] %v1612_v58  ;;  %v5253_v31 = vld [vmem:[%s5632_s2 + $0x558] sm:$0xff]  ;;  %v2025_v48 = vcombine.high %v5255_v24, %v5256_v33  ;;  %v5257_v16 = vld [vmem:[%s5632_s2 + $0x160] sm:$0xff] }
 0x12b   : > { %9691 = vst [vmem:[#allocation48_spill] sm:$0xff] %v7648_v8  ;;  %9693 = vst [vmem:[#allocation50_spill] sm:$0xff] %v7659_v21  ;;  %v7668_v38 = vrot.slane %v1832_v55, %v5658_v27  ;;  %v5254_v60 = vld [vmem:[%s5632_s2 + $0x758] sm:$0xff]  ;;  %v1968_v55 = vcombine.low %v7659_v21, %v7662_v56 }
 0x12c   : > { %9692 = vst [vmem:[#allocation47_spill] sm:$0xff] %v7651_v54  ;;  %9694 = vst [vmem:[#allocation49_spill] sm:$0xff] %v7662_v56  ;;  %v1864_v26 = vcombine.low %v7648_v8, %v7651_v54  ;;  %v1937_v34 = vcombine.high %v5253_v31, %v5254_v60  ;;  %v1748_v28 = vcombine.low %v7637_v53, %v7656_v20  ;;  %v5258_v8 = vld [vmem:[%s5632_s2 + $0x360] sm:$0xff]  ;;  %v5264_v56 = vld [vmem:[%s5632_s2 + $0x268] sm:$0xff] }
 0x12d   : > { %v7679_v58 = vrot.slane %v1921_v35, %v9648_v9  ;;  %v2041_v31 = vcombine.high %v5257_v16, %v5258_v8  ;;  %v7692_v24 = vrot.slane %v2025_v48, %v9648_v9  ;;  %v5259_v35 = vld [vmem:[%s5632_s2 + $0x460] sm:$0xff]  ;;  %v7698_v21 = vrot.slane %v1968_v55, %v5658_v27  ;;  %v5263_v48 = vld [vmem:[%s5632_s2 + $0x68] sm:$0xff] }
 0x12e   : > { %v7686_v60 = vrot.slane %v1864_v26, %v5658_v27  ;;  %v7689_v33 = vrot.slane %v1937_v34, %v9648_v9  ;;  %v5260_v54 = vld [vmem:[%s5632_s2 + $0x660] sm:$0xff]  ;;  %4881 = vst [vmem:[%s5745_s17 + $0x448] sm:$0xff] %v1748_v28  ;;  %v2161_v44 = vcombine.high %v5263_v48, %v5264_v56 }
 0x12f   : > { %9695 = vst [vmem:[#allocation52_spill] sm:$0xff] %v7679_v58  ;;  %9697 = vst [vmem:[#allocation54_spill] sm:$0xff] %v7692_v24  ;;  %v2057_v32 = vcombine.high %v5259_v35, %v5260_v54  ;;  %v7701_v8 = vrot.slane %v2041_v31, %v9648_v9  ;;  %v5261_v26 = vld [vmem:[%s5632_s2 + $0x560] sm:$0xff]  ;;  %v5265_v31 = vld [vmem:[%s5632_s2 + $0x168] sm:$0xff] }
 0x130   : > { %9696 = vst [vmem:[#allocation51_spill] sm:$0xff] %v7689_v33  ;;  %v5262_v34 = vld [vmem:[%s5632_s2 + $0x760] sm:$0xff]  ;;  %v1884_v54 = vcombine.low %v7668_v38, %v7686_v60  ;;  %v2000_v28 = vcombine.low %v7679_v58, %v7689_v33  ;;  %v5266_v35 = vld [vmem:[%s5632_s2 + $0x368] sm:$0xff]  ;;  %v7722_v48 = vrot.slane %v2161_v44, %v9648_v9  ;;  %v5272_v44 = vld [vmem:[%s5632_s2 + $0x270] sm:$0xff] }
 0x131   : > { %9698 = vst [vmem:[#allocation53_spill] sm:$0xff] %v7701_v8  ;;  %v2073_v16 = vcombine.high %v5261_v26, %v5262_v34  ;;  %v7712_v55 = vrot.slane %v2057_v32, %v9648_v9  ;;  %v2177_v26 = vcombine.high %v5265_v31, %v5266_v35  ;;  %v2104_v56 = vcombine.low %v7692_v24, %v7701_v8  ;;  %v5268_v58 = vld [vmem:[%s5632_s2 + $0x668] sm:$0xff]  ;;  %v5271_v24 = vld [vmem:[%s5632_s2 + $0x70] sm:$0xff] }
 0x132   : > { %9701 = vst [vmem:[#allocation58_spill] sm:$0xff] %v7722_v48  ;;  %v2193_v32 = vcombine.high %v5267_v30, %v5268_v58  ;;  %4882 = vst [vmem:[%s5745_s17 + $0x450] sm:$0xff] %v1884_v54  ;;  %v7728_v33 = vrot.slane %v2000_v28, %v5658_v27  ;;  %v5270_v35 = vld [vmem:[%s5632_s2 + $0x768] sm:$0xff]  ;;  %v2297_v8 = vcombine.high %v5271_v24, %v5272_v44  ;;  %v5273_v54 = vld [vmem:[%s5632_s2 + $0x170] sm:$0xff] }
 0x133   : > { %9699 = vst [vmem:[#allocation56_spill] sm:$0xff] %v7712_v55  ;;  %v7717_v34 = vrot.slane %v2073_v16, %v9648_v9  ;;  %v7731_v31 = vrot.slane %v2177_v26, %v9648_v9  ;;  %v5269_v16 = vld [vmem:[%s5632_s2 + $0x568] sm:$0xff]  ;;  %v7738_v42 = vrot.slane %v2104_v56, %v5658_v27  ;;  %v5274_v28 = vld [vmem:[%s5632_s2 + $0x370] sm:$0xff] }
 0x134   : > { %v2209_v45 = vcombine.high %v5269_v16, %v5270_v35  ;;  %v7743_v58 = vrot.slane %v2193_v32, %v9648_v9  ;;  %v2313_v26 = vcombine.high %v5273_v54, %v5274_v28  ;;  %v2020_v16 = vcombine.low %v7698_v21, %v7728_v33  ;;  %v5275_v54 = vld [vmem:[%s5632_s2 + $0x470] sm:$0xff] }
 0x135   : > { %9700 = vst [vmem:[#allocation55_spill] sm:$0xff] %v7717_v34  ;;  %9702 = vst [vmem:[#allocation57_spill] sm:$0xff] %v7731_v31  ;;  %v2136_v30 = vcombine.low %v7712_v55, %v7717_v34  ;;  %v2240_v56 = vcombine.low %v7722_v48, %v7731_v31  ;;  %v7755_v35 = vrot.slane %v2297_v8, %v9648_v9  ;;  %v5276_v28 = vld [vmem:[%s5632_s2 + $0x670] sm:$0xff]  ;;  %v5280_v31 = vld [vmem:[%s5632_s2 + $0x278] sm:$0xff] }
 0x136   : > { %9703 = vst [vmem:[#allocation60_spill] sm:$0xff] %v7743_v58  ;;  %v7750_v24 = vrot.slane %v2209_v45, %v9648_v9  ;;  %v7761_v44 = vrot.slane %v2313_v26, %v9648_v9  ;;  %v2329_v55 = vcombine.high %v5275_v54, %v5276_v28  ;;  %v5277_v34 = vld [vmem:[%s5632_s2 + $0x570] sm:$0xff]  ;;  %4883 = vst [vmem:[%s5745_s17 + $0x458] sm:$0xff] %v2020_v16 }
 0x137   : > { %9705 = vst [vmem:[#allocation62_spill] sm:$0xff] %v7755_v35  ;;  %v7758_v32 = vrot.slane %v2136_v30, %v5658_v27  ;;  %v5278_v45 = vld [vmem:[%s5632_s2 + $0x770] sm:$0xff]  ;;  %v7769_v48 = vrot.slane %v2240_v56, %v5658_v27  ;;  %v5279_v30 = vld [vmem:[%s5632_s2 + $0x78] sm:$0xff]  ;;  %v2449_v54 = vcombine.high %v5281_v39, %v5282_v15 }
 0x138   : > { %9704 = vst [vmem:[#allocation59_spill] sm:$0xff] %v7750_v24  ;;  %9706 = vst [vmem:[#allocation61_spill] sm:$0xff] %v7761_v44  ;;  %v2345_v41 = vcombine.high %v5277_v34, %v5278_v45  ;;  %v2272_v8 = vcombine.low %v7743_v58, %v7750_v24  ;;  %v2433_v26 = vcombine.high %v5279_v30, %v5280_v31  ;;  %v5283_v39 = vld [vmem:[%s5632_s2 + $0x478] sm:$0xff]  ;;  %v5288_v58 = vld [vmem:[%s5632_s2 + $0x280] sm:$0xff] }
 0x139   : > { %v2156_v34 = vcombine.low %v7738_v42, %v7758_v32  ;;  %v7780_v16 = vrot.slane %v2329_v55, %v9648_v9  ;;  %v2376_v28 = vcombine.low %v7755_v35, %v7761_v44  ;;  %v7794_v15 = vrot.slane %v2449_v54, %v9648_v9  ;;  %v5284_v55 = vld [vmem:[%s5632_s2 + $0x678] sm:$0xff]  ;;  %v5287_v54 = vld [vmem:[%s5632_s2 + $0x80] sm:$0xff] }
 0x13a   : > { %v7783_v56 = vrot.slane %v2345_v41, %v9648_v9  ;;  %v7788_v31 = vrot.slane %v2272_v8, %v5658_v27  ;;  %v7791_v45 = vrot.slane %v2433_v26, %v9648_v9  ;;  %v2465_v30 = vcombine.high %v5283_v39, %v5284_v55  ;;  %v5285_v8 = vld [vmem:[%s5632_s2 + $0x578] sm:$0xff]  ;;  %v5289_v55 = vld [vmem:[%s5632_s2 + $0x180] sm:$0xff] }
 0x13b   : > { %9707 = vst [vmem:[#allocation64_spill] sm:$0xff] %v7780_v16  ;;  %9710 = vst [vmem:[#allocation65_spill] sm:$0xff] %v7794_v15  ;;  %v7800_v41 = vrot.slane %v2376_v28, %v5658_v27  ;;  %v5286_v26 = vld [vmem:[%s5632_s2 + $0x778] sm:$0xff]  ;;  %v2569_v24 = vcombine.high %v5287_v54, %v5288_v58 }
 0x13c   : > { %9708 = vst [vmem:[#allocation63_spill] sm:$0xff] %v7783_v56  ;;  %9709 = vst [vmem:[#allocation66_spill] sm:$0xff] %v7791_v45  ;;  %v2408_v35 = vcombine.low %v7780_v16, %v7783_v56  ;;  %v2481_v44 = vcombine.high %v5285_v8, %v5286_v26  ;;  %v2292_v39 = vcombine.low %v7769_v48, %v7788_v31  ;;  %v5290_v16 = vld [vmem:[%s5632_s2 + $0x380] sm:$0xff] }
 0x13d   : > { %4884 = vst [vmem:[%s5745_s17 + $0x460] sm:$0xff] %v2156_v34  ;;  %v7811_v34 = vrot.slane %v2465_v30, %v9648_v9  ;;  %v2512_v28 = vcombine.low %v7791_v45, %v7794_v15  ;;  %v2585_v8 = vcombine.high %v5289_v55, %v5290_v16  ;;  %v7824_v54 = vrot.slane %v2569_v24, %v9648_v9  ;;  %v5291_v30 = vld [vmem:[%s5632_s2 + $0x480] sm:$0xff]  ;;  %v5295_v24 = vld [vmem:[%s5632_s2 + $0x88] sm:$0xff] }
 0x13e   : > { %v7818_v26 = vrot.slane %v2408_v35, %v5658_v27  ;;  %v7821_v58 = vrot.slane %v2481_v44, %v9648_v9  ;;  %v5292_v56 = vld [vmem:[%s5632_s2 + $0x680] sm:$0xff]  ;;  %4885 = vst [vmem:[%s5745_s17 + $0x468] sm:$0xff] %v2292_v39  ;;  %v5296_v15 = vld [vmem:[%s5632_s2 + $0x288] sm:$0xff] }
 0x13f   : > { %9711 = vst [vmem:[#allocation68_spill] sm:$0xff] %v7811_v34  ;;  %9713 = vst [vmem:[#allocation70_spill] sm:$0xff] %v7824_v54  ;;  %v2601_v46 = vcombine.high %v5291_v30, %v5292_v56  ;;  %v7830_v45 = vrot.slane %v2512_v28, %v5658_v27  ;;  %v7833_v16 = vrot.slane %v2585_v8, %v9648_v9  ;;  %v5293_v35 = vld [vmem:[%s5632_s2 + $0x580] sm:$0xff]  ;;  %v5297_v8 = vld [vmem:[%s5632_s2 + $0x188] sm:$0xff] }
 0x140   : > { %9712 = vst [vmem:[#allocation67_spill] sm:$0xff] %v7821_v58  ;;  %v5294_v44 = vld [vmem:[%s5632_s2 + $0x780] sm:$0xff]  ;;  %v2705_v47 = vcombine.high %v5295_v24, %v5296_v15  ;;  %v2428_v56 = vcombine.low %v7800_v41, %v7818_v26  ;;  %v2544_v39 = vcombine.low %v7811_v34, %v7821_v58  ;;  %v5298_v30 = vld [vmem:[%s5632_s2 + $0x388] sm:$0xff] }
 0x141   : > { %9714 = vst [vmem:[#allocation69_spill] sm:$0xff] %v7833_v16  ;;  %v2617_v55 = vcombine.high %v5293_v35, %v5294_v44  ;;  %v7844_v28 = vrot.slane %v2601_v46, %v9648_v9  ;;  %v2721_v35 = vcombine.high %v5297_v8, %v5298_v30  ;;  %v2648_v15 = vcombine.low %v7824_v54, %v7833_v16  ;;  %v5300_v34 = vld [vmem:[%s5632_s2 + $0x688] sm:$0xff]  ;;  %v5303_v54 = vld [vmem:[%s5632_s2 + $0x90] sm:$0xff] }
 0x142   : > { %v7854_v24 = vrot.slane %v2705_v47, %v9648_v9  ;;  %v2737_v46 = vcombine.high %v5299_v61, %v5300_v34  ;;  %4886 = vst [vmem:[%s5745_s17 + $0x470] sm:$0xff] %v2428_v56  ;;  %v7860_v58 = vrot.slane %v2544_v39, %v5658_v27  ;;  %v5302_v30 = vld [vmem:[%s5632_s2 + $0x788] sm:$0xff]  ;;  %v5304_v47 = vld [vmem:[%s5632_s2 + $0x290] sm:$0xff] }
 0x143   : > { %9715 = vst [vmem:[#allocation72_spill] sm:$0xff] %v7844_v28  ;;  %v7849_v44 = vrot.slane %v2617_v55, %v9648_v9  ;;  %v7863_v8 = vrot.slane %v2721_v35, %v9648_v9  ;;  %v5301_v55 = vld [vmem:[%s5632_s2 + $0x588] sm:$0xff]  ;;  %v2841_v16 = vcombine.high %v5303_v54, %v5304_v47  ;;  %v7870_v59 = vrot.slane %v2648_v15, %v5658_v27  ;;  %v5305_v56 = vld [vmem:[%s5632_s2 + $0x190] sm:$0xff] }
 0x144   : > { %9717 = vst [vmem:[#allocation74_spill] sm:$0xff] %v7854_v24  ;;  %v2753_v5 = vcombine.high %v5301_v55, %v5302_v30  ;;  %v7875_v34 = vrot.slane %v2737_v46, %v9648_v9  ;;  %v5306_v39 = vld [vmem:[%s5632_s2 + $0x390] sm:$0xff]  ;;  %v2564_v55 = vcombine.low %v7830_v45, %v7860_v58 }
 0x145   : > { %9716 = vst [vmem:[#allocation71_spill] sm:$0xff] %v7849_v44  ;;  %9718 = vst [vmem:[#allocation73_spill] sm:$0xff] %v7863_v8  ;;  %v2680_v61 = vcombine.low %v7844_v28, %v7849_v44  ;;  %v2857_v35 = vcombine.high %v5305_v56, %v5306_v39  ;;  %v2784_v15 = vcombine.low %v7854_v24, %v7863_v8  ;;  %v5307_v56 = vld [vmem:[%s5632_s2 + $0x490] sm:$0xff]  ;;  %v5312_v8 = vld [vmem:[%s5632_s2 + $0x298] sm:$0xff] }
 0x146   : > { %9719 = vst [vmem:[#allocation76_spill] sm:$0xff] %v7875_v34  ;;  %v7882_v54 = vrot.slane %v2753_v5, %v9648_v9  ;;  %v7887_v30 = vrot.slane %v2841_v16, %v9648_v9  ;;  %v5308_v39 = vld [vmem:[%s5632_s2 + $0x690] sm:$0xff]  ;;  %4887 = vst [vmem:[%s5745_s17 + $0x478] sm:$0xff] %v2564_v55 }
 0x147   : > { %v7890_v46 = vrot.slane %v2680_v61, %v5658_v27  ;;  %v7893_v47 = vrot.slane %v2857_v35, %v9648_v9  ;;  %v2873_v28 = vcombine.high %v5307_v56, %v5308_v39  ;;  %v5309_v44 = vld [vmem:[%s5632_s2 + $0x590] sm:$0xff]  ;;  %v7901_v24 = vrot.slane %v2784_v15, %v5658_v27  ;;  %v5311_v61 = vld [vmem:[%s5632_s2 + $0x98] sm:$0xff] }
 0x148   : > { %9720 = vst [vmem:[#allocation75_spill] sm:$0xff] %v7882_v54  ;;  %9721 = vst [vmem:[#allocation78_spill] sm:$0xff] %v7887_v30  ;;  %v5310_v5 = vld [vmem:[%s5632_s2 + $0x790] sm:$0xff]  ;;  %v2816_v16 = vcombine.low %v7875_v34, %v7882_v54  ;;  %v2977_v35 = vcombine.high %v5311_v61, %v5312_v8  ;;  %v2993_v56 = vcombine.high %v5313_v17, %v5314_v0  ;;  %v5315_v17 = vld [vmem:[%s5632_s2 + $0x498] sm:$0xff] }
 0x149   : > { %9722 = vst [vmem:[#allocation77_spill] sm:$0xff] %v7893_v47  ;;  %v2889_v62 = vcombine.high %v5309_v44, %v5310_v5  ;;  %v2700_v44 = vcombine.low %v7870_v59, %v7890_v46  ;;  %v7912_v55 = vrot.slane %v2873_v28, %v9648_v9  ;;  %v2920_v39 = vcombine.low %v7887_v30, %v7893_v47  ;;  %v5316_v28 = vld [vmem:[%s5632_s2 + $0x698] sm:$0xff]  ;;  %v5320_v34 = vld [vmem:[%s5632_s2 + $0x2a0] sm:$0xff] }
 0x14a   : > { %v7920_v8 = vrot.slane %v2816_v16, %v5658_v27  ;;  %v7923_v5 = vrot.slane %v2977_v35, %v9648_v9  ;;  %v7926_v0 = vrot.slane %v2993_v56, %v9648_v9  ;;  %v3009_v61 = vcombine.high %v5315_v17, %v5316_v28  ;;  %v5317_v16 = vld [vmem:[%s5632_s2 + $0x598] sm:$0xff]  ;;  %v5319_v56 = vld [vmem:[%s5632_s2 + $0xa0] sm:$0xff] }
 0x14b   : > { %9723 = vst [vmem:[#allocation80_spill] sm:$0xff] %v7912_v55  ;;  %v7915_v15 = vrot.slane %v2889_v62, %v9648_v9  ;;  %4888 = vst [vmem:[%s5745_s17 + $0x480] sm:$0xff] %v2700_v44  ;;  %v7932_v62 = vrot.slane %v2920_v39, %v5658_v27  ;;  %v5318_v35 = vld [vmem:[%s5632_s2 + $0x798] sm:$0xff]  ;;  %v3113_v54 = vcombine.high %v5319_v56, %v5320_v34  ;;  %v5321_v28 = vld [vmem:[%s5632_s2 + $0x1a0] sm:$0xff] }
 0x14c   : > { %9725 = vst [vmem:[#allocation82_spill] sm:$0xff] %v7923_v5  ;;  %9726 = vst [vmem:[#allocation81_spill] sm:$0xff] %v7926_v0  ;;  %v3025_v47 = vcombine.high %v5317_v16, %v5318_v35  ;;  %v2836_v17 = vcombine.low %v7901_v24, %v7920_v8  ;;  %v7943_v44 = vrot.slane %v3009_v61, %v9648_v9  ;;  %v5323_v61 = vld [vmem:[%s5632_s2 + $0x4a0] sm:$0xff] }
 0x14d   : > { %9724 = vst [vmem:[#allocation79_spill] sm:$0xff] %v7915_v15  ;;  %v2952_v30 = vcombine.low %v7912_v55, %v7915_v15  ;;  %v3056_v39 = vcombine.low %v7923_v5, %v7926_v0  ;;  %v5322_v55 = vld [vmem:[%s5632_s2 + $0x3a0] sm:$0xff]  ;;  %v7956_v56 = vrot.slane %v3113_v54, %v9648_v9  ;;  %v5327_v54 = vld [vmem:[%s5632_s2 + $0xa8] sm:$0xff] }
 0x14e   : > { %9727 = vst [vmem:[#allocation85_spill] sm:$0xff] %v7943_v44  ;;  %v3129_v16 = vcombine.high %v5321_v28, %v5322_v55  ;;  %v7953_v34 = vrot.slane %v3025_v47, %v9648_v9  ;;  %v5324_v15 = vld [vmem:[%s5632_s2 + $0x6a0] sm:$0xff]  ;;  %4889 = vst [vmem:[%s5745_s17 + $0x488] sm:$0xff] %v2836_v17  ;;  %v5328_v0 = vld [vmem:[%s5632_s2 + $0x2a8] sm:$0xff] }
 0x14f   : > { %v7950_v35 = vrot.slane %v2952_v30, %v5658_v27  ;;  %9729 = vst [vmem:[#allocation88_spill] sm:$0xff] %v7956_v56  ;;  %v3145_v12 = vcombine.high %v5323_v61, %v5324_v15  ;;  %v7962_v5 = vrot.slane %v3056_v39, %v5658_v27  ;;  %v5325_v30 = vld [vmem:[%s5632_s2 + $0x5a0] sm:$0xff]  ;;  %v3249_v14 = vcombine.high %v5327_v54, %v5328_v0  ;;  %v5330_v61 = vld [vmem:[%s5632_s2 + $0x3a8] sm:$0xff] }
 0x150   : > { %9728 = vst [vmem:[#allocation84_spill] sm:$0xff] %v7953_v34  ;;  %v7965_v55 = vrot.slane %v3129_v16, %v9648_v9  ;;  %v5326_v47 = vld [vmem:[%s5632_s2 + $0x7a0] sm:$0xff]  ;;  %v3088_v17 = vcombine.low %v7943_v44, %v7953_v34  ;;  %v5329_v16 = vld [vmem:[%s5632_s2 + $0x1a8] sm:$0xff] }
 0x151   : > { %v3161_v28 = vcombine.high %v5325_v30, %v5326_v47  ;;  %v2972_v15 = vcombine.low %v7932_v62, %v7950_v35  ;;  %v7976_v39 = vrot.slane %v3145_v12, %v9648_v9  ;;  %v3265_v30 = vcombine.high %v5329_v16, %v5330_v61  ;;  %v5332_v44 = vld [vmem:[%s5632_s2 + $0x6a8] sm:$0xff] }
 0x152   : > { %9730 = vst [vmem:[#allocation87_spill] sm:$0xff] %v7965_v55  ;;  %v3192_v0 = vcombine.low %v7956_v56, %v7965_v55  ;;  %v7986_v54 = vrot.slane %v3249_v14, %v9648_v9  ;;  %v3281_v12 = vcombine.high %v5331_v4, %v5332_v44  ;;  %v7992_v34 = vrot.slane %v3088_v17, %v5658_v27  ;;  %v5334_v61 = vld [vmem:[%s5632_s2 + $0x7a8] sm:$0xff]  ;;  %v5335_v56 = vld [vmem:[%s5632_s2 + $0xb0] sm:$0xff] }
 0x153   : > { %9731 = vst [vmem:[#allocation92_spill] sm:$0xff] %v7976_v39  ;;  %v7981_v47 = vrot.slane %v3161_v28, %v9648_v9  ;;  %4890 = vst [vmem:[%s5745_s17 + $0x490] sm:$0xff] %v2972_v15  ;;  %v7995_v16 = vrot.slane %v3265_v30, %v9648_v9  ;;  %v5333_v28 = vld [vmem:[%s5632_s2 + $0x5a8] sm:$0xff]  ;;  %v5336_v14 = vld [vmem:[%s5632_s2 + $0x2b0] sm:$0xff] }
 0x154   : > { %9733 = vst [vmem:[#allocation95_spill] sm:$0xff] %v7986_v54  ;;  %v3297_v50 = vcombine.high %v5333_v28, %v5334_v61  ;;  %v3385_v55 = vcombine.high %v5335_v56, %v5336_v14  ;;  %v8002_v52 = vrot.slane %v3192_v0, %v5658_v27  ;;  %v8007_v44 = vrot.slane %v3281_v12, %v9648_v9  ;;  %v5337_v15 = vld [vmem:[%s5632_s2 + $0x1b0] sm:$0xff] }
 0x155   : > { %9732 = vst [vmem:[#allocation90_spill] sm:$0xff] %v7981_v47  ;;  %9734 = vst [vmem:[#allocation93_spill] sm:$0xff] %v7995_v16  ;;  %v3224_v4 = vcombine.low %v7976_v39, %v7981_v47  ;;  %v5338_v17 = vld [vmem:[%s5632_s2 + $0x3b0] sm:$0xff]  ;;  %v3108_v28 = vcombine.low %v7962_v5, %v7992_v34  ;;  %v3328_v0 = vcombine.low %v7986_v54, %v7995_v16  ;;  %v5344_v16 = vld [vmem:[%s5632_s2 + $0x2b8] sm:$0xff] }
 0x156   : > { %9735 = vst [vmem:[#allocation97_spill] sm:$0xff] %v8002_v52  ;;  %9736 = vst [vmem:[#allocation96_spill] sm:$0xff] %v8007_v44  ;;  %v3401_v30 = vcombine.high %v5337_v15, %v5338_v17  ;;  %v8014_v56 = vrot.slane %v3297_v50, %v9648_v9  ;;  %v8019_v61 = vrot.slane %v3385_v55, %v9648_v9  ;;  %v5339_v15 = vld [vmem:[%s5632_s2 + $0x4b0] sm:$0xff] }
 0x157   : > { %v8022_v12 = vrot.slane %v3224_v4, %v5658_v27  ;;  %v5340_v17 = vld [vmem:[%s5632_s2 + $0x6b0] sm:$0xff]  ;;  %4891 = vst [vmem:[%s5745_s17 + $0x498] sm:$0xff] %v3108_v28  ;;  %v8033_v54 = vrot.slane %v3328_v0, %v5658_v27  ;;  %v5343_v4 = vld [vmem:[%s5632_s2 + $0xb8] sm:$0xff] }
 0x158   : > { %9737 = vst [vmem:[#allocation100_spill] sm:$0xff] %v8014_v56  ;;  %9738 = vst [vmem:[#allocation98_spill] sm:$0xff] %v8019_v61  ;;  %v8025_v14 = vrot.slane %v3401_v30, %v9648_v9  ;;  %v3417_v39 = vcombine.high %v5339_v15, %v5340_v17  ;;  %v5341_v47 = vld [vmem:[%s5632_s2 + $0x5b0] sm:$0xff]  ;;  %v3360_v55 = vcombine.low %v8007_v44, %v8014_v56  ;;  %v5352_v44 = vld [vmem:[%s5632_s2 + $0x2c0] sm:$0xff] }
 0x159   : > { %v5342_v50 = vld [vmem:[%s5632_s2 + $0x7b0] sm:$0xff]  ;;  %9740 = vst [vmem:[#allocation102_spill] sm:$0xff] %v8033_v54  ;;  %v3521_v30 = vcombine.high %v5343_v4, %v5344_v16  ;;  %v3537_v15 = vcombine.high %v5345_v13, %v5346_v22  ;;  %v5347_v13 = vld [vmem:[%s5632_s2 + $0x4b8] sm:$0xff] }
 0x15a   : > { %9739 = vst [vmem:[#allocation103_spill] sm:$0xff] %v8025_v14  ;;  %v3433_v57 = vcombine.high %v5341_v47, %v5342_v50  ;;  %v3244_v47 = vcombine.low %v8002_v52, %v8022_v12  ;;  %v8044_v28 = vrot.slane %v3417_v39, %v9648_v9  ;;  %v3464_v17 = vcombine.low %v8019_v61, %v8025_v14  ;;  %v5348_v39 = vld [vmem:[%s5632_s2 + $0x6b8] sm:$0xff] }
 0x15b   : > { %v8052_v16 = vrot.slane %v3360_v55, %v5658_v27  ;;  %v8055_v50 = vrot.slane %v3521_v30, %v9648_v9  ;;  %v8058_v22 = vrot.slane %v3537_v15, %v9648_v9  ;;  %v3553_v4 = vcombine.high %v5347_v13, %v5348_v39  ;;  %v5349_v55 = vld [vmem:[%s5632_s2 + $0x5b8] sm:$0xff]  ;;  %v5351_v15 = vld [vmem:[%s5632_s2 + $0xc0] sm:$0xff] }
 0x15c   : > { %9741 = vst [vmem:[#allocation106_spill] sm:$0xff] %v8044_v28  ;;  %v8047_v0 = vrot.slane %v3433_v57, %v9648_v9  ;;  %4892 = vst [vmem:[%s5745_s17 + $0x4a0] sm:$0xff] %v3244_v47  ;;  %v8064_v57 = vrot.slane %v3464_v17, %v5658_v27  ;;  %v5350_v30 = vld [vmem:[%s5632_s2 + $0x7b8] sm:$0xff]  ;;  %v3657_v56 = vcombine.high %v5351_v15, %v5352_v44  ;;  %v5353_v39 = vld [vmem:[%s5632_s2 + $0x1c0] sm:$0xff] }
 0x15d   : > { %9743 = vst [vmem:[#allocation109_spill] sm:$0xff] %v8052_v16  ;;  %9744 = vst [vmem:[#allocation108_spill] sm:$0xff] %v8055_v50  ;;  %v3569_v14 = vcombine.high %v5349_v55, %v5350_v30  ;;  %v3380_v13 = vcombine.low %v8033_v54, %v8052_v16  ;;  %v8075_v47 = vrot.slane %v3553_v4, %v9648_v9  ;;  %v5355_v4 = vld [vmem:[%s5632_s2 + $0x4c0] sm:$0xff]  ;;  %v5378_v52 = vld [vmem:[%s5632_s2 + $0x3d8] sm:$0xff] }
 0x15e   : > { %9742 = vst [vmem:[#allocation104_spill] sm:$0xff] %v8047_v0  ;;  %9745 = vst [vmem:[#allocation112_spill] sm:$0xff] %v8058_v22  ;;  %v3496_v61 = vcombine.low %v8044_v28, %v8047_v0  ;;  %v3600_v17 = vcombine.low %v8055_v50, %v8058_v22  ;;  %v5354_v28 = vld [vmem:[%s5632_s2 + $0x3c0] sm:$0xff]  ;;  %v8088_v15 = vrot.slane %v3657_v56, %v9648_v9  ;;  %v5359_v56 = vld [vmem:[%s5632_s2 + $0xc8] sm:$0xff] }
 0x15f   : > { %9746 = vst [vmem:[#allocation111_spill] sm:$0xff] %v8064_v57  ;;  %9747 = vst [vmem:[#allocation116_spill] sm:$0xff] %v8075_v47  ;;  %v3673_v55 = vcombine.high %v5353_v39, %v5354_v28  ;;  %v8085_v44 = vrot.slane %v3569_v14, %v9648_v9  ;;  %v5356_v0 = vld [vmem:[%s5632_s2 + $0x6c0] sm:$0xff]  ;;  %v5360_v22 = vld [vmem:[%s5632_s2 + $0x2c8] sm:$0xff] }
 0x160   : > { %v8082_v30 = vrot.slane %v3496_v61, %v5658_v27  ;;  %9750 = vst [vmem:[#allocation117_spill] sm:$0xff] %v8088_v15  ;;  %v3689_v23 = vcombine.high %v5355_v4, %v5356_v0  ;;  %4893 = vst [vmem:[%s5745_s17 + $0x4a8] sm:$0xff] %v3380_v13  ;;  %v8094_v50 = vrot.slane %v3600_v17, %v5658_v27  ;;  %v5357_v61 = vld [vmem:[%s5632_s2 + $0x5c0] sm:$0xff]  ;;  %v5362_v4 = vld [vmem:[%s5632_s2 + $0x3c8] sm:$0xff] }
 0x161   : > { %9749 = vst [vmem:[#allocation119_spill] sm:$0xff] %v8085_v44  ;;  %v8097_v28 = vrot.slane %v3673_v55, %v9648_v9  ;;  %v5358_v14 = vld [vmem:[%s5632_s2 + $0x7c0] sm:$0xff]  ;;  %v3793_v54 = vcombine.high %v5359_v56, %v5360_v22  ;;  %v3632_v13 = vcombine.low %v8075_v47, %v8085_v44  ;;  %v5361_v55 = vld [vmem:[%s5632_s2 + $0x1c8] sm:$0xff] }
 0x162   : > { %9748 = vst [vmem:[#allocation114_spill] sm:$0xff] %v8082_v30  ;;  %9751 = vst [vmem:[#allocation121_spill] sm:$0xff] %v8094_v50  ;;  %v3705_v39 = vcombine.high %v5357_v61, %v5358_v14  ;;  %v3516_v0 = vcombine.low %v8064_v57, %v8082_v30  ;;  %v8108_v17 = vrot.slane %v3689_v23, %v9648_v9  ;;  %v5363_v57 = vld [vmem:[%s5632_s2 + $0x4c8] sm:$0xff] }
 0x163   : > { %9752 = vst [vmem:[#allocation120_spill] sm:$0xff] %v8097_v28  ;;  %v3809_v61 = vcombine.high %v5361_v55, %v5362_v4  ;;  %v3736_v22 = vcombine.low %v8088_v15, %v8097_v28  ;;  %v8118_v56 = vrot.slane %v3793_v54, %v9648_v9  ;;  %v5364_v47 = vld [vmem:[%s5632_s2 + $0x6c8] sm:$0xff]  ;;  %v8124_v44 = vrot.slane %v3632_v13, %v5658_v27  ;;  %v5367_v15 = vld [vmem:[%s5632_s2 + $0xd0] sm:$0xff] }
 0x164   : > { %9753 = vst [vmem:[#allocation124_spill] sm:$0xff] %v8108_v17  ;;  %v8113_v14 = vrot.slane %v3705_v39, %v9648_v9  ;;  %v3825_v23 = vcombine.high %v5363_v57, %v5364_v47  ;;  %4894 = vst [vmem:[%s5745_s17 + $0x4b0] sm:$0xff] %v3516_v0  ;;  %v5365_v39 = vld [vmem:[%s5632_s2 + $0x5c8] sm:$0xff]  ;;  %v5368_v54 = vld [vmem:[%s5632_s2 + $0x2d0] sm:$0xff] }
 0x165   : > { %9755 = vst [vmem:[#allocation127_spill] sm:$0xff] %v8118_v56  ;;  %9756 = vst [vmem:[#allocation126_spill] sm:$0xff] %v8124_v44  ;;  %v8127_v55 = vrot.slane %v3809_v61, %v9648_v9  ;;  %v5366_v4 = vld [vmem:[%s5632_s2 + $0x7c8] sm:$0xff]  ;;  %v3929_v28 = vcombine.high %v5367_v15, %v5368_v54  ;;  %v8134_v16 = vrot.slane %v3736_v22, %v5658_v27  ;;  %v5369_v0 = vld [vmem:[%s5632_s2 + $0x1d0] sm:$0xff] }
 0x166   : > { %9754 = vst [vmem:[#allocation122_spill] sm:$0xff] %v8113_v14  ;;  %v3841_v30 = vcombine.high %v5365_v39, %v5366_v4  ;;  %v3768_v57 = vcombine.low %v8108_v17, %v8113_v14  ;;  %v8139_v47 = vrot.slane %v3825_v23, %v9648_v9  ;;  %v5370_v13 = vld [vmem:[%s5632_s2 + $0x3d0] sm:$0xff]  ;;  %v3652_v39 = vcombine.low %v8094_v50, %v8124_v44  ;;  %v5377_v44 = vld [vmem:[%s5632_s2 + $0x1d8] sm:$0xff] }
 0x167   : > { %9757 = vst [vmem:[#allocation130_spill] sm:$0xff] %v8127_v55  ;;  %9758 = vst [vmem:[#allocation128_spill] sm:$0xff] %v8134_v16  ;;  %v3945_v61 = vcombine.high %v5369_v0, %v5370_v13  ;;  %v3872_v22 = vcombine.low %v8118_v56, %v8127_v55  ;;  %v8151_v4 = vrot.slane %v3929_v28, %v9648_v9  ;;  %v5371_v0 = vld [vmem:[%s5632_s2 + $0x4d0] sm:$0xff]  ;;  %v5376_v55 = vld [vmem:[%s5632_s2 + $0x2d8] sm:$0xff] }
 0x168   : > { %9759 = vst [vmem:[#allocation133_spill] sm:$0xff] %v8139_v47  ;;  %v8146_v15 = vrot.slane %v3841_v30, %v9648_v9  ;;  %v8154_v23 = vrot.slane %v3768_v57, %v5658_v27  ;;  %v5372_v13 = vld [vmem:[%s5632_s2 + $0x6d0] sm:$0xff]  ;;  %4895 = vst [vmem:[%s5745_s17 + $0x4b8] sm:$0xff] %v3652_v39  ;;  %v5375_v57 = vld [vmem:[%s5632_s2 + $0xd8] sm:$0xff] }
 0x169   : > { %9761 = vst [vmem:[#allocation136_spill] sm:$0xff] %v8151_v4  ;;  %v8157_v54 = vrot.slane %v3945_v61, %v9648_v9  ;;  %v3961_v17 = vcombine.high %v5371_v0, %v5372_v13  ;;  %v5373_v14 = vld [vmem:[%s5632_s2 + $0x5d0] sm:$0xff]  ;;  %v8165_v56 = vrot.slane %v3872_v22, %v5658_v27  ;;  %v4065_v61 = vcombine.high %v5375_v57, %v5376_v55 }
 0x16a   : > { %9760 = vst [vmem:[#allocation132_spill] sm:$0xff] %v8146_v15  ;;  %9762 = vst [vmem:[#allocation135_spill] sm:$0xff] %v8154_v23  ;;  %v5374_v30 = vld [vmem:[%s5632_s2 + $0x7d0] sm:$0xff]  ;;  %v3904_v28 = vcombine.low %v8139_v47, %v8146_v15  ;;  %v4081_v0 = vcombine.high %v5377_v44, %v5378_v52  ;;  %v5379_v44 = vld [vmem:[%s5632_s2 + $0x4d8] sm:$0xff] }
 0x16b   : > { %9763 = vst [vmem:[#allocation140_spill] sm:$0xff] %v8157_v54  ;;  %v3977_v50 = vcombine.high %v5373_v14, %v5374_v30  ;;  %9764 = vst [vmem:[#allocation138_spill] sm:$0xff] %v8165_v56  ;;  %v3788_v14 = vcombine.low %v8134_v16, %v8154_v23  ;;  %v8176_v39 = vrot.slane %v3961_v17, %v9648_v9  ;;  %v5380_v17 = vld [vmem:[%s5632_s2 + $0x6d8] sm:$0xff]  ;;  %v5384_v47 = vld [vmem:[%s5632_s2 + $0x2e0] sm:$0xff] }
 0x16c   : > { %v4008_v13 = vcombine.low %v8151_v4, %v8157_v54  ;;  %v8184_v55 = vrot.slane %v3904_v28, %v5658_v27  ;;  %v8187_v30 = vrot.slane %v4065_v61, %v9648_v9  ;;  %v8190_v52 = vrot.slane %v4081_v0, %v9648_v9  ;;  %v5381_v28 = vld [vmem:[%s5632_s2 + $0x5d8] sm:$0xff]  ;;  %v5383_v0 = vld [vmem:[%s5632_s2 + $0xe0] sm:$0xff] }
 0x16d   : > { %9765 = vst [vmem:[#allocation143_spill] sm:$0xff] %v8176_v39  ;;  %v8179_v22 = vrot.slane %v3977_v50, %v9648_v9  ;;  %v4097_v57 = vcombine.high %v5379_v44, %v5380_v17  ;;  %4896 = vst [vmem:[%s5745_s17 + $0x4c0] sm:$0xff] %v3788_v14  ;;  %v5382_v61 = vld [vmem:[%s5632_s2 + $0x7d8] sm:$0xff]  ;;  %v4201_v15 = vcombine.high %v5383_v0, %v5384_v47  ;;  %v5385_v17 = vld [vmem:[%s5632_s2 + $0x1e0] sm:$0xff] }
 0x16e   : > { %9767 = vst [vmem:[#allocation145_spill] sm:$0xff] %v8184_v55  ;;  %9768 = vst [vmem:[#allocation144_spill] sm:$0xff] %v8187_v30  ;;  %v8196_v50 = vrot.slane %v4008_v13, %v5658_v27  ;;  %v4113_v54 = vcombine.high %v5381_v28, %v5382_v61  ;;  %v3924_v44 = vcombine.low %v8165_v56, %v8184_v55  ;;  %v5410_v23 = vld [vmem:[%s5632_s2 + $0x3f8] sm:$0xff] }
 0x16f   : > { %9766 = vst [vmem:[#allocation141_spill] sm:$0xff] %v8179_v22  ;;  %9769 = vst [vmem:[#allocation147_spill] sm:$0xff] %v8190_v52  ;;  %v4040_v4 = vcombine.low %v8176_v39, %v8179_v22  ;;  %v8207_v14 = vrot.slane %v4097_v57, %v9648_v9  ;;  %v4144_v13 = vcombine.low %v8187_v30, %v8190_v52  ;;  %v5386_v39 = vld [vmem:[%s5632_s2 + $0x3e0] sm:$0xff]  ;;  %v5392_v52 = vld [vmem:[%s5632_s2 + $0x2e8] sm:$0xff] }
 0x170   : > { %9770 = vst [vmem:[#allocation146_spill] sm:$0xff] %v8196_v50  ;;  %v4217_v28 = vcombine.high %v5385_v17, %v5386_v39  ;;  %v8217_v47 = vrot.slane %v4113_v54, %v9648_v9  ;;  %v8220_v0 = vrot.slane %v4201_v15, %v9648_v9  ;;  %v5387_v57 = vld [vmem:[%s5632_s2 + $0x4e0] sm:$0xff]  ;;  %4897 = vst [vmem:[%s5745_s17 + $0x4c8] sm:$0xff] %v3924_v44  ;;  %v5391_v15 = vld [vmem:[%s5632_s2 + $0xe8] sm:$0xff] }
 0x171   : > { %9771 = vst [vmem:[#allocation86_spill] sm:$0xff] %v8207_v14  ;;  %v8214_v61 = vrot.slane %v4040_v4, %v5658_v27  ;;  %v5388_v22 = vld [vmem:[%s5632_s2 + $0x6e0] sm:$0xff]  ;;  %v8226_v30 = vrot.slane %v4144_v13, %v5658_v27  ;;  %v4337_v55 = vcombine.high %v5391_v15, %v5392_v52 }
 0x172   : > { %9773 = vst [vmem:[#allocation83_spill] sm:$0xff] %v8217_v47  ;;  %9774 = vst [vmem:[#allocation99_spill] sm:$0xff] %v8220_v0  ;;  %v4233_v56 = vcombine.high %v5387_v57, %v5388_v22  ;;  %v8229_v39 = vrot.slane %v4217_v28, %v9648_v9  ;;  %v5389_v4 = vld [vmem:[%s5632_s2 + $0x5e0] sm:$0xff]  ;;  %v4176_v44 = vcombine.low %v8207_v14, %v8217_v47  ;;  %v5393_v28 = vld [vmem:[%s5632_s2 + $0x1e8] sm:$0xff] }
 0x173   : > { %9772 = vst [vmem:[#allocation91_spill] sm:$0xff] %v8214_v61  ;;  %9775 = vst [vmem:[#allocation89_spill] sm:$0xff] %v8226_v30  ;;  %v5390_v54 = vld [vmem:[%s5632_s2 + $0x7e0] sm:$0xff]  ;;  %v4060_v22 = vcombine.low %v8196_v50, %v8214_v61  ;;  %v5394_v57 = vld [vmem:[%s5632_s2 + $0x3e8] sm:$0xff]  ;;  %v8250_v15 = vrot.slane %v4337_v55, %v9648_v9 }
 0x174   : > { %9776 = vst [vmem:[#allocation105_spill] sm:$0xff] %v8229_v39  ;;  %v4249_v17 = vcombine.high %v5389_v4, %v5390_v54  ;;  %v8240_v13 = vrot.slane %v4233_v56, %v9648_v9  ;;  %v4353_v4 = vcombine.high %v5393_v28, %v5394_v57  ;;  %v4280_v52 = vcombine.low %v8220_v0, %v8229_v39  ;;  %v5395_v50 = vld [vmem:[%s5632_s2 + $0x4e8] sm:$0xff]  ;;  %v5399_v0 = vld [vmem:[%s5632_s2 + $0xf0] sm:$0xff] }
 0x175   : > { %9779 = vst [vmem:[#allocation101_spill] sm:$0xff] %v8250_v15  ;;  %v5396_v14 = vld [vmem:[%s5632_s2 + $0x6e8] sm:$0xff]  ;;  %4898 = vst [vmem:[%s5745_s17 + $0x4d0] sm:$0xff] %v4060_v22  ;;  %v8256_v47 = vrot.slane %v4176_v44, %v5658_v27  ;;  %v5400_v55 = vld [vmem:[%s5632_s2 + $0x2f0] sm:$0xff] }
 0x176   : > { %9777 = vst [vmem:[#allocation94_spill] sm:$0xff] %v8240_v13  ;;  %v8245_v54 = vrot.slane %v4249_v17, %v9648_v9  ;;  %v4369_v56 = vcombine.high %v5395_v50, %v5396_v14  ;;  %v8259_v28 = vrot.slane %v4353_v4, %v9648_v9  ;;  %v5397_v17 = vld [vmem:[%s5632_s2 + $0x5e8] sm:$0xff]  ;;  %v4473_v39 = vcombine.high %v5399_v0, %v5400_v55  ;;  %v5401_v22 = vld [vmem:[%s5632_s2 + $0x1f0] sm:$0xff] }
 0x177   : > { %9780 = vst [vmem:[#allocation115_spill] sm:$0xff] %v8256_v47  ;;  %v5398_v57 = vld [vmem:[%s5632_s2 + $0x7e8] sm:$0xff]  ;;  %v8266_v16 = vrot.slane %v4280_v52, %v5658_v27  ;;  %v5402_v44 = vld [vmem:[%s5632_s2 + $0x3f0] sm:$0xff] }
 0x178   : > { %9778 = vst [vmem:[#allocation110_spill] sm:$0xff] %v8245_v54  ;;  %9781 = vst [vmem:[#allocation107_spill] sm:$0xff] %v8259_v28  ;;  %v4385_v61 = vcombine.high %v5397_v17, %v5398_v57  ;;  %v4312_v50 = vcombine.low %v8240_v13, %v8245_v54  ;;  %v8271_v14 = vrot.slane %v4369_v56, %v9648_v9  ;;  %v5405_v54 = vld [vmem:[%s5632_s2 + $0x5f0] sm:$0xff] }
 0x179   : > { %v4489_v4 = vcombine.high %v5401_v22, %v5402_v44  ;;  %v4196_v17 = vcombine.low %v8226_v30, %v8256_v47  ;;  %v4416_v52 = vcombine.low %v8250_v15, %v8259_v28  ;;  %v8283_v57 = vrot.slane %v4473_v39, %v9648_v9  ;;  %v5403_v22 = vld [vmem:[%s5632_s2 + $0x4f0] sm:$0xff]  ;;  %v5408_v28 = vld [vmem:[%s5632_s2 + $0x2f8] sm:$0xff] }
 0x17a   : > { %9782 = vst [vmem:[#allocation123_spill] sm:$0xff] %v8271_v14  ;;  %v8278_v0 = vrot.slane %v4385_v61, %v9648_v9  ;;  %v8286_v56 = vrot.slane %v4312_v50, %v5658_v27  ;;  %v5404_v44 = vld [vmem:[%s5632_s2 + $0x6f0] sm:$0xff]  ;;  %v5407_v50 = vld [vmem:[%s5632_s2 + $0xf8] sm:$0xff] }
 0x17b   : > { %9783 = vst [vmem:[#allocation113_spill] sm:$0xff] %v8283_v57  ;;  %v8289_v55 = vrot.slane %v4489_v4, %v9648_v9  ;;  %v4505_v13 = vcombine.high %v5403_v22, %v5404_v44  ;;  %v5406_v61 = vld [vmem:[%s5632_s2 + $0x7f0] sm:$0xff]  ;;  %4899 = vst [vmem:[%s5745_s17 + $0x4d8] sm:$0xff] %v4196_v17  ;;  %v8297_v15 = vrot.slane %v4416_v52, %v5658_v27  ;;  %v5409_v47 = vld [vmem:[%s5632_s2 + $0x1f8] sm:$0xff] }
 0x17c   : > { %v4521_v30 = vcombine.high %v5405_v54, %v5406_v61  ;;  %v4448_v39 = vcombine.low %v8271_v14, %v8278_v0  ;;  %v4609_v4 = vcombine.high %v5407_v50, %v5408_v28  ;;  %v4625_v22 = vcombine.high %v5409_v47, %v5410_v23  ;;  %v5411_v47 = vld [vmem:[%s5632_s2 + $0x4f8] sm:$0xff] }
 0x17d   : > { %9784 = vst [vmem:[#allocation129_spill] sm:$0xff] %v8289_v55  ;;  %v4332_v54 = vcombine.low %v8266_v16, %v8286_v56  ;;  %v8308_v17 = vrot.slane %v4505_v13, %v9648_v9  ;;  %v4552_v44 = vcombine.low %v8283_v57, %v8289_v55  ;;  %v5412_v50 = vld [vmem:[%s5632_s2 + $0x6f8] sm:$0xff] }
 0x17e   : > { %v8311_v52 = vrot.slane %v4521_v30, %v9648_v9  ;;  %v8316_v61 = vrot.slane %v4448_v39, %v5658_v27  ;;  %v8319_v28 = vrot.slane %v4609_v4, %v9648_v9  ;;  %v8322_v23 = vrot.slane %v4625_v22, %v9648_v9  ;;  %v5413_v39 = vld [vmem:[%s5632_s2 + $0x5f8] sm:$0xff] }
 0x17f   : > { %v4641_v13 = vcombine.high %v5411_v47, %v5412_v50  ;;  %4900 = vst [vmem:[%s5745_s17 + $0x4e0] sm:$0xff] %v4332_v54  ;;  %v8328_v30 = vrot.slane %v4552_v44, %v5658_v27  ;;  %v5414_v55 = vld [vmem:[%s5632_s2 + $0x7f8] sm:$0xff]  ;;  %v525_v22 = vcombine.high %v7361_v18, %v7372_v7  ;;  %v661_v44 = vcombine.high %v7375_v11, %v7384_v49 }
 0x180   : > { %v4584_v57 = vcombine.low %v8308_v17, %v8311_v52  ;;  %v4657_v4 = vcombine.high %v5413_v39, %v5414_v55  ;;  %v4468_v14 = vcombine.low %v8297_v15, %v8316_v61  ;;  %v4688_v54 = vcombine.low %v8319_v28, %v8322_v23 }
 0x181   : > { %v8339_v47 = vrot.slane %v4641_v13, %v9648_v9  ;;  %4904 = vst [vmem:[%s5745_s17 + $0x500] sm:$0xff] %v525_v22  ;;  %v797_v18 = vcombine.high %v7403_v37, %v7413_v6  ;;  %v933_v7 = vcombine.high %v7442_v63, %v7455_v1  ;;  %4905 = vst [vmem:[%s5745_s17 + $0x508] sm:$0xff] %v661_v44 }
 0x182   : > { %v8346_v50 = vrot.slane %v4584_v57, %v5658_v27  ;;  %v8349_v55 = vrot.slane %v4657_v4, %v9648_v9  ;;  %4901 = vst [vmem:[%s5745_s17 + $0x4e8] sm:$0xff] %v4468_v14  ;;  %v8358_v13 = vrot.slane %v4688_v54, %v5658_v27  ;;  %v1069_v11 = vcombine.high %v7483_v2, %v7486_v10  ;;  %v9798_v14 = vld [vmem:[#allocation115_spill] sm:$0xff]  ;;  %v9799_v57 = vld [vmem:[#allocation89_spill] sm:$0xff] }
 0x183   : > { %v1205_v9 = vcombine.high %v7513_v3, %v7525_v36  ;;  %v1341_v49 = vcombine.high %v7536_v19, %v7554_v25  ;;  %4906 = vst [vmem:[%s5745_s17 + $0x510] sm:$0xff] %v797_v18  ;;  %4907 = vst [vmem:[%s5745_s17 + $0x518] sm:$0xff] %v933_v7  ;;  %v1477_v63 = vcombine.high %v7566_v51, %v7596_v29  ;;  %v9800_v18 = vld [vmem:[#allocation139_spill] sm:$0xff] }
 0x184   : > { %v4604_v37 = vcombine.low %v8328_v30, %v8346_v50  ;;  %v4720_v6 = vcombine.low %v8339_v47, %v8349_v55  ;;  %v1613_v1 = vcombine.high %v7606_v40, %v7626_v43  ;;  %4908 = vst [vmem:[%s5745_s17 + $0x520] sm:$0xff] %v1069_v11  ;;  %v1749_v2 = vcombine.high %v7637_v53, %v7656_v20  ;;  %v9801_v7 = vld [vmem:[#allocation131_spill] sm:$0xff] }
 0x185   : > { %4909 = vst [vmem:[%s5745_s17 + $0x528] sm:$0xff] %v1205_v9  ;;  %4910 = vst [vmem:[%s5745_s17 + $0x530] sm:$0xff] %v1341_v49  ;;  %v1885_v10 = vcombine.high %v7668_v38, %v7686_v60  ;;  %v2021_v3 = vcombine.high %v7698_v21, %v7728_v33  ;;  %v2157_v36 = vcombine.high %v7738_v42, %v7758_v32  ;;  %v9786_v38 = vld [vmem:[#allocation109_spill] sm:$0xff]  ;;  %v9787_v60 = vld [vmem:[#allocation102_spill] sm:$0xff] }
 0x186   : > { %4902 = vst [vmem:[%s5745_s17 + $0x4f0] sm:$0xff] %v4604_v37  ;;  %v4728_v40 = vrot.slane %v4720_v6, %v5658_v27  ;;  %4911 = vst [vmem:[%s5745_s17 + $0x538] sm:$0xff] %v1477_v63  ;;  %v2293_v19 = vcombine.high %v7769_v48, %v7788_v31  ;;  %v2429_v25 = vcombine.high %v7800_v41, %v7818_v26  ;;  %v9788_v48 = vld [vmem:[#allocation114_spill] sm:$0xff]  ;;  %v9789_v32 = vld [vmem:[#allocation111_spill] sm:$0xff] }
 0x187   : > { %4912 = vst [vmem:[%s5745_s17 + $0x540] sm:$0xff] %v1613_v1  ;;  %v2565_v29 = vcombine.high %v7830_v45, %v7860_v58  ;;  %4913 = vst [vmem:[%s5745_s17 + $0x548] sm:$0xff] %v1749_v2  ;;  %v2701_v42 = vcombine.high %v7870_v59, %v7890_v46  ;;  %v2837_v51 = vcombine.high %v7901_v24, %v7920_v8  ;;  %v9785_v59 = vld [vmem:[#allocation97_spill] sm:$0xff]  ;;  %v9790_v45 = vld [vmem:[#allocation126_spill] sm:$0xff] }
 0x188   : > { %4914 = vst [vmem:[%s5745_s17 + $0x550] sm:$0xff] %v1885_v10  ;;  %4915 = vst [vmem:[%s5745_s17 + $0x558] sm:$0xff] %v2021_v3  ;;  %v2973_v53 = vcombine.high %v7932_v62, %v7950_v35  ;;  %v3109_v43 = vcombine.high %v7962_v5, %v7992_v34  ;;  %v4740_v20 = vcombine.low %v8358_v13, %v4728_v40  ;;  %v9791_v41 = vld [vmem:[#allocation121_spill] sm:$0xff]  ;;  %v9792_v58 = vld [vmem:[#allocation135_spill] sm:$0xff] }
 0x189   : > { %4916 = vst [vmem:[%s5745_s17 + $0x560] sm:$0xff] %v2157_v36  ;;  %4917 = vst [vmem:[%s5745_s17 + $0x568] sm:$0xff] %v2293_v19  ;;  %v3245_v21 = vcombine.high %v9785_v59, %v8022_v12  ;;  %v3381_v33 = vcombine.high %v9787_v60, %v9786_v38  ;;  %v3517_v31 = vcombine.high %v9789_v32, %v9788_v48  ;;  %v9793_v24 = vld [vmem:[#allocation128_spill] sm:$0xff]  ;;  %v9794_v8 = vld [vmem:[#allocation145_spill] sm:$0xff] }
 0x18a   : > { %4918 = vst [vmem:[%s5745_s17 + $0x570] sm:$0xff] %v2429_v25  ;;  %4919 = vst [vmem:[%s5745_s17 + $0x578] sm:$0xff] %v2565_v29  ;;  %v3653_v26 = vcombine.high %v9791_v41, %v9790_v45  ;;  %v3789_v46 = vcombine.high %v9793_v24, %v9792_v58  ;;  %v9795_v5 = vld [vmem:[#allocation138_spill] sm:$0xff]  ;;  %v9796_v35 = vld [vmem:[#allocation91_spill] sm:$0xff]  ;;  %v4197_v39 = vcombine.high %v9799_v57, %v9798_v14 }
 0x18b   : > { %4920 = vst [vmem:[%s5745_s17 + $0x580] sm:$0xff] %v2701_v42  ;;  %4921 = vst [vmem:[%s5745_s17 + $0x588] sm:$0xff] %v2837_v51  ;;  %v3925_v62 = vcombine.high %v9795_v5, %v9794_v8  ;;  %v9797_v34 = vld [vmem:[#allocation146_spill] sm:$0xff]  ;;  %v4333_v4 = vcombine.high %v8266_v16, %v8286_v56  ;;  %v4469_v22 = vcombine.high %v8297_v15, %v8316_v61  ;;  %v9803_v49 = vld [vmem:[#allocation137_spill] sm:$0xff] }
 0x18c   : > { %4922 = vst [vmem:[%s5745_s17 + $0x590] sm:$0xff] %v2973_v53  ;;  %4923 = vst [vmem:[%s5745_s17 + $0x598] sm:$0xff] %v3109_v43  ;;  %v4061_v12 = vcombine.high %v9797_v34, %v9796_v35  ;;  %v4605_v54 = vcombine.high %v8328_v30, %v8346_v50  ;;  %v4741_v44 = vcombine.high %v8358_v13, %v4728_v40  ;;  %v9802_v9 = vld [vmem:[#allocation142_spill] sm:$0xff]  ;;  %v9804_v16 = vld [vmem:[#allocation9_spill] sm:$0xff] }
 0x18d   : > { %4903 = vst [vmem:[%s5745_s17 + $0x4f8] sm:$0xff] %v4740_v20  ;;  %4924 = vst [vmem:[%s5745_s17 + $0x5a0] sm:$0xff] %v3245_v21  ;;  %v473_v11 = vcombine.high %v9801_v7, %v9800_v18  ;;  %v505_v37 = vcombine.high %v9803_v49, %v9802_v9  ;;  %v9805_v56 = vld [vmem:[#allocation10_spill] sm:$0xff]  ;;  %v9806_v15 = vld [vmem:[#allocation11_spill] sm:$0xff] }
 0x18e   : > { %4925 = vst [vmem:[%s5745_s17 + $0x5a8] sm:$0xff] %v3381_v33  ;;  %4926 = vst [vmem:[%s5745_s17 + $0x5b0] sm:$0xff] %v3517_v31  ;;  %v609_v6 = vcombine.high %v9805_v56, %v9804_v16  ;;  %v9807_v61 = vld [vmem:[#allocation12_spill] sm:$0xff]  ;;  %v9808_v50 = vld [vmem:[#allocation13_spill] sm:$0xff] }
 0x18f   : > { %4927 = vst [vmem:[%s5745_s17 + $0x5b8] sm:$0xff] %v3653_v26  ;;  %4928 = vst [vmem:[%s5745_s17 + $0x5c0] sm:$0xff] %v3789_v46  ;;  %v641_v30 = vcombine.high %v9807_v61, %v9806_v15  ;;  %v9809_v63 = vld [vmem:[#allocation14_spill] sm:$0xff]  ;;  %v9810_v13 = vld [vmem:[#allocation15_spill] sm:$0xff]  ;;  %v8469_v19 = vrot.slane %v473_v11, %v5658_v27  ;;  %v8472_v25 = vrot.slane %v505_v37, %v5658_v27 }
 0x190   : > { %4929 = vst [vmem:[%s5745_s17 + $0x5c8] sm:$0xff] %v3925_v62  ;;  %4930 = vst [vmem:[%s5745_s17 + $0x5d0] sm:$0xff] %v4061_v12  ;;  %v745_v1 = vcombine.high %v9809_v63, %v9808_v50  ;;  %v9811_v2 = vld [vmem:[#allocation16_spill] sm:$0xff]  ;;  %v9812_v3 = vld [vmem:[#allocation17_spill] sm:$0xff]  ;;  %v8475_v29 = vrot.slane %v609_v6, %v5658_v27 }
 0x191   : > { %4931 = vst [vmem:[%s5745_s17 + $0x5d8] sm:$0xff] %v4197_v39  ;;  %4932 = vst [vmem:[%s5745_s17 + $0x5e0] sm:$0xff] %v4333_v4  ;;  %v777_v10 = vcombine.high %v9811_v2, %v9810_v13  ;;  %v9813_v36 = vld [vmem:[#allocation18_spill] sm:$0xff]  ;;  %v9814_v42 = vld [vmem:[#allocation19_spill] sm:$0xff]  ;;  %v8480_v43 = vrot.slane %v641_v30, %v5658_v27  ;;  %v526_v38 = vcombine.low %v8469_v19, %v8472_v25 }
 0x192   : > { %4933 = vst [vmem:[%s5745_s17 + $0x5e8] sm:$0xff] %v4469_v22  ;;  %4934 = vst [vmem:[%s5745_s17 + $0x5f0] sm:$0xff] %v4605_v54  ;;  %v881_v40 = vcombine.high %v9813_v36, %v9812_v3  ;;  %v9815_v51 = vld [vmem:[#allocation20_spill] sm:$0xff]  ;;  %v8483_v20 = vrot.slane %v745_v1, %v5658_v27  ;;  %v9816_v33 = vld [vmem:[#allocation21_spill] sm:$0xff] }
 0x193   : > { %4935 = vst [vmem:[%s5745_s17 + $0x5f8] sm:$0xff] %v4741_v44  ;;  %v913_v53 = vcombine.high %v9815_v51, %v9814_v42  ;;  %v8486_v59 = vrot.slane %v777_v10, %v5658_v27  ;;  %v9817_v48 = vld [vmem:[#allocation22_spill] sm:$0xff]  ;;  %v9818_v31 = vld [vmem:[#allocation23_spill] sm:$0xff]  ;;  %v9819_v45 = vld [vmem:[#allocation24_spill] sm:$0xff]  ;;  %v662_v26 = vcombine.low %v8475_v29, %v8480_v43 }
 0x194   : > { %v8489_v21 = vrot.slane %v881_v40, %v5658_v27  ;;  %v1017_v32 = vcombine.high %v9817_v48, %v9816_v33  ;;  %v1049_v41 = vcombine.high %v9819_v45, %v9818_v31  ;;  %v9820_v24 = vld [vmem:[#allocation25_spill] sm:$0xff]  ;;  %v9821_v46 = vld [vmem:[#allocation26_spill] sm:$0xff]  ;;  %v9822_v5 = vld [vmem:[#allocation27_spill] sm:$0xff]  ;;  %4936 = vst [vmem:[%s5745_s17 + $0x600] sm:$0xff] %v526_v38 }
 0x195   : > { %v8494_v60 = vrot.slane %v913_v53, %v5658_v27  ;;  %v798_v58 = vcombine.low %v8483_v20, %v8486_v59  ;;  %v1153_v8 = vcombine.high %v9821_v46, %v9820_v24  ;;  %v9823_v62 = vld [vmem:[#allocation28_spill] sm:$0xff]  ;;  %v9824_v57 = vld [vmem:[#allocation29_spill] sm:$0xff]  ;;  %v9825_v39 = vld [vmem:[#allocation30_spill] sm:$0xff]  ;;  %4937 = vst [vmem:[%s5745_s17 + $0x608] sm:$0xff] %v662_v26 }
 0x196   : > { %v1185_v35 = vcombine.high %v9823_v62, %v9822_v5  ;;  %v8512_v12 = vrot.slane %v1017_v32, %v5658_v27  ;;  %v8515_v14 = vrot.slane %v1049_v41, %v5658_v27  ;;  %v1289_v4 = vcombine.high %v9825_v39, %v9824_v57  ;;  %v9826_v44 = vld [vmem:[#allocation31_spill] sm:$0xff]  ;;  %v9827_v18 = vld [vmem:[#allocation32_spill] sm:$0xff]  ;;  %v9828_v11 = vld [vmem:[#allocation33_spill] sm:$0xff] }
 0x197   : > { %v934_v34 = vcombine.low %v8489_v21, %v8494_v60  ;;  %4938 = vst [vmem:[%s5745_s17 + $0x610] sm:$0xff] %v798_v58  ;;  %v8522_v22 = vrot.slane %v1153_v8, %v5658_v27  ;;  %v1321_v7 = vcombine.high %v9827_v18, %v9826_v44  ;;  %v9829_v9 = vld [vmem:[#allocation34_spill] sm:$0xff]  ;;  %v9830_v56 = vld [vmem:[#allocation35_spill] sm:$0xff]  ;;  %v9831_v6 = vld [vmem:[#allocation36_spill] sm:$0xff] }
 0x198   : > { %v8525_v54 = vrot.slane %v1185_v35, %v5658_v27  ;;  %v1425_v49 = vcombine.high %v9829_v9, %v9828_v11  ;;  %v1070_v37 = vcombine.low %v8512_v12, %v8515_v14  ;;  %v8535_v16 = vrot.slane %v1289_v4, %v5658_v27  ;;  %v9832_v61 = vld [vmem:[#allocation37_spill] sm:$0xff]  ;;  %v9833_v30 = vld [vmem:[#allocation38_spill] sm:$0xff]  ;;  %v9834_v2 = vld [vmem:[#allocation39_spill] sm:$0xff] }
 0x199   : > { %4939 = vst [vmem:[%s5745_s17 + $0x618] sm:$0xff] %v934_v34  ;;  %v1457_v15 = vcombine.high %v9831_v6, %v9830_v56  ;;  %v1561_v50 = vcombine.high %v9833_v30, %v9832_v61  ;;  %v8544_v1 = vrot.slane %v1321_v7, %v5658_v27  ;;  %v9835_v10 = vld [vmem:[#allocation40_spill] sm:$0xff]  ;;  %v9836_v42 = vld [vmem:[#allocation41_spill] sm:$0xff]  ;;  %v9837_v51 = vld [vmem:[#allocation42_spill] sm:$0xff] }
 0x19a   : > { %v1206_v63 = vcombine.low %v8522_v22, %v8525_v54  ;;  %v8547_v13 = vrot.slane %v1425_v49, %v5658_v27  ;;  %v1593_v3 = vcombine.high %v9835_v10, %v9834_v2  ;;  %4940 = vst [vmem:[%s5745_s17 + $0x620] sm:$0xff] %v1070_v37  ;;  %v1697_v53 = vcombine.high %v9837_v51, %v9836_v42  ;;  %v9838_v38 = vld [vmem:[#allocation43_spill] sm:$0xff]  ;;  %v9839_v33 = vld [vmem:[#allocation44_spill] sm:$0xff]  ;;  %v9840_v45 = vld [vmem:[#allocation45_spill] sm:$0xff] }
 0x19b   : > { %v8553_v36 = vrot.slane %v1457_v15, %v5658_v27  ;;  %v8556_v40 = vrot.slane %v1561_v50, %v5658_v27  ;;  %v1729_v48 = vcombine.high %v9839_v33, %v9838_v38  ;;  %v1342_v32 = vcombine.low %v8535_v16, %v8544_v1  ;;  %v9841_v41 = vld [vmem:[#allocation46_spill] sm:$0xff]  ;;  %v9842_v58 = vld [vmem:[#allocation47_spill] sm:$0xff]  ;;  %v9843_v24 = vld [vmem:[#allocation48_spill] sm:$0xff] }
 0x19c   : > { %4941 = vst [vmem:[%s5745_s17 + $0x628] sm:$0xff] %v1206_v63  ;;  %v8566_v31 = vrot.slane %v1593_v3, %v5658_v27  ;;  %v1833_v26 = vcombine.high %v9841_v41, %v9840_v45  ;;  %v1865_v46 = vcombine.high %v9843_v24, %v9842_v58  ;;  %v8575_v5 = vrot.slane %v1697_v53, %v5658_v27  ;;  %v9844_v35 = vld [vmem:[#allocation49_spill] sm:$0xff]  ;;  %v9845_v34 = vld [vmem:[#allocation50_spill] sm:$0xff]  ;;  %v9846_v18 = vld [vmem:[#allocation51_spill] sm:$0xff] }
 0x19d   : > { %v1478_v8 = vcombine.low %v8547_v13, %v8553_v36  ;;  %v8578_v62 = vrot.slane %v1729_v48, %v5658_v27  ;;  %v1969_v57 = vcombine.high %v9845_v34, %v9844_v35  ;;  %4942 = vst [vmem:[%s5745_s17 + $0x630] sm:$0xff] %v1342_v32  ;;  %v9847_v7 = vld [vmem:[#allocation52_spill] sm:$0xff]  ;;  %v9848_v37 = vld [vmem:[#allocation53_spill] sm:$0xff]  ;;  %v9849_v56 = vld [vmem:[#allocation54_spill] sm:$0xff] }
 0x19e   : > { %v1614_v39 = vcombine.low %v8556_v40, %v8566_v31  ;;  %v8586_v4 = vrot.slane %v1833_v26, %v5658_v27  ;;  %v8589_v44 = vrot.slane %v1865_v46, %v5658_v27  ;;  %v2001_v11 = vcombine.high %v9847_v7, %v9846_v18  ;;  %v9850_v15 = vld [vmem:[#allocation55_spill] sm:$0xff]  ;;  %v9851_v61 = vld [vmem:[#allocation56_spill] sm:$0xff]  ;;  %v9852_v2 = vld [vmem:[#allocation57_spill] sm:$0xff] }
 0x19f   : > { %4943 = vst [vmem:[%s5745_s17 + $0x638] sm:$0xff] %v1478_v8  ;;  %v1750_v9 = vcombine.low %v8575_v5, %v8578_v62  ;;  %v8597_v49 = vrot.slane %v1969_v57, %v5658_v27  ;;  %v2105_v6 = vcombine.high %v9849_v56, %v9848_v37  ;;  %v2137_v30 = vcombine.high %v9851_v61, %v9850_v15  ;;  %v9853_v10 = vld [vmem:[#allocation58_spill] sm:$0xff]  ;;  %v9854_v42 = vld [vmem:[#allocation59_spill] sm:$0xff]  ;;  %v9855_v51 = vld [vmem:[#allocation60_spill] sm:$0xff] }
 0x1a0   : > { %4944 = vst [vmem:[%s5745_s17 + $0x640] sm:$0xff] %v1614_v39  ;;  %v1886_v50 = vcombine.low %v8586_v4, %v8589_v44  ;;  %v8607_v63 = vrot.slane %v2001_v11, %v5658_v27  ;;  %v2241_v3 = vcombine.high %v9853_v10, %v9852_v2  ;;  %v2273_v53 = vcombine.high %v9855_v51, %v9854_v42  ;;  %v9856_v48 = vld [vmem:[#allocation61_spill] sm:$0xff]  ;;  %v9857_v32 = vld [vmem:[#allocation62_spill] sm:$0xff]  ;;  %v9858_v41 = vld [vmem:[#allocation63_spill] sm:$0xff] }
 0x1a1   : > { %4945 = vst [vmem:[%s5745_s17 + $0x648] sm:$0xff] %v1750_v9  ;;  %v8615_v38 = vrot.slane %v2105_v6, %v5658_v27  ;;  %v8618_v33 = vrot.slane %v2137_v30, %v5658_v27  ;;  %v2377_v45 = vcombine.high %v9857_v32, %v9856_v48  ;;  %v9859_v26 = vld [vmem:[#allocation64_spill] sm:$0xff]  ;;  %v9860_v35 = vld [vmem:[#allocation65_spill] sm:$0xff]  ;;  %v9861_v34 = vld [vmem:[#allocation66_spill] sm:$0xff] }
 0x1a2   : > { %v2409_v58 = vcombine.high %v9859_v26, %v9858_v41  ;;  %4946 = vst [vmem:[%s5745_s17 + $0x650] sm:$0xff] %v1886_v50  ;;  %v2022_v24 = vcombine.low %v8597_v49, %v8607_v63  ;;  %v8628_v46 = vrot.slane %v2241_v3, %v5658_v27  ;;  %v8631_v8 = vrot.slane %v2273_v53, %v5658_v27  ;;  %v9862_v11 = vld [vmem:[#allocation67_spill] sm:$0xff]  ;;  %v9863_v9 = vld [vmem:[#allocation68_spill] sm:$0xff]  ;;  %v9864_v15 = vld [vmem:[#allocation69_spill] sm:$0xff] }
 0x1a3   : > { %v2513_v57 = vcombine.high %v9861_v34, %v9860_v35  ;;  %v2158_v39 = vcombine.low %v8615_v38, %v8618_v33  ;;  %v8638_v18 = vrot.slane %v2377_v45, %v5658_v27  ;;  %v2545_v37 = vcombine.high %v9863_v9, %v9862_v11  ;;  %v9865_v61 = vld [vmem:[#allocation70_spill] sm:$0xff]  ;;  %v9866_v50 = vld [vmem:[#allocation71_spill] sm:$0xff]  ;;  %v9867_v2 = vld [vmem:[#allocation72_spill] sm:$0xff] }
 0x1a4   : > { %v8641_v7 = vrot.slane %v2409_v58, %v5658_v27  ;;  %4947 = vst [vmem:[%s5745_s17 + $0x658] sm:$0xff] %v2022_v24  ;;  %v2294_v56 = vcombine.low %v8628_v46, %v8631_v8  ;;  %v2649_v30 = vcombine.high %v9865_v61, %v9864_v15  ;;  %v2681_v10 = vcombine.high %v9867_v2, %v9866_v50  ;;  %v9868_v51 = vld [vmem:[#allocation73_spill] sm:$0xff]  ;;  %v9869_v53 = vld [vmem:[#allocation74_spill] sm:$0xff]  ;;  %v9870_v32 = vld [vmem:[#allocation75_spill] sm:$0xff] }
 0x1a5   : > { %v8649_v6 = vrot.slane %v2513_v57, %v5658_v27  ;;  %4948 = vst [vmem:[%s5745_s17 + $0x660] sm:$0xff] %v2158_v39  ;;  %v8659_v42 = vrot.slane %v2545_v37, %v5658_v27  ;;  %v2785_v48 = vcombine.high %v9869_v53, %v9868_v51  ;;  %v9871_v45 = vld [vmem:[#allocation76_spill] sm:$0xff]  ;;  %v9872_v24 = vld [vmem:[#allocation77_spill] sm:$0xff]  ;;  %v9873_v35 = vld [vmem:[#allocation78_spill] sm:$0xff] }
 0x1a6   : > { %v2430_v3 = vcombine.low %v8638_v18, %v8641_v7  ;;  %v2817_v41 = vcombine.high %v9871_v45, %v9870_v32  ;;  %4949 = vst [vmem:[%s5745_s17 + $0x668] sm:$0xff] %v2294_v56  ;;  %v8667_v26 = vrot.slane %v2649_v30, %v5658_v27  ;;  %v8670_v58 = vrot.slane %v2681_v10, %v5658_v27  ;;  %v9874_v57 = vld [vmem:[#allocation79_spill] sm:$0xff]  ;;  %v9875_v39 = vld [vmem:[#allocation80_spill] sm:$0xff]  ;;  %v9876_v15 = vld [vmem:[#allocation81_spill] sm:$0xff] }
 0x1a7   : > { %v2921_v34 = vcombine.high %v9873_v35, %v9872_v24  ;;  %v2953_v11 = vcombine.high %v9875_v39, %v9874_v57  ;;  %v2566_v9 = vcombine.low %v8649_v6, %v8659_v42  ;;  %v8680_v37 = vrot.slane %v2785_v48, %v5658_v27  ;;  %v9877_v61 = vld [vmem:[#allocation82_spill] sm:$0xff]  ;;  %v9881_v51 = vld [vmem:[#allocation85_spill] sm:$0xff]  ;;  %v9883_v45 = vld [vmem:[#allocation87_spill] sm:$0xff] }
 0x1a8   : > { %4950 = vst [vmem:[%s5745_s17 + $0x670] sm:$0xff] %v2430_v3  ;;  %v8683_v56 = vrot.slane %v2817_v41, %v5658_v27  ;;  %v3057_v30 = vcombine.high %v9877_v61, %v9876_v15  ;;  %v2702_v50 = vcombine.low %v8667_v26, %v8670_v58  ;;  %v9880_v3 = vld [vmem:[#allocation84_spill] sm:$0xff]  ;;  %v9885_v35 = vld [vmem:[#allocation90_spill] sm:$0xff]  ;;  %v9889_v15 = vld [vmem:[#allocation95_spill] sm:$0xff] }
 0x1a9   : > { %v8690_v2 = vrot.slane %v2921_v34, %v5658_v27  ;;  %v8693_v10 = vrot.slane %v2953_v11, %v5658_v27  ;;  %v3089_v53 = vcombine.high %v9881_v51, %v9880_v3  ;;  %4951 = vst [vmem:[%s5745_s17 + $0x678] sm:$0xff] %v2566_v9  ;;  %v9884_v41 = vld [vmem:[#allocation88_spill] sm:$0xff]  ;;  %v9888_v9 = vld [vmem:[#allocation93_spill] sm:$0xff] }
 0x1aa   : > { %v2838_v48 = vcombine.low %v8680_v37, %v8683_v56  ;;  %v8701_v32 = vrot.slane %v3057_v30, %v5658_v27  ;;  %v3193_v24 = vcombine.high %v9884_v41, %v9883_v45  ;;  %v9886_v34 = vld [vmem:[#allocation92_spill] sm:$0xff]  ;;  %4952 = vst [vmem:[%s5745_s17 + $0x680] sm:$0xff] %v2702_v50  ;;  %v3329_v61 = vcombine.high %v9889_v15, %v9888_v9  ;;  %v9894_v50 = vld [vmem:[#allocation103_spill] sm:$0xff] }
 0x1ab   : > { %9878 = vst [vmem:[#allocation118_spill] sm:$0xff] %v8690_v2  ;;  %9879 = vst [vmem:[#allocation134_spill] sm:$0xff] %v8693_v10  ;;  %v3225_v57 = vcombine.high %v9886_v34, %v9885_v35  ;;  %v2974_v39 = vcombine.low %v8690_v2, %v8693_v10  ;;  %v8711_v11 = vrot.slane %v3089_v53, %v5658_v27  ;;  %v9890_v3 = vld [vmem:[#allocation100_spill] sm:$0xff]  ;;  %v9895_v35 = vld [vmem:[#allocation98_spill] sm:$0xff] }
 0x1ac   : > { %9882 = vst [vmem:[#allocation125_spill] sm:$0xff] %v8701_v32  ;;  %v9891_v51 = vld [vmem:[#allocation96_spill] sm:$0xff]  ;;  %4953 = vst [vmem:[%s5745_s17 + $0x688] sm:$0xff] %v2838_v48  ;;  %v8719_v45 = vrot.slane %v3193_v24, %v5658_v27  ;;  %v3465_v34 = vcombine.high %v9895_v35, %v9894_v50  ;;  %v9897_v53 = vld [vmem:[#allocation106_spill] sm:$0xff]  ;;  %v8732_v15 = vrot.slane %v3329_v61, %v5658_v27 }
 0x1ad   : > { %9887 = vst [vmem:[#allocation8_spill] sm:$0xff] %v8711_v11  ;;  %v3361_v30 = vcombine.high %v9891_v51, %v9890_v3  ;;  %v8722_v41 = vrot.slane %v3225_v57, %v5658_v27  ;;  %v9896_v2 = vld [vmem:[#allocation104_spill] sm:$0xff]  ;;  %4954 = vst [vmem:[%s5745_s17 + $0x690] sm:$0xff] %v2974_v39  ;;  %v3110_v9 = vcombine.low %v8701_v32, %v8711_v11  ;;  %v9904_v39 = vld [vmem:[#allocation119_spill] sm:$0xff] }
 0x1ae   : > { %9892 = vst [vmem:[#allocation97_spill] sm:$0xff] %v8719_v45  ;;  %v3497_v10 = vcombine.high %v9897_v53, %v9896_v2  ;;  %9898 = vst [vmem:[#allocation102_spill] sm:$0xff] %v8732_v15  ;;  %v9900_v24 = vld [vmem:[#allocation112_spill] sm:$0xff]  ;;  %v8742_v50 = vrot.slane %v3465_v34, %v5658_v27 }
 0x1af   : > { %9893 = vst [vmem:[#allocation109_spill] sm:$0xff] %v8722_v41  ;;  %v8735_v48 = vrot.slane %v3361_v30, %v5658_v27  ;;  %v9901_v57 = vld [vmem:[#allocation108_spill] sm:$0xff]  ;;  %v3246_v51 = vcombine.low %v8719_v45, %v8722_v41  ;;  %4955 = vst [vmem:[%s5745_s17 + $0x698] sm:$0xff] %v3110_v9  ;;  %v9909_v41 = vld [vmem:[#allocation122_spill] sm:$0xff] }
 0x1b0   : > { %v3601_v3 = vcombine.high %v9901_v57, %v9900_v24  ;;  %9902 = vst [vmem:[#allocation111_spill] sm:$0xff] %v8742_v50  ;;  %v8745_v2 = vrot.slane %v3497_v10, %v5658_v27  ;;  %v9905_v35 = vld [vmem:[#allocation116_spill] sm:$0xff]  ;;  %v9908_v57 = vld [vmem:[#allocation117_spill] sm:$0xff]  ;;  %v9912_v9 = vld [vmem:[#allocation130_spill] sm:$0xff] }
 0x1b1   : > { %9899 = vst [vmem:[#allocation114_spill] sm:$0xff] %v8735_v48  ;;  %v3633_v61 = vcombine.high %v9905_v35, %v9904_v39  ;;  %v3382_v30 = vcombine.low %v8732_v15, %v8735_v48  ;;  %v9907_v24 = vld [vmem:[#allocation120_spill] sm:$0xff]  ;;  %4956 = vst [vmem:[%s5745_s17 + $0x6a0] sm:$0xff] %v3246_v51  ;;  %v9913_v35 = vld [vmem:[#allocation127_spill] sm:$0xff] }
 0x1b2   : > { %9903 = vst [vmem:[#allocation126_spill] sm:$0xff] %v8745_v2  ;;  %v8753_v53 = vrot.slane %v3601_v3, %v5658_v27  ;;  %v3737_v45 = vcombine.high %v9908_v57, %v9907_v24  ;;  %v9910_v34 = vld [vmem:[#allocation124_spill] sm:$0xff]  ;;  %v3518_v10 = vcombine.low %v8742_v50, %v8745_v2  ;;  %v3873_v11 = vcombine.high %v9913_v35, %v9912_v9  ;;  %v9915_v48 = vld [vmem:[#allocation133_spill] sm:$0xff] }
 0x1b3   : > { %v3769_v32 = vcombine.high %v9910_v34, %v9909_v41  ;;  %v8763_v39 = vrot.slane %v3633_v61, %v5658_v27  ;;  %v9914_v15 = vld [vmem:[#allocation132_spill] sm:$0xff]  ;;  %4957 = vst [vmem:[%s5745_s17 + $0x6a8] sm:$0xff] %v3382_v30  ;;  %v9920_v50 = vld [vmem:[#allocation141_spill] sm:$0xff]  ;;  %v9921_v61 = vld [vmem:[#allocation143_spill] sm:$0xff] }
 0x1b4   : > { %9906 = vst [vmem:[#allocation121_spill] sm:$0xff] %v8753_v53  ;;  %v3905_v3 = vcombine.high %v9915_v48, %v9914_v15  ;;  %v8771_v24 = vrot.slane %v3737_v45, %v5658_v27  ;;  %v9918_v51 = vld [vmem:[#allocation140_spill] sm:$0xff]  ;;  %v4041_v2 = vcombine.high %v9921_v61, %v9920_v50  ;;  %4958 = vst [vmem:[%s5745_s17 + $0x6b0] sm:$0xff] %v3518_v10  ;;  %v9923_v48 = vld [vmem:[#allocation147_spill] sm:$0xff] }
 0x1b5   : > { %9911 = vst [vmem:[#allocation135_spill] sm:$0xff] %v8763_v39  ;;  %v8774_v41 = vrot.slane %v3769_v32, %v5658_v27  ;;  %v9919_v57 = vld [vmem:[#allocation136_spill] sm:$0xff]  ;;  %v3654_v9 = vcombine.low %v8753_v53, %v8763_v39  ;;  %v8784_v15 = vrot.slane %v3873_v11, %v5658_v27  ;;  %v9925_v10 = vld [vmem:[#allocation83_spill] sm:$0xff] }
 0x1b6   : > { %9916 = vst [vmem:[#allocation128_spill] sm:$0xff] %v8771_v24  ;;  %v4009_v34 = vcombine.high %v9919_v57, %v9918_v51  ;;  %v8787_v45 = vrot.slane %v3905_v3, %v5658_v27  ;;  %v9924_v32 = vld [vmem:[#allocation144_spill] sm:$0xff]  ;;  %v8797_v50 = vrot.slane %v4041_v2, %v5658_v27  ;;  %v9926_v57 = vld [vmem:[#allocation86_spill] sm:$0xff] }
 0x1b7   : > { %9917 = vst [vmem:[#allocation145_spill] sm:$0xff] %v8774_v41  ;;  %9922 = vst [vmem:[#allocation138_spill] sm:$0xff] %v8784_v15  ;;  %v4145_v30 = vcombine.high %v9924_v32, %v9923_v48  ;;  %v3790_v35 = vcombine.low %v8771_v24, %v8774_v41  ;;  %v4177_v11 = vcombine.high %v9926_v57, %v9925_v10  ;;  %v9927_v48 = vld [vmem:[#allocation105_spill] sm:$0xff]  ;;  %v9928_v32 = vld [vmem:[#allocation99_spill] sm:$0xff] }
 0x1b8   : > { %v8794_v51 = vrot.slane %v4009_v34, %v5658_v27  ;;  %4959 = vst [vmem:[%s5745_s17 + $0x6b8] sm:$0xff] %v3654_v9  ;;  %v3926_v3 = vcombine.low %v8784_v15, %v8787_v45  ;;  %v4281_v24 = vcombine.high %v9928_v32, %v9927_v48  ;;  %v9929_v41 = vld [vmem:[#allocation110_spill] sm:$0xff]  ;;  %v9931_v9 = vld [vmem:[#allocation107_spill] sm:$0xff]  ;;  %v9932_v57 = vld [vmem:[#allocation101_spill] sm:$0xff] }
 0x1b9   : > { %v8805_v61 = vrot.slane %v4145_v30, %v5658_v27  ;;  %v9930_v34 = vld [vmem:[#allocation94_spill] sm:$0xff]  ;;  %4960 = vst [vmem:[%s5745_s17 + $0x6c0] sm:$0xff] %v3790_v35  ;;  %v8815_v10 = vrot.slane %v4177_v11, %v5658_v27  ;;  %v4417_v39 = vcombine.high %v9932_v57, %v9931_v9  ;;  %v9933_v15 = vld [vmem:[#allocation123_spill] sm:$0xff]  ;;  %v9934_v35 = vld [vmem:[#allocation129_spill] sm:$0xff]  ;;  %v4585_v11 = vcombine.high %v8308_v17, %v8311_v52 }
 0x1ba   : > { %v4313_v53 = vcombine.high %v9930_v34, %v9929_v41  ;;  %v4062_v2 = vcombine.low %v8794_v51, %v8797_v50  ;;  %v4449_v30 = vcombine.high %v9933_v15, %v8278_v0  ;;  %4961 = vst [vmem:[%s5745_s17 + $0x6c8] sm:$0xff] %v3926_v3  ;;  %v8823_v48 = vrot.slane %v4281_v24, %v5658_v27  ;;  %v9935_v32 = vld [vmem:[#allocation113_spill] sm:$0xff] }
 0x1bb   : > { %v4553_v34 = vcombine.high %v9935_v32, %v9934_v35  ;;  %v4198_v9 = vcombine.low %v8805_v61, %v8815_v10  ;;  %v8836_v0 = vrot.slane %v4417_v39, %v5658_v27  ;;  %v8849_v52 = vrot.slane %v4585_v11, %v5658_v27 }
 0x1bc   : > { %v8826_v41 = vrot.slane %v4313_v53, %v5658_v27  ;;  %4962 = vst [vmem:[%s5745_s17 + $0x6d0] sm:$0xff] %v4062_v2  ;;  %v8839_v24 = vrot.slane %v4449_v30, %v5658_v27  ;;  %v4689_v53 = vcombine.high %v8319_v28, %v8322_v23  ;;  %v4721_v39 = vcombine.high %v8339_v47, %v8349_v55 }
 0x1bd   : > { %v8846_v17 = vrot.slane %v4553_v34, %v5658_v27  ;;  %4963 = vst [vmem:[%s5745_s17 + $0x6d8] sm:$0xff] %v4198_v9  ;;  %v527_v23 = vcombine.high %v8469_v19, %v8472_v25  ;;  %v663_v2 = vcombine.high %v8475_v29, %v8480_v43  ;;  %v799_v57 = vcombine.high %v8483_v20, %v8486_v59 }
 0x1be   : > { %v4334_v15 = vcombine.low %v8823_v48, %v8826_v41  ;;  %v4470_v3 = vcombine.low %v8836_v0, %v8839_v24  ;;  %v8857_v28 = vrot.slane %v4689_v53, %v5658_v27  ;;  %v8867_v55 = vrot.slane %v4721_v39, %v5658_v27 }
 0x1bf   : > { %v4606_v47 = vcombine.low %v8846_v17, %v8849_v52  ;;  %v935_v30 = vcombine.high %v8489_v21, %v8494_v60  ;;  %4968 = vst [vmem:[%s5745_s17 + $0x700] sm:$0xff] %v527_v23  ;;  %4969 = vst [vmem:[%s5745_s17 + $0x708] sm:$0xff] %v663_v2  ;;  %v1071_v19 = vcombine.high %v8512_v12, %v8515_v14 }
 0x1c0   : > { %4964 = vst [vmem:[%s5745_s17 + $0x6e0] sm:$0xff] %v4334_v15  ;;  %4965 = vst [vmem:[%s5745_s17 + $0x6e8] sm:$0xff] %v4470_v3  ;;  %v1207_v27 = vcombine.high %v8522_v22, %v8525_v54  ;;  %v1343_v25 = vcombine.high %v8535_v16, %v8544_v1  ;;  %v1479_v29 = vcombine.high %v8547_v13, %v8553_v36  ;;  %v9936_v13 = vld [vmem:[#allocation134_spill] sm:$0xff] }
 0x1c1   : > { %4966 = vst [vmem:[%s5745_s17 + $0x6f0] sm:$0xff] %v4606_v47  ;;  %v4742_v43 = vcombine.low %v8857_v28, %v8867_v55  ;;  %4970 = vst [vmem:[%s5745_s17 + $0x710] sm:$0xff] %v799_v57  ;;  %v1615_v20 = vcombine.high %v8556_v40, %v8566_v31  ;;  %v1751_v59 = vcombine.high %v8575_v5, %v8578_v62  ;;  %v9937_v36 = vld [vmem:[#allocation118_spill] sm:$0xff]  ;;  %v9938_v31 = vld [vmem:[#allocation8_spill] sm:$0xff] }
 0x1c2   : > { %4971 = vst [vmem:[%s5745_s17 + $0x718] sm:$0xff] %v935_v30  ;;  %v1887_v21 = vcombine.high %v8586_v4, %v8589_v44  ;;  %4972 = vst [vmem:[%s5745_s17 + $0x720] sm:$0xff] %v1071_v19  ;;  %v2023_v60 = vcombine.high %v8597_v49, %v8607_v63  ;;  %v2159_v12 = vcombine.high %v8615_v38, %v8618_v33  ;;  %v9939_v5 = vld [vmem:[#allocation125_spill] sm:$0xff]  ;;  %v9942_v63 = vld [vmem:[#allocation114_spill] sm:$0xff] }
 0x1c3   : > { %4973 = vst [vmem:[%s5745_s17 + $0x728] sm:$0xff] %v1207_v27  ;;  %4974 = vst [vmem:[%s5745_s17 + $0x730] sm:$0xff] %v1343_v25  ;;  %v2295_v14 = vcombine.high %v8628_v46, %v8631_v8  ;;  %v2431_v22 = vcombine.high %v8638_v18, %v8641_v7  ;;  %v2567_v54 = vcombine.high %v8649_v6, %v8659_v42  ;;  %v9940_v4 = vld [vmem:[#allocation109_spill] sm:$0xff]  ;;  %v9943_v38 = vld [vmem:[#allocation102_spill] sm:$0xff] }
 0x1c4   : > { %4975 = vst [vmem:[%s5745_s17 + $0x738] sm:$0xff] %v1479_v29  ;;  %4967 = vst [vmem:[%s5745_s17 + $0x6f8] sm:$0xff] %v4742_v43  ;;  %v2703_v16 = vcombine.high %v8667_v26, %v8670_v58  ;;  %v2839_v1 = vcombine.high %v8680_v37, %v8683_v56  ;;  %v2975_v40 = vcombine.high %v9937_v36, %v9936_v13  ;;  %v9941_v44 = vld [vmem:[#allocation97_spill] sm:$0xff]  ;;  %v9944_v46 = vld [vmem:[#allocation126_spill] sm:$0xff] }
 0x1c5   : > { %4976 = vst [vmem:[%s5745_s17 + $0x740] sm:$0xff] %v1615_v20  ;;  %4977 = vst [vmem:[%s5745_s17 + $0x748] sm:$0xff] %v1751_v59  ;;  %v3111_v62 = vcombine.high %v9939_v5, %v9938_v31  ;;  %v3247_v49 = vcombine.high %v9941_v44, %v9940_v4  ;;  %v3383_v33 = vcombine.high %v9943_v38, %v9942_v63  ;;  %v9945_v8 = vld [vmem:[#allocation111_spill] sm:$0xff]  ;;  %v9947_v6 = vld [vmem:[#allocation121_spill] sm:$0xff] }
 0x1c6   : > { %4978 = vst [vmem:[%s5745_s17 + $0x750] sm:$0xff] %v1887_v21  ;;  %4979 = vst [vmem:[%s5745_s17 + $0x758] sm:$0xff] %v2023_v60  ;;  %v3519_v18 = vcombine.high %v9945_v8, %v9944_v46  ;;  %v9946_v7 = vld [vmem:[#allocation135_spill] sm:$0xff]  ;;  %v9948_v26 = vld [vmem:[#allocation145_spill] sm:$0xff]  ;;  %v4063_v32 = vcombine.high %v8794_v51, %v8797_v50  ;;  %v4199_v34 = vcombine.high %v8805_v61, %v8815_v10 }
 0x1c7   : > { %4980 = vst [vmem:[%s5745_s17 + $0x760] sm:$0xff] %v2159_v12  ;;  %4981 = vst [vmem:[%s5745_s17 + $0x768] sm:$0xff] %v2295_v14  ;;  %v3655_v42 = vcombine.high %v9947_v6, %v9946_v7  ;;  %v9949_v58 = vld [vmem:[#allocation128_spill] sm:$0xff]  ;;  %v9950_v56 = vld [vmem:[#allocation138_spill] sm:$0xff]  ;;  %v4335_v11 = vcombine.high %v8823_v48, %v8826_v41  ;;  %v4607_v51 = vcombine.high %v8846_v17, %v8849_v52 }
 0x1c8   : > { %4982 = vst [vmem:[%s5745_s17 + $0x770] sm:$0xff] %v2431_v22  ;;  %4983 = vst [vmem:[%s5745_s17 + $0x778] sm:$0xff] %v2567_v54  ;;  %v3791_v37 = vcombine.high %v9949_v58, %v9948_v26  ;;  %v3927_v35 = vcombine.high %v9950_v56, %v8787_v45  ;;  %v4471_v45 = vcombine.high %v8836_v0, %v8839_v24 }
 0x1c9   : > { %4984 = vst [vmem:[%s5745_s17 + $0x780] sm:$0xff] %v2703_v16  ;;  %4985 = vst [vmem:[%s5745_s17 + $0x788] sm:$0xff] %v2839_v1  ;;  %v4743_v50 = vcombine.high %v8857_v28, %v8867_v55 }
 0x1ca   : > { %4986 = vst [vmem:[%s5745_s17 + $0x790] sm:$0xff] %v2975_v40  ;;  %4987 = vst [vmem:[%s5745_s17 + $0x798] sm:$0xff] %v3111_v62 }
 0x1cb   : > { %4988 = vst [vmem:[%s5745_s17 + $0x7a0] sm:$0xff] %v3247_v49  ;;  %4989 = vst [vmem:[%s5745_s17 + $0x7a8] sm:$0xff] %v3383_v33 }
 0x1cc   : > { %4990 = vst [vmem:[%s5745_s17 + $0x7b0] sm:$0xff] %v3519_v18  ;;  %4991 = vst [vmem:[%s5745_s17 + $0x7b8] sm:$0xff] %v3655_v42 }
 0x1cd   : > { %4992 = vst [vmem:[%s5745_s17 + $0x7c0] sm:$0xff] %v3791_v37  ;;  %4993 = vst [vmem:[%s5745_s17 + $0x7c8] sm:$0xff] %v3927_v35 }
 0x1ce   : > { %4994 = vst [vmem:[%s5745_s17 + $0x7d0] sm:$0xff] %v4063_v32  ;;  %4995 = vst [vmem:[%s5745_s17 + $0x7d8] sm:$0xff] %v4199_v34 }
 0x1cf   : > { %4996 = vst [vmem:[%s5745_s17 + $0x7e0] sm:$0xff] %v4335_v11  ;;  %4997 = vst [vmem:[%s5745_s17 + $0x7e8] sm:$0xff] %v4471_v45 }
 0x1d0   : > { %4998 = vst [vmem:[%s5745_s17 + $0x7f0] sm:$0xff] %v4607_v51  ;;  %4999 = vst [vmem:[%s5745_s17 + $0x7f8] sm:$0xff] %v4743_v50 }
 0x1d1   : > { %5456 = shalt.err (!%p5453_p9)
}
 0x1d2   : > { %s5457_s14 = scalar_lea.hbm %s8960_s29, 32768  ;;  %s5461_s21 = scalar_lea.hbm %s9016_s1, 262144 }
 0x1d3   : > { %p5458_p0 = scmp.ne.s32.totalorder %s8960_s29, %s5457_s14  ;;  %p5462_p1 = scmp.lt.s32.totalorder %s8960_s29, %s9016_s1 }
 0x1d4   : > { %p5463_p3 = scmp.lt.s32.totalorder %s5461_s21, %s5457_s14 }
 0x1d5   : > { %p5459_p2 = pnand %p5458_p0, %p9951_p11 }
 0x1d6   : > { %p5464_p6 = por %p5463_p3, %p5462_p1 }
 0x1d7   : > { %p5460_p13 = pneg %p5459_p2 }
 0x1d9   : > { %p5465_p10 = pnand %p5464_p6, %p5460_p13 }
 0x1db   : > { %5468 = shalt.err (!%p5465_p10)
}
 0x1dc   : > { %s5516_s26 = smov 4096   ;;  %s5517_s30 = smov 256  }
 0x1dd   : > { %5108 = dma.vmem_to_hbm [thread:$0]  (%p9951_p11), %s8962_s27, 32768, %s8960_s29, %s5001_s3, %s5516_s26, %s5516_s26, %s5517_s30  }
 0x1de PF: > { %p5119_p12 = scmp.ge.s32.totalorder %s5507_s9, 2  ;;  %s5030_s2 = sand.u32 1, %s5495_s6  }
 0x1df   : > { %p9952_p4 = scmp.ne.s32.totalorder %s9331_s19, 0  ;;  %s5031_s17 = scalar_lea.sflag [#allocation4], %s5030_s2 }
 0x1e1   : > { %p5115_p5 = pnand %p5119_p12, %p9952_p4 }
 0x1e3   : > { %p5116_p7 = pneg %p5115_p5 }
 0x1e5   : > { %5490 = dma.done.wait (%p5116_p7), %s5031_s17, 32768  }
 0x1e6   : > { %5492 = vsyncadd (%p5116_p7), %s5031_s17, 4294934528  ;;  %p14_p8 = scmp.ge.s32.totalorder %s5553_s12, 10   ;;  %s9953_s6 = smov %s5499_s7 }
 0x1e7   : > { %s9954_s7 = smov %s5503_s8  ;;  %s9955_s8 = smov %s5565_s15 }
 0x1e8   : > { %s9956_s9 = smov %s5553_s12  ;;  %16 = sbr.rel (!%p14_p8) target bundleno = 5 (0x5), region = 69 }
 0x1ed   :  { %5036 = vsyncpa [#allocation3], 1 }
 0x1ee   :  { %5038 = vsyncpa [#allocation3 + $0x1], 1 }
 0x1ef   :  { %5039 = vsyncpa [#allocation4], 1 }
 0x1f0   :  { %5041 = vsyncpa [#allocation4 + $0x1], 1 }

</bundles_post_ra>
